<compile_context>
chip_gen: v6e
topology: v6e:2x2x1
jax: 0.10.0
libtpu: 0.0.40
codegen_flags: <defaults>
</compile_context>

<pallas_src>
import jax
import jax.numpy as jnp
from jax import lax
from jax.experimental import pallas as pl
from jax.experimental.pallas import tpu as pltpu


def _rasterize_sum_kernel(coords_ref, params_ref, featT_ref, out_ref, acc_ref):
    """One (row-tile i, gaussian-chunk k) grid step of the sum rasterizer.

    coords_ref: (2, P)      rows = [pixel x, pixel y] for this row tile (P = TH*W)
    params_ref: (NT, 8)     cols = [cx, cy, 0.5*conic_x, conic_y, 0.5*conic_z, opac_eff, 0, 0]
    featT_ref:  (8, NT)     per-gaussian RGB (rows 0..2), zero-padded to 8 rows
    out_ref:    (3, P)      lane-dense output slab for this row tile
    acc_ref:    (8, P) f32  accumulator scratch, persists across the k (gaussian) axis
    """
    k = pl.program_id(1)

    @pl.when(k == 0)
    def _():
        acc_ref[...] = jnp.zeros_like(acc_ref)

    px = coords_ref[0:1, :]                       # (1, P)
    py = coords_ref[1:2, :]                       # (1, P)

    p = params_ref[...]                           # (NT, 8)
    cx = p[:, 0:1]
    cy = p[:, 1:2]
    a_half = p[:, 2:3]                            # 0.5 * conic_x
    b_con = p[:, 3:4]                             # conic_y
    c_half = p[:, 4:5]                            # 0.5 * conic_z
    opac = p[:, 5:6]                              # opacity (0 for invalid / padded gaussians)

    # Direct quadratic form on the VPU (no large-term cancellation).
    dx = cx - px                                  # (NT, P)
    dy = cy - py
    sigma = (a_half * dx) * dx + (c_half * dy) * dy + (b_con * dx) * dy

    w = opac * jnp.exp(-sigma)
    keep = jnp.logical_and(sigma >= 0.0, w >= (1.0 / 255.0))
    alpha = jnp.where(keep, jnp.minimum(w, 0.999), 0.0)

    # (8, NT) @ (NT, P) -> (8, P) on the MXU; rows 3..7 are zeros.
    acc_ref[...] += jnp.dot(featT_ref[...], alpha,
                            preferred_element_type=jnp.float32)

    @pl.when(k == pl.num_programs(1) - 1)
    def _():
        out_ref[...] = jnp.clip(acc_ref[0:3, :], 0.0, 1.0)


def gaussianimage_cholesky_render(_xyz, _cholesky, _features_dc, _opacity,
                                  H, W, *, tile_h=8, n_tile=128):
    """Pallas implementation of GaussianImage_Cholesky.forward(). Returns {'render': NCHW}.

    tile_h: rows per output tile (keep H//tile_h >= 2-4 so v7x's two TensorCores stay busy).
    n_tile: gaussians per reduction chunk (multiple of 128); bounds per-step VMEM so large
            N models stay within v7x's 64 MiB VMEM.
    """
    f32 = jnp.float32
    N = _xyz.shape[0]
    P = tile_h * W
    assert H % tile_h == 0, "H must be divisible by tile_h"
    assert P % 128 == 0, "tile_h * W must be a multiple of 128 (lane width)"
    assert n_tile % 128 == 0, "n_tile must be a multiple of 128"

    # ---------------- project_gaussians_2d (pure JAX, computed once) ----------------
    xy = jnp.tanh(_xyz.astype(f32))                                   # (N, 2) in (-1, 1)
    cx = 0.5 * W * xy[:, 0:1] + (0.5 * W - 0.5)                       # pixel center x
    cy = 0.5 * H * xy[:, 1:2] + (0.5 * H - 0.5)                       # pixel center y

    chol = _cholesky.astype(f32) + jnp.array([[0.5, 0.0, 0.5]], f32)  # cholesky_bound
    l1, l2, l3 = chol[:, 0:1], chol[:, 1:2], chol[:, 2:3]
    # Sigma = L @ L^T with L = [[l1, 0], [l2, l3]]
    a = l1 * l1
    b = l1 * l2
    c = l2 * l2 + l3 * l3
    det = a * c - b * b
    valid = det > 0.0
    inv_det = jnp.where(valid, 1.0 / jnp.where(valid, det, 1.0), 0.0)
    conic_x = c * inv_det
    conic_y = -b * inv_det
    conic_z = a * inv_det
    # 3-sigma radius (compute_cov2d_bounds); radius == 0 -> num_tiles_hit == 0 -> skip
    b_mid = 0.5 * (a + c)
    lam_max = b_mid + jnp.sqrt(jnp.maximum(0.1, b_mid * b_mid - det))
    radius = jnp.ceil(3.0 * jnp.sqrt(jnp.maximum(lam_max, 0.0)))
    valid = jnp.logical_and(valid, radius > 0.0)

    opac_eff = jnp.where(valid, _opacity.astype(f32), 0.0)            # fold valid into opacity

    zcol = jnp.zeros_like(cx)
    params = jnp.concatenate(
        [cx, cy, 0.5 * conic_x, conic_y, 0.5 * conic_z, opac_eff, zcol, zcol],
        axis=1)                                                       # (N, 8)

    # Pad N to a multiple of n_tile; zero rows have opacity 0 -> contribute nothing.
    n_pad = ((N + n_tile - 1) // n_tile) * n_tile
    params = jnp.pad(params, ((0, n_pad - N), (0, 0)))
    featT = jnp.pad(_features_dc.astype(f32).T, ((0, 5), (0, n_pad - N)))   # (8, n_pad)

    # Flattened pixel coordinates (2, H*W): row 0 = x, row 1 = y (row-major pixel order).
    xx = jnp.broadcast_to(jnp.arange(W, dtype=f32)[None, :], (H, W)).reshape(1, H * W)
    yy = jnp.broadcast_to(jnp.arange(H, dtype=f32)[:, None], (H, W)).reshape(1, H * W)
    coords = jnp.concatenate([xx, yy], axis=0)

    grid = (H // tile_h, n_pad // n_tile)   # (row tiles "parallel", gaussian chunks reduction)

    out = pl.pallas_call(
        _rasterize_sum_kernel,
        out_shape=jax.ShapeDtypeStruct((3, H * W), f32),
        grid_spec=pltpu.PrefetchScalarGridSpec(
            num_scalar_prefetch=0,
            grid=grid,
            in_specs=[
                pl.BlockSpec((2, P), lambda i, k: (0, i)),            # pixel coords (per row tile)
                pl.BlockSpec((n_tile, 8), lambda i, k: (k, 0)),       # packed gaussian params
                pl.BlockSpec((8, n_tile), lambda i, k: (0, k)),       # features^T (padded to 8)
            ],
            out_specs=pl.BlockSpec((3, P), lambda i, k: (0, i)),      # lane-dense image slab
            scratch_shapes=[pltpu.VMEM((8, P), f32)],                 # accumulator
        ),
        compiler_params=pltpu.CompilerParams(
            dimension_semantics=("parallel", "arbitrary"),
            vmem_limit_bytes=48 * 1024 * 1024,   # explicit; stays under v7x's 64 MiB physical
        ),
    )(coords, params, featT)

    # Free metadata reshape to NCHW in the wrapper (keeps in-kernel stores lane-dense).
    return {"render": out.reshape(3, H, W)[None]}   # (1, 3, H, W)


def _reference_render(_xyz, _cholesky, _features_dc, _opacity, H, W):
    """Pure-JAX reference of the same math (for a sanity check)."""
    f32 = jnp.float32
    xy = jnp.tanh(_xyz.astype(f32))
    cx = 0.5 * W * xy[:, 0:1] + (0.5 * W - 0.5)
    cy = 0.5 * H * xy[:, 1:2] + (0.5 * H - 0.5)
    chol = _cholesky.astype(f32) + jnp.array([[0.5, 0.0, 0.5]], f32)
    l1, l2, l3 = chol[:, 0:1], chol[:, 1:2], chol[:, 2:3]
    a, b, c = l1 * l1, l1 * l2, l2 * l2 + l3 * l3
    det = a * c - b * b
    valid = det > 0.0
    inv_det = jnp.where(valid, 1.0 / jnp.where(valid, det, 1.0), 0.0)
    ccx, ccy, ccz = c * inv_det, -b * inv_det, a * inv_det
    b_mid = 0.5 * (a + c)
    lam = b_mid + jnp.sqrt(jnp.maximum(0.1, b_mid * b_mid - det))
    valid = jnp.logical_and(valid, jnp.ceil(3.0 * jnp.sqrt(jnp.maximum(lam, 0.0))) > 0)

    yy, xx = jnp.meshgrid(jnp.arange(H, dtype=f32), jnp.arange(W, dtype=f32), indexing="ij")
    dx = cx[:, :, None] - xx[None]          # (N, H, W)
    dy = cy[:, :, None] - yy[None]
    sigma = ((0.5 * ccx)[:, :, None] * dx * dx + (0.5 * ccz)[:, :, None] * dy * dy
             + ccy[:, :, None] * dx * dy)
    alpha = jnp.minimum(0.999, _opacity.astype(f32)[:, :, None] * jnp.exp(-sigma))
    alpha = jnp.where(sigma >= 0.0, alpha, 0.0)
    alpha = jnp.where(alpha >= 1.0 / 255.0, alpha, 0.0)
    alpha = jnp.where(valid[:, :, None], alpha, 0.0)
    img = jnp.einsum("nc,nhw->chw", _features_dc.astype(f32), alpha,
                     precision=lax.Precision.HIGHEST)
    return jnp.clip(img, 0.0, 1.0)[None]


if __name__ == "__main__":
    # Small, deterministic setup consistent with the module's __init__.
    N_POINTS, H, W = 256, 32, 128
    key = jax.random.PRNGKey(0)
    k_xyz, k_chol, k_op, k_feat = jax.random.split(key, 4)

    # _xyz = atanh(2*(rand-0.5)), _cholesky/_opacity/_features_dc = rand
    _xyz = jnp.arctanh(2.0 * (jax.random.uniform(k_xyz, (N_POINTS, 2), jnp.float32) - 0.5))
    _cholesky = jax.random.uniform(k_chol, (N_POINTS, 3), jnp.float32)
    _opacity = jax.random.uniform(k_op, (N_POINTS, 1), jnp.float32)
    _features_dc = jax.random.uniform(k_feat, (N_POINTS, 3), jnp.float32)

    # n_tile=128 with N=256 exercises the gaussian-chunk reduction axis (2 chunks).
    out = gaussianimage_cholesky_render(_xyz, _cholesky, _features_dc, _opacity, H, W,
                                        tile_h=8, n_tile=128)
    render = jax.block_until_ready(out["render"])
    assert render.shape == (1, 3, H, W), render.shape

    ref = jax.block_until_ready(
        _reference_render(_xyz, _cholesky, _features_dc, _opacity, H, W))
    max_err = float(jnp.max(jnp.abs(render - ref)))
    # loose tolerance: the 1/255 alpha cutoff and matmul accumulation order are
    # threshold/order sensitive between the kernel and the XLA reference.
    assert max_err < 1e-2, f"max abs err {max_err}"

    print("KERNEL_OK")
</pallas_src>

<mosaic_0001>
module attributes {stable_mosaic.version = 11 : i64} {
  func.func @_rasterize_sum_kernel(%arg0: i32, %arg1: i32, %arg2: memref<2x1024xf32, #tpu.memory_space<vmem>>, %arg3: memref<128x8xf32, #tpu.memory_space<vmem>>, %arg4: memref<8x128xf32, #tpu.memory_space<vmem>>, %arg5: memref<3x1024xf32, #tpu.memory_space<vmem>>, %arg6: memref<8x1024xf32, #tpu.memory_space<vmem>>) attributes {dimension_semantics = [#tpu.dimension_semantics<parallel>, #tpu.dimension_semantics<arbitrary>], iteration_bounds = array<i64: 4, 2>, scalar_prefetch = 0 : i64, scratch_operands = 1 : i64, tpu.core_type = #tpu.core_type<tc>, window_params = [{transform_indices = @transform_0, window_bounds = array<i64: 2, 1024>}, {transform_indices = @transform_1, window_bounds = array<i64: 128, 8>}, {transform_indices = @transform_2, window_bounds = array<i64: 8, 128>}, {transform_indices = @transform_3, window_bounds = array<i64: 3, 1024>}]} {
    %c0_i32 = arith.constant 0 : i32
    %0 = arith.cmpi eq, %arg1, %c0_i32 : i32
    %1 = arith.extui %0 : i1 to i32
    %c0_i32_0 = arith.constant 0 : i32
    %2 = arith.cmpi ne, %1, %c0_i32_0 : i32
    scf.if %2 {
      %cst_17 = arith.constant 0.000000e+00 : f32
      %51 = vector.broadcast %cst_17 : f32 to vector<8x1024xf32>
      %c0_18 = arith.constant 0 : index
      %c0_19 = arith.constant 0 : index
      %52 = vector.load %arg6[%c0_18, %c0_19] : memref<8x1024xf32, #tpu.memory_space<vmem>>, vector<8x1024xf32>
      tpu.vector_store %arg6[%c0_18, %c0_19], %51 {strides = array<i32>} : memref<8x1024xf32, #tpu.memory_space<vmem>>, vector<8x1024xf32>,
    } else {
    }
    %c0 = arith.constant 0 : index
    %c0_1 = arith.constant 0 : index
    %3 = vector.load %arg2[%c0, %c0_1] : memref<2x1024xf32, #tpu.memory_space<vmem>>, vector<1x1024xf32>
    %c1 = arith.constant 1 : index
    %c0_2 = arith.constant 0 : index
    %4 = vector.load %arg2[%c1, %c0_2] : memref<2x1024xf32, #tpu.memory_space<vmem>>, vector<1x1024xf32>
    %c0_3 = arith.constant 0 : index
    %c0_4 = arith.constant 0 : index
    %5 = vector.load %arg3[%c0_3, %c0_4] : memref<128x8xf32, #tpu.memory_space<vmem>>, vector<128x8xf32>
    %6 = vector.extract_strided_slice %5 {offsets = [0, 0], sizes = [128, 1], strides = [1, 1]} : vector<128x8xf32> to vector<128x1xf32>
    %7 = vector.extract_strided_slice %5 {offsets = [0, 1], sizes = [128, 1], strides = [1, 1]} : vector<128x8xf32> to vector<128x1xf32>
    %8 = vector.extract_strided_slice %5 {offsets = [0, 2], sizes = [128, 1], strides = [1, 1]} : vector<128x8xf32> to vector<128x1xf32>
    %9 = vector.extract_strided_slice %5 {offsets = [0, 3], sizes = [128, 1], strides = [1, 1]} : vector<128x8xf32> to vector<128x1xf32>
    %10 = vector.extract_strided_slice %5 {offsets = [0, 4], sizes = [128, 1], strides = [1, 1]} : vector<128x8xf32> to vector<128x1xf32>
    %11 = vector.extract_strided_slice %5 {offsets = [0, 5], sizes = [128, 1], strides = [1, 1]} : vector<128x8xf32> to vector<128x1xf32>
    %12 = vector.broadcast %6 : vector<128x1xf32> to vector<128x1024xf32>
    %13 = vector.broadcast %3 : vector<1x1024xf32> to vector<128x1024xf32>
    %14 = arith.subf %12, %13 : vector<128x1024xf32>
    %15 = vector.broadcast %7 : vector<128x1xf32> to vector<128x1024xf32>
    %16 = vector.broadcast %4 : vector<1x1024xf32> to vector<128x1024xf32>
    %17 = arith.subf %15, %16 : vector<128x1024xf32>
    %18 = vector.broadcast %8 : vector<128x1xf32> to vector<128x1024xf32>
    %19 = arith.mulf %18, %14 : vector<128x1024xf32>
    %20 = arith.mulf %19, %14 : vector<128x1024xf32>
    %21 = vector.broadcast %10 : vector<128x1xf32> to vector<128x1024xf32>
    %22 = arith.mulf %21, %17 : vector<128x1024xf32>
    %23 = arith.mulf %22, %17 : vector<128x1024xf32>
    %24 = arith.addf %20, %23 : vector<128x1024xf32>
    %25 = vector.broadcast %9 : vector<128x1xf32> to vector<128x1024xf32>
    %26 = arith.mulf %25, %14 : vector<128x1024xf32>
    %27 = arith.mulf %26, %17 : vector<128x1024xf32>
    %28 = arith.addf %24, %27 : vector<128x1024xf32>
    %cst = arith.constant 0.000000e+00 : f32
    %29 = vector.broadcast %cst : f32 to vector<128x1024xf32>
    %30 = arith.subf %29, %28 : vector<128x1024xf32>
    %31 = math.exp %30 : vector<128x1024xf32>
    %32 = vector.broadcast %11 : vector<128x1xf32> to vector<128x1024xf32>
    %33 = arith.mulf %32, %31 : vector<128x1024xf32>
    %cst_5 = arith.constant 0.000000e+00 : f32
    %34 = vector.broadcast %cst_5 : f32 to vector<128x1024xf32>
    %35 = arith.cmpf oge, %28, %34 : vector<128x1024xf32>
    %cst_6 = arith.constant 0.00392156886 : f32
    %36 = vector.broadcast %cst_6 : f32 to vector<128x1024xf32>
    %37 = arith.cmpf oge, %33, %36 : vector<128x1024xf32>
    %38 = arith.andi %35, %37 : vector<128x1024xi1>
    %cst_7 = arith.constant 9.990000e-01 : f32
    %39 = vector.broadcast %cst_7 : f32 to vector<128x1024xf32>
    %40 = arith.minimumf %33, %39 : vector<128x1024xf32>
    %cst_8 = arith.constant 0.000000e+00 : f32
    %41 = vector.broadcast %cst_8 : f32 to vector<128x1024xf32>
    %42 = arith.select %38, %40, %41 : vector<128x1024xi1>, vector<128x1024xf32>
    %c0_9 = arith.constant 0 : index
    %c0_10 = arith.constant 0 : index
    %43 = vector.load %arg6[%c0_9, %c0_10] : memref<8x1024xf32, #tpu.memory_space<vmem>>, vector<8x1024xf32>
    %c0_11 = arith.constant 0 : index
    %c0_12 = arith.constant 0 : index
    %44 = vector.load %arg4[%c0_11, %c0_12] : memref<8x128xf32, #tpu.memory_space<vmem>>, vector<8x128xf32>
    %cst_13 = arith.constant dense<0.000000e+00> : vector<8x1024xf32>
    %45 = tpu.matmul %44, %42, %cst_13 {dimension_numbers = #tpu.dot_dimension_numbers<[1], [0], [0], [1], [0, 0, 1, 1], [], []>} : vector<8x128xf32>, vector<128x1024xf32>, vector<8x1024xf32> -> vector<8x1024xf32>
    %46 = arith.addf %43, %45 : vector<8x1024xf32>
    %c0_14 = arith.constant 0 : index
    %c0_15 = arith.constant 0 : index
    %47 = vector.load %arg6[%c0_14, %c0_15] : memref<8x1024xf32, #tpu.memory_space<vmem>>, vector<8x1024xf32>
    tpu.vector_store %arg6[%c0_14, %c0_15], %46 {strides = array<i32>} : memref<8x1024xf32, #tpu.memory_space<vmem>>, vector<8x1024xf32>,
    %c1_i32 = arith.constant 1 : i32
    %48 = arith.cmpi eq, %arg1, %c1_i32 : i32
    %49 = arith.extui %48 : i1 to i32
    %c0_i32_16 = arith.constant 0 : i32
    %50 = arith.cmpi ne, %49, %c0_i32_16 : i32
    scf.if %50 {
      %c0_17 = arith.constant 0 : index
      %c0_18 = arith.constant 0 : index
      %51 = vector.load %arg6[%c0_17, %c0_18] : memref<8x1024xf32, #tpu.memory_space<vmem>>, vector<3x1024xf32>
      %cst_19 = arith.constant 0.000000e+00 : f32
      %cst_20 = arith.constant 1.000000e+00 : f32
      %52 = vector.broadcast %cst_19 : f32 to vector<3x1024xf32>
      %53 = arith.maximumf %52, %51 : vector<3x1024xf32>
      %54 = vector.broadcast %cst_20 : f32 to vector<3x1024xf32>
      %55 = arith.minimumf %54, %53 : vector<3x1024xf32>
      %c0_21 = arith.constant 0 : index
      %c0_22 = arith.constant 0 : index
      %56 = vector.load %arg5[%c0_21, %c0_22] : memref<3x1024xf32, #tpu.memory_space<vmem>>, vector<3x1024xf32>
      tpu.vector_store %arg5[%c0_21, %c0_22], %55 {strides = array<i32>} : memref<3x1024xf32, #tpu.memory_space<vmem>>, vector<3x1024xf32>,
    } else {
    }
    return
  }
  func.func @transform_0(%arg0: i32, %arg1: i32) -> (i32, i32) {
    %c0_i32 = arith.constant 0 : i32
    %c0_i32_0 = arith.constant 0 : i32
    return %c0_i32, %arg0 : i32, i32
  }
  func.func @transform_1(%arg0: i32, %arg1: i32) -> (i32, i32) {
    %c0_i32 = arith.constant 0 : i32
    %c0_i32_0 = arith.constant 0 : i32
    return %arg1, %c0_i32 : i32, i32
  }
  func.func @transform_2(%arg0: i32, %arg1: i32) -> (i32, i32) {
    %c0_i32 = arith.constant 0 : i32
    %c0_i32_0 = arith.constant 0 : i32
    return %c0_i32, %arg1 : i32, i32
  }
  func.func @transform_3(%arg0: i32, %arg1: i32) -> (i32, i32) {
    %c0_i32 = arith.constant 0 : i32
    %c0_i32_0 = arith.constant 0 : i32
    return %c0_i32, %arg0 : i32, i32
  }
}

</mosaic_0001>

<bundles_post_ra>
// kernel: tpu_custom_call.1
= control target key start
LH: loop header
LB: loop body
LE: loop exit
PB: predicated region body
PF: predicated region fallthrough
CT: control target
= control target key end

     0   :  { %8 = vsyncpa [#allocation4], 0  ;;  %s7643_s0 = inlined_call_operand.vmem [shape: f32[2,4096], index: 0, kind: input, shape index: {}]   ;;  %s7644_s1 = inlined_call_operand.vmem [shape: f32[256,8], index: 1, kind: input, shape index: {}]   ;;  %s7645_s2 = inlined_call_operand.vmem [shape: f32[8,256], index: 2, kind: input, shape index: {}]   ;;  %s7646_s3 = inlined_call_operand.hbm [shape: f32[3,4096], index: 3, kind: output, shape index: {}]  }
   0x1   :  { %10 = vsyncpa [#allocation4 + $0x1], 0  ;;  %s4308_s12 = smov 0   ;;  %s4310_s13 = smov 0  }
   0x2   :  { %s4312_s14 = smov 0   ;;  %s4314_s15 = smov 0  }
   0x3   :  { %s4316_s16 = smov 0   ;;  %s4318_s17 = smov 0  }
   0x4   :  { %s4320_s18 = smov 0   ;;  %s4322_s19 = smov 0  }
   0x5 LB: > { %s3634_s20 = sadd.s32 4294967295, %s4277_s19   ;;  %s3635_s21 = sadd.s32 4294967294, %s4277_s19   ;;  %s4277_s19 = sphi %s4322_s19, %s16_s19   ;;  %s4273_s18 = sphi %s4320_s18, %s8684_s18   ;;  %s4269_s17 = sphi %s4318_s17, %s8683_s17   ;;  %s4265_s16 = sphi %s4316_s16, %s8682_s16   ;;  %s4261_s15 = sphi %s4314_s15, %s8681_s15   ;;  %s4257_s14 = sphi %s4312_s14, %s8680_s14   ;;  %s4253_s13 = sphi %s4310_s13, %s8679_s13   ;;  %s4249_s12 = sphi %s4308_s12, %s8678_s12  }
   0x6   : > { %s25_s22 = sadd.s32 1, %s4269_s17  ;;  %s28_s23 = sadd.s32 1, %s4273_s18 }
   0x7   : > { %p26_p0 = scmp.ge.s32.totalorder %s25_s22, 2  ;;  %p123_p1 = scmp.ne.s32.totalorder %s4257_s14, %s4253_s13 }
   0x8   : > { %p124_p2 = scmp.eq.s32.totalorder %s3634_s20, 7  ;;  %p129_p4 = scmp.ne.s32.totalorder %s4253_s13, %s4249_s12 }
   0x9   : > { %s8686_s22 = smov (%p26_p0, %s25_s22), 0  ;;  %s8688_s23 = smov (!%p26_p0, %s28_s23), %s4273_s18 }
   0xa   : > { %8027 = sst [smem:[#allocation6_spill]] %s8686_s22  ;;  %p4357_p3 = por %p124_p2, %p123_p1 }
   0xb   : > { %p30_p5 = scmp.ge.s32.totalorder %s8688_s23, 4  ;;  %p130_p6 = scmp.eq.s32.totalorder %s3635_s21, 7 }
   0xc   : > { %p3638_p7 = scmp.ge.s32.totalorder %s4277_s19, 1  ;;  %p173_p8 = scmp.lt.s32.totalorder %s4277_s19, 9 }
   0xd   : > { %s8690_s23 = smov (%p30_p5, %s8688_s23), 0  ;;  %p4367_p9 = por %p130_p6, %p129_p4 }
   0xe   : > { %8029 = sst [smem:[#allocation7_spill]] %s8690_s23  ;;  %p174_p10 = pnand %p3638_p7, %p173_p8 }
   0xf   : > { %s110_s26 = ssub.s32 %s4273_s18, %s8690_s23  ;;  %s113_s27 = sadd.s32 1, %s4257_s14 }
  0x10   : > { %p111_p11 = scmp.eq.s32.totalorder %s110_s26, 0  ;;  %177 = sbr.rel (%p174_p10) target bundleno = 1034 (0x40a), region = 32 }
  0x12   : > { %s4375_s28 = scalar_select %p111_p11, %s4257_s14, %s113_s27  }
  0x15   : > { %s7647_s29 = sand.u32 1, %s4253_s13   ;;  %s3640_s30 = sshll.u32 %s4265_s16, 3 }
  0x16   : > { %s3639_s4 = sshll.u32 %s7647_s29, 5  ;;  %p207_p12 = scmp.lt.s32.totalorder %s3640_s30, 31 }
  0x17   : > { %s3642_s5 = sshll.u32 %s4261_s15, 4  ;;  %p218_p0 = scmp.lt.s32.totalorder %s4261_s15, 1 }
  0x18   : > { %s8692_s30 = smov (!%p207_p12, %s3640_s30), 31  ;;  %p213_p13 = scmp.lt.s32.totalorder %s3642_s5, 31 }
  0x19   : > { %s3641_s6 = sshll.u32 %s8692_s30, 1  ;;  %s4399_s30 = scalar_lea.vmem [#allocation3], %s3639_s4 }
  0x1a   : > { %s4386_s9 = scalar_lea.vmem %s7643_s0, %s3641_s6  ;;  %s8694_s5 = smov (!%p213_p13, %s3642_s5), 31 }
  0x1b   : > { %s219_s10 = scalar_select %p218_p0, %s4261_s15, 1 }
  0x1c   : > { %s3643_s11 = sshll.u32 %s8694_s5, 3  ;;  %p3645_p1 = scmp.ne.s32.totalorder %s4261_s15, 0 }
  0x1d   : > { %s4392_s26 = scalar_lea.vmem %s7644_s1, %s3643_s11  ;;  %s3644_s27 = sshll.u32 %s219_s10, 3 }
  0x1e   : > { %s4397_s22 = scalar_lea.vmem %s7645_s2, %s3644_s27  ;;  %226 = sbr.rel (%p3645_p1) target bundleno = 40 (0x28), region = 36 }
  0x23   : > { %v4279_v0 = vmov 0.0  }
  0x24   : > { %227 = vst [vmem:[#allocation2 + $0x30] sm:$0xff] %v4279_v0  ;;  %228 = vst [vmem:[#allocation2] sm:$0xff] %v4279_v0 }
  0x25   : > { %229 = vst [vmem:[#allocation2 + $0x18] sm:$0xff] %v4279_v0  ;;  %230 = vst [vmem:[#allocation2 + $0x10] sm:$0xff] %v4279_v0 }
  0x26   : > { %231 = vst [vmem:[#allocation2 + $0x8] sm:$0xff] %v4279_v0  ;;  %232 = vst [vmem:[#allocation2 + $0x20] sm:$0xff] %v4279_v0 }
  0x27   : > { %233 = vst [vmem:[#allocation2 + $0x28] sm:$0xff] %v4279_v0  ;;  %234 = vst [vmem:[#allocation2 + $0x38] sm:$0xff] %v4279_v0 }
  0x28 PF: > { %v4403_v1 = vld [vmem:[%s4392_s26 + $0x10] sm:$0xff]  ;;  %v4406_v2 = vld [vmem:[%s4392_s26] sm:$0xff]  ;;  %v4280_v3 = vmov 0   ;;  %v4413_v4 = vld [vmem:[%s4392_s26 + $0x18] sm:$0xff]  ;;  %v7657_v13 = vmov 1   ;;  %v7651_v15 = vmov 4   ;;  %v335_v44 = vlaneseq }
  0x29   : > { %8031 = vst [vmem:[#allocation8_spill] sm:$0xff] %v4406_v2  ;;  %3862 = vset.pattern.permute.xlu1 %v4280_v3  ;;  %3861 = vset.pattern.permute.xlu0 %v4280_v3  ;;  %v4416_v5 = vld [vmem:[%s4392_s26 + $0x8] sm:$0xff]  ;;  %v4424_v7 = vld [vmem:[%s4392_s26 + $0x20] sm:$0xff]  ;;  %v4429_v8 = vld [vmem:[%s4392_s26 + $0x78] sm:$0xff]  ;;  %v7655_v19 = vmov 2   ;;  %v7653_v21 = vmov 3  }
  0x2a   : > { %266 = vperm.xlu1 %3862, %v4403_v1   ;;  %256 = vperm.xlu0 %3861, %v4406_v2   ;;  %8032 = vst [vmem:[#allocation9_spill] sm:$0xff] %v4416_v5  ;;  %v4421_v6 = vld [vmem:[%s4392_s26 + $0x28] sm:$0xff]  ;;  %8033 = vst [vmem:[#allocation10_spill] sm:$0xff] %v4429_v8  ;;  %v4432_v9 = vld [vmem:[%s4392_s26 + $0x30] sm:$0xff]  ;;  %v7649_v22 = vmov 5   ;;  %v4589_v47 = vshrl.u32 %v335_v44, 7 }
  0x2b   : > { %v4437_v10 = vld [vmem:[%s4392_s26 + $0x70] sm:$0xff]  ;;  %v4440_v11 = vld [vmem:[%s4392_s26 + $0x58] sm:$0xff]  ;;  %v4445_v12 = vld [vmem:[%s4392_s26 + $0x40] sm:$0xff]  ;;  %p3775_p2 = scmp.ne.s32.totalorder %s4261_s15, 1 }
  0x2c   : > { %v4451_v14 = vld [vmem:[%s4392_s26 + $0x60] sm:$0xff]  ;;  %v4458_v16 = vld [vmem:[%s4392_s26 + $0x48] sm:$0xff]  ;;  %v4464_v18 = vld [vmem:[%s4392_s26 + $0x38] sm:$0xff]  ;;  %8057 = vst [vmem:[#allocation34_spill] sm:$0xff] %v4589_v47  ;;  %v341_v49 = vsub.s32 1, %v4589_v47  ;;  %v349_v50 = vsub.s32 3, %v4589_v47 }
  0x2d   : > { %v251_v17 = vld [vmem:[%s4392_s26 + $0x68] sm:$0xff]  ;;  %v248_v20 = vld [vmem:[%s4392_s26 + $0x50] sm:$0xff]  ;;  %v337_v51 = vsub.s32 0, %v4589_v47  ;;  %v345_v54 = vsub.s32 2, %v4589_v47 }
  0x2e   : > { %271 = vperm.xlu1 %3862, %v4413_v4   ;;  %261 = vperm.xlu0 %3861, %v4416_v5   ;;  %v4601_v53 = vld [vmem:[%s4386_s9] ss:$2 sm:$0xff]  ;;  %v4606_v55 = vld [vmem:[%s4386_s9 + $0x1] ss:$2 sm:$0xff] }
  0x2f   : > { %v4612_v57 = vrot.slane %v4601_v53, %v341_v49  ;;  %v4615_v58 = vrot.slane %v4601_v53, %v349_v50  ;;  %v4618_v59 = vrot.slane %v4601_v53, %v337_v51  ;;  %v4621_v60 = vrot.slane %v4606_v55, %v341_v49 }
  0x30   : > { %v4624_v61 = vrot.slane %v4606_v55, %v349_v50  ;;  %v4627_v62 = vrot.slane %v4606_v55, %v337_v51  ;;  %v4630_v63 = vrot.slane %v4601_v53, %v345_v54 }
  0x31   : > { %8061 = vst [vmem:[#allocation38_spill] sm:$0xff] %v4615_v58  ;;  %8062 = vst [vmem:[#allocation39_spill] sm:$0xff] %v4618_v59 }
  0x32   : > { %281 = vperm.xlu1 %3862, %v4421_v6   ;;  %276 = vperm.xlu0 %3861, %v4424_v7   ;;  %8063 = vst [vmem:[#allocation40_spill] sm:$0xff] %v4621_v60  ;;  %8064 = vst [vmem:[#allocation41_spill] sm:$0xff] %v4624_v61 }
  0x33   : > { %8065 = vst [vmem:[#allocation42_spill] sm:$0xff] %v4627_v62  ;;  %8066 = vst [vmem:[#allocation43_spill] sm:$0xff] %v4630_v63 }
  0x36   : > { %331 = vperm.xlu1 %3862, %v4429_v8   ;;  %286 = vperm.xlu0 %3861, %v4432_v9  }
  0x3a   : > { %326 = vperm.xlu1 %3862, %v4437_v10   ;;  %311 = vperm.xlu0 %3861, %v4440_v11  }
  0x3e   : > { %3863 = vset.pattern.permute.xlu1 %v7657_v13  ;;  %296 = vperm.xlu0 %3861, %v4445_v12  }
  0x3f   : > { %560 = vperm.xlu1 %3863, %v4437_v10  }
  0x42   : > { %3882 = vset.pattern.permute.xlu0 %v7651_v15 }
  0x43   : > { %3864 = vset.pattern.permute.xlu1 %v7651_v15  ;;  %1105 = vperm.xlu0 %3882, %v4451_v14  }
  0x44   : > { %1117 = vperm.xlu1 %3864, %v4429_v8  }
  0x47   : > { %1093 = vperm.xlu0 %3882, %v4458_v16  }
  0x48   : > { %3865 = vset.pattern.permute.xlu1 %v4280_v3 }
  0x49   : > { %321 = vperm.xlu1 %3865, %v251_v17  }
  0x4b   : > { %1085 = vperm.xlu0 %3882, %v4464_v18  }
  0x4d   : > { %3866 = vset.pattern.permute.xlu1 %v7655_v19 }
  0x4e   : > { %793 = vperm.xlu1 %3866, %v4437_v10  }
  0x4f   : > { %1073 = vperm.xlu0 %3882, %v4424_v7  }
  0x52   : > { %3867 = vset.pattern.permute.xlu1 %v7651_v15 }
  0x53   : > { %1113 = vperm.xlu1 %3867, %v4437_v10   ;;  %3899 = vset.pattern.permute.xlu0 %v7657_v13 }
  0x54   : > { %564 = vperm.xlu0 %3899, %v4429_v8  }
  0x57   : > { %3868 = vset.pattern.permute.xlu1 %v4280_v3 }
  0x58   : > { %316 = vperm.xlu1 %3868, %v4451_v14   ;;  %556 = vperm.xlu0 %3899, %v251_v17  }
  0x5c   : > { %3869 = vset.pattern.permute.xlu1 %v7657_v13  ;;  %544 = vperm.xlu0 %3899, %v248_v20  }
  0x5d   : > { %552 = vperm.xlu1 %3869, %v4451_v14  }
  0x60   : > { %532 = vperm.xlu0 %3899, %v4464_v18  }
  0x61   : > { %3870 = vset.pattern.permute.xlu1 %v7651_v15 }
  0x62   : > { %1109 = vperm.xlu1 %3870, %v251_v17  }
  0x64   : > { %520 = vperm.xlu0 %3899, %v4424_v7  }
  0x66   : > { %3871 = vset.pattern.permute.xlu1 %v7653_v21 }
  0x67   : > { %1561 = vperm.xlu1 %3871, %v4437_v10  }
  0x68   : > { %508 = vperm.xlu0 %3899, %v4416_v5  }
  0x6b   : > { %3872 = vset.pattern.permute.xlu1 %v7657_v13 }
  0x6c   : > { %548 = vperm.xlu1 %3872, %v4440_v11   ;;  %3904 = vset.pattern.permute.xlu0 %v7655_v19 }
  0x6d   : > { %797 = vperm.xlu0 %3904, %v4429_v8  }
  0x70   : > { %3873 = vset.pattern.permute.xlu1 %v7655_v19 }
  0x71   : > { %785 = vperm.xlu1 %3873, %v4451_v14   ;;  %789 = vperm.xlu0 %3904, %v251_v17  }
  0x75   : > { %3874 = vset.pattern.permute.xlu1 %v7653_v21  ;;  %777 = vperm.xlu0 %3904, %v248_v20  }
  0x76   : > { %1557 = vperm.xlu1 %3874, %v251_v17  }
  0x79   : > { %761 = vperm.xlu0 %3904, %v4432_v9  }
  0x7a   : > { %3875 = vset.pattern.permute.xlu1 %v4280_v3 }
  0x7b   : > { %306 = vperm.xlu1 %3875, %v248_v20  }
  0x7d   : > { %749 = vperm.xlu0 %3904, %v4413_v4  }
  0x7f   : > { %3876 = vset.pattern.permute.xlu1 %v7655_v19 }
  0x80   : > { %781 = vperm.xlu1 %3876, %v4440_v11  }
  0x81   : > { %741 = vperm.xlu0 %3904, %v4416_v5  }
  0x84   : > { %3877 = vset.pattern.permute.xlu1 %v7651_v15 }
  0x85   : > { %1101 = vperm.xlu1 %3877, %v4440_v11   ;;  %3909 = vset.pattern.permute.xlu0 %v7653_v21 }
  0x86   : > { %1565 = vperm.xlu0 %3909, %v4429_v8  }
  0x89   : > { %3878 = vset.pattern.permute.xlu1 %v4280_v3 }
  0x8a   : > { %301 = vperm.xlu1 %3878, %v4458_v16   ;;  %1553 = vperm.xlu0 %3909, %v4451_v14  }
  0x8e   : > { %3879 = vset.pattern.permute.xlu1 %v7657_v13  ;;  %1541 = vperm.xlu0 %3909, %v4458_v16  }
  0x8f   : > { %540 = vperm.xlu1 %3879, %v4458_v16  }
  0x92   : > { %1529 = vperm.xlu0 %3909, %v4432_v9  }
  0x93   : > { %3880 = vset.pattern.permute.xlu1 %v7651_v15 }
  0x94   : > { %1097 = vperm.xlu1 %3880, %v248_v20  }
  0x96   : > { %1517 = vperm.xlu0 %3909, %v4413_v4  }
  0x98   : > { %3881 = vset.pattern.permute.xlu1 %v7653_v21 }
  0x99   : > { %1549 = vperm.xlu1 %3881, %v4440_v11  }
  0x9a   : > { %1509 = vperm.xlu0 %3909, %v4416_v5  }
  0x9d   : > { %3883 = vset.pattern.permute.xlu1 %v7657_v13 }
  0x9e   : > { %536 = vperm.xlu1 %3883, %v4445_v12   ;;  %3914 = vset.pattern.permute.xlu0 %v7649_v22 }
  0x9f   : > { %2393 = vperm.xlu0 %3914, %v4437_v10  }
  0xa2   : > { %3884 = vset.pattern.permute.xlu1 %v7655_v19 }
  0xa3   : > { %773 = vperm.xlu1 %3884, %v4458_v16   ;;  %2385 = vperm.xlu0 %3914, %v4451_v14  }
  0xa5   : > { %v4521_v23 = vpop.permute.xlu1 %266  ;;  %v4523_v24 = vpop.permute.xlu0 %256 }
  0xa6   : > { %8034 = vst [vmem:[#allocation11_spill] sm:$0xff] %v4521_v23  ;;  %8035 = vst [vmem:[#allocation12_spill] sm:$0xff] %v4523_v24 }
  0xa7   : > { %3885 = vset.pattern.permute.xlu1 %v7653_v21  ;;  %2373 = vperm.xlu0 %3914, %v4458_v16  }
  0xa8   : > { %1545 = vperm.xlu1 %3885, %v248_v20  }
  0xa9   : > { %v4527_v25 = vpop.permute.xlu1 %271  ;;  %v4529_v26 = vpop.permute.xlu0 %261 }
  0xaa   : > { %8036 = vst [vmem:[#allocation13_spill] sm:$0xff] %v4527_v25  ;;  %8037 = vst [vmem:[#allocation14_spill] sm:$0xff] %v4529_v26  ;;  %v4643_v10 = vsub.f32 %v4527_v25, %v4615_v58  ;;  %v4647_v11 = vsub.f32 %v4527_v25, %v4618_v59 }
  0xab   : > { %2365 = vperm.xlu0 %3914, %v4464_v18  }
  0xac   : > { %3886 = vset.pattern.permute.xlu1 %v4280_v3  ;;  %v4635_v3 = vrot.slane %v4606_v55, %v345_v54  ;;  %8070 = vst [vmem:[#allocation47_spill] sm:$0xff] %v4643_v10  ;;  %8071 = vst [vmem:[#allocation48_spill] sm:$0xff] %v4647_v11 }
  0xad   : > { %291 = vperm.xlu1 %3886, %v4464_v18   ;;  %v4534_v27 = vpop.permute.xlu1 %281  ;;  %v4536_v28 = vpop.permute.xlu0 %276 }
  0xae   : > { %8038 = vst [vmem:[#allocation15_spill] sm:$0xff] %v4534_v27  ;;  %8039 = vst [vmem:[#allocation16_spill] sm:$0xff] %v4536_v28  ;;  %v4656_v14 = vsub.f32 %v4534_v27, %v4615_v58  ;;  %v4660_v16 = vsub.f32 %v4534_v27, %v4618_v59  ;;  %v4664_v17 = vsub.f32 %v4534_v27, %v4630_v63 }
  0xaf   : > { %2357 = vperm.xlu0 %3914, %v4421_v6   ;;  %8068 = vst [vmem:[#allocation45_spill] sm:$0xff] %v4635_v3 }
  0xb0   : > { %8073 = vst [vmem:[#allocation50_spill] sm:$0xff] %v4656_v14  ;;  %8074 = vst [vmem:[#allocation51_spill] sm:$0xff] %v4660_v16 }
  0xb1   : > { %3887 = vset.pattern.permute.xlu1 %v7655_v19  ;;  %v4540_v29 = vpop.permute.xlu1 %331  ;;  %v4542_v30 = vpop.permute.xlu0 %286  ;;  %8075 = vst [vmem:[#allocation52_spill] sm:$0xff] %v4664_v17  ;;  %v4748_v17 = vsub.f32 %v4521_v23, %v4615_v58 }
  0xb2   : > { %8040 = vst [vmem:[#allocation17_spill] sm:$0xff] %v4540_v29  ;;  %8041 = vst [vmem:[#allocation18_spill] sm:$0xff] %v4542_v30  ;;  %769 = vperm.xlu1 %3887, %v4445_v12   ;;  %v4671_v20 = vsub.f32 %v4540_v29, %v4612_v57  ;;  %v4675_v44 = vsub.f32 %v4540_v29, %v4615_v58  ;;  %v4679_v49 = vsub.f32 %v4540_v29, %v4618_v59 }
  0xb3   : > { %2349 = vperm.xlu0 %3914, %v4413_v4   ;;  %v4683_v50 = vsub.f32 %v4540_v29, %v4630_v63  ;;  %8090 = vst [vmem:[#allocation66_spill] sm:$0xff] %v4748_v17 }
  0xb4   : > { %8077 = vst [vmem:[#allocation54_spill] sm:$0xff] %v4671_v20  ;;  %8078 = vst [vmem:[#allocation55_spill] sm:$0xff] %v4675_v44 }
  0xb5   : > { %v4546_v31 = vpop.permute.xlu1 %326  ;;  %v4548_v32 = vpop.permute.xlu0 %311  ;;  %8079 = vst [vmem:[#allocation56_spill] sm:$0xff] %v4679_v49  ;;  %8080 = vst [vmem:[#allocation57_spill] sm:$0xff] %v4683_v50 }
  0xb6   : > { %8042 = vst [vmem:[#allocation19_spill] sm:$0xff] %v4546_v31  ;;  %8043 = vst [vmem:[#allocation20_spill] sm:$0xff] %v4548_v32  ;;  %3888 = vset.pattern.permute.xlu1 %v7651_v15  ;;  %v4687_v51 = vsub.f32 %v4546_v31, %v4612_v57  ;;  %v4691_v54 = vsub.f32 %v4546_v31, %v4615_v58  ;;  %v4695_v22 = vsub.f32 %v4546_v31, %v4618_v59 }
  0xb7   : > { %1089 = vperm.xlu1 %3888, %v4445_v12   ;;  %2341 = vperm.xlu0 %3914, %v4416_v5  }
  0xb9   : > { %v4553_v33 = vpop.permute.xlu0 %296 }
  0xba   : > { %8044 = vst [vmem:[#allocation21_spill] sm:$0xff] %v4553_v33  ;;  %v4555_v34 = vpop.permute.xlu1 %560 }
  0xbb   : > { %8045 = vst [vmem:[#allocation22_spill] sm:$0xff] %v4555_v34  ;;  %3889 = vset.pattern.permute.xlu1 %v7657_v13  ;;  %v4725_v26 = vsub.f32 %v4555_v34, %v4624_v61  ;;  %v4729_v11 = vsub.f32 %v4555_v34, %v4627_v62  ;;  %v4733_v10 = vsub.f32 %v4555_v34, %v4635_v3 }
  0xbc   : > { %528 = vperm.xlu1 %3889, %v4432_v9  }
  0xbe   : > { %v4559_v35 = vpop.permute.xlu0 %1105 }
  0xbf   : > { %8046 = vst [vmem:[#allocation23_spill] sm:$0xff] %v4559_v35  ;;  %v4561_v36 = vpop.permute.xlu1 %1117 }
  0xc0   : > { %8047 = vst [vmem:[#allocation24_spill] sm:$0xff] %v4561_v36  ;;  %3890 = vset.pattern.permute.xlu1 %v7655_v19 }
  0xc1   : > { %765 = vperm.xlu1 %3890, %v4464_v18  }
  0xc2   : > { %v4565_v37 = vpop.permute.xlu0 %1093 }
  0xc3   : > { %8048 = vst [vmem:[#allocation25_spill] sm:$0xff] %v4565_v37 }
  0xc4   : > { %v4567_v38 = vpop.permute.xlu1 %321 }
  0xc5   : > { %8049 = vst [vmem:[#allocation26_spill] sm:$0xff] %v4567_v38  ;;  %3891 = vset.pattern.permute.xlu1 %v7653_v21  ;;  %v4833_v44 = vsub.f32 %v4567_v38, %v4630_v63 }
  0xc6   : > { %1537 = vperm.xlu1 %3891, %v4445_v12   ;;  %v4571_v39 = vpop.permute.xlu0 %1085  ;;  %v4652_v12 = vsub.f32 %v4534_v27, %v4612_v57  ;;  %v4715_v27 = vsub.f32 %v4548_v32, %v4630_v63 }
  0xc7   : > { %8050 = vst [vmem:[#allocation27_spill] sm:$0xff] %v4571_v39 }
  0xc8   : > { %8072 = vst [vmem:[#allocation49_spill] sm:$0xff] %v4652_v12  ;;  %8084 = vst [vmem:[#allocation61_spill] sm:$0xff] %v4715_v27  ;;  %v4788_v27 = vsub.f32 %v4567_v38, %v4612_v57 }
  0xc9   : > { %v4573_v40 = vpop.permute.xlu1 %793 }
  0xca   : > { %8051 = vst [vmem:[#allocation28_spill] sm:$0xff] %v4573_v40  ;;  %3892 = vset.pattern.permute.xlu1 %v7657_v13  ;;  %v4576_v41 = vpop.permute.xlu0 %1073  ;;  %v4711_v13 = vsub.f32 %v4548_v32, %v4618_v59  ;;  %v913_v12 = vmul.f32 %v4573_v40, %v4687_v51  ;;  %v912_v37 = vmul.f32 %v4573_v40, %v4695_v22 }
  0xcb   : > { %8052 = vst [vmem:[#allocation29_spill] sm:$0xff] %v4576_v41  ;;  %524 = vperm.xlu1 %3892, %v4421_v6   ;;  %v4740_v41 = vsub.f32 %v4527_v25, %v4630_v63 }
  0xcc   : > { %8083 = vst [vmem:[#allocation60_spill] sm:$0xff] %v4711_v13  ;;  %v4796_v13 = vsub.f32 %v4521_v23, %v4630_v63 }
  0xcd   : > { %8088 = vst [vmem:[#allocation64_spill] sm:$0xff] %v4740_v41 }
  0xce   : > { %v4579_v42 = vpop.permute.xlu1 %1113  ;;  %8097 = vst [vmem:[#allocation73_spill] sm:$0xff] %v4796_v13 }
  0xcf   : > { %8053 = vst [vmem:[#allocation30_spill] sm:$0xff] %v4579_v42  ;;  %3893 = vset.pattern.permute.xlu1 %v7651_v15  ;;  %v4582_v43 = vpop.permute.xlu0 %564 }
  0xd0   : > { %8054 = vst [vmem:[#allocation31_spill] sm:$0xff] %v4582_v43  ;;  %1081 = vperm.xlu1 %3893, %v4432_v9   ;;  %v4639_v9 = vsub.f32 %v4527_v25, %v4612_v57  ;;  %v1232_v25 = vmul.f32 %v4579_v42, %v4729_v11  ;;  %v4762_v41 = vsub.f32 %v4582_v43, %v4621_v60 }
  0xd1   : > { %v4766_v16 = vsub.f32 %v4582_v43, %v4624_v61  ;;  %v4770_v17 = vsub.f32 %v4582_v43, %v4627_v62  ;;  %v4774_v14 = vsub.f32 %v4582_v43, %v4635_v3  ;;  %v4792_v43 = vsub.f32 %v4521_v23, %v4618_v59 }
  0xd2   : > { %8069 = vst [vmem:[#allocation46_spill] sm:$0xff] %v4639_v9  ;;  %8091 = vst [vmem:[#allocation67_spill] sm:$0xff] %v4762_v41  ;;  %v1360_v49 = vmul.f32 %v1232_v25, %v4729_v11 }
  0xd3   : > { %v4585_v45 = vpop.permute.xlu1 %316  ;;  %v4587_v46 = vpop.permute.xlu0 %556  ;;  %8092 = vst [vmem:[#allocation68_spill] sm:$0xff] %v4766_v16  ;;  %8093 = vst [vmem:[#allocation69_spill] sm:$0xff] %v4770_v17 }
  0xd4   : > { %8055 = vst [vmem:[#allocation32_spill] sm:$0xff] %v4585_v45  ;;  %8056 = vst [vmem:[#allocation33_spill] sm:$0xff] %v4587_v46  ;;  %3894 = vset.pattern.permute.xlu1 %v7653_v21  ;;  %v4703_v21 = vsub.f32 %v4548_v32, %v4612_v57 }
  0xd5   : > { %1533 = vperm.xlu1 %3894, %v4464_v18   ;;  %8094 = vst [vmem:[#allocation70_spill] sm:$0xff] %v4774_v14  ;;  %8096 = vst [vmem:[#allocation72_spill] sm:$0xff] %v4792_v43 }
  0xd6   : > { %8081 = vst [vmem:[#allocation58_spill] sm:$0xff] %v4703_v21 }
  0xd7   : > { %v4593_v48 = vpop.permute.xlu0 %544 }
  0xd8   : > { %8058 = vst [vmem:[#allocation35_spill] sm:$0xff] %v4593_v48  ;;  %v4598_v52 = vpop.permute.xlu1 %552 }
  0xd9   : > { %8059 = vst [vmem:[#allocation36_spill] sm:$0xff] %v4598_v52  ;;  %3895 = vset.pattern.permute.xlu1 %v7655_v19  ;;  %v4707_v19 = vsub.f32 %v4548_v32, %v4615_v58  ;;  %v8086_v32 = vmov 1  }
  0xda   : > { %757 = vperm.xlu1 %3895, %v4421_v6  }
  0xdb   : > { %v4609_v56 = vpop.permute.xlu0 %532  ;;  %8082 = vst [vmem:[#allocation59_spill] sm:$0xff] %v4707_v19  ;;  %v8098_v19 = vsub.s32 5, %v4589_v47 }
  0xdc   : > { %8060 = vst [vmem:[#allocation37_spill] sm:$0xff] %v4609_v56 }
  0xdd   : > { %v4632_v0 = vpop.permute.xlu1 %1109  ;;  %v4801_v21 = vrot.slane %v4601_v53, %v8098_v19  ;;  %v1243_v19 = vmul.f32 %v4561_v36, %v4766_v16  ;;  %v1240_v53 = vmul.f32 %v4561_v36, %v4770_v17 }
  0xde   : > { %8067 = vst [vmem:[#allocation44_spill] sm:$0xff] %v4632_v0  ;;  %3896 = vset.pattern.permute.xlu1 %v7651_v15  ;;  %v4699_v15 = vsub.f32 %v4546_v31, %v4630_v63  ;;  %v4721_v31 = vsub.f32 %v4555_v34, %v4621_v60 }
  0xdf   : > { %1077 = vperm.xlu1 %3896, %v4421_v6   ;;  %v4667_v18 = vpop.permute.xlu0 %520  ;;  %8099 = vst [vmem:[#allocation74_spill] sm:$0xff] %v4801_v21 }
  0xe0   : > { %8076 = vst [vmem:[#allocation53_spill] sm:$0xff] %v4667_v18  ;;  %v4744_v18 = vsub.f32 %v4521_v23, %v4612_v57  ;;  %v1233_v34 = vmul.f32 %v4579_v42, %v4721_v31  ;;  %v914_v39 = vmul.f32 %v4573_v40, %v4699_v15  ;;  %v1241_v23 = vmul.f32 %v4561_v36, %v4762_v41 }
  0xe2   : > { %v4717_v24 = vpop.permute.xlu1 %1561  ;;  %8089 = vst [vmem:[#allocation65_spill] sm:$0xff] %v4744_v18  ;;  %v1234_v18 = vmul.f32 %v4579_v42, %v4733_v10  ;;  %v1361_v8 = vmul.f32 %v1233_v34, %v4721_v31  ;;  %v1242_v34 = vmul.f32 %v4561_v36, %v4774_v14  ;;  %v1042_v13 = vmul.f32 %v914_v39, %v4699_v15 }
  0xe3   : > { %8085 = vst [vmem:[#allocation62_spill] sm:$0xff] %v4717_v24  ;;  %3897 = vset.pattern.permute.xlu1 %v8086_v32  ;;  %v4736_v9 = vpop.permute.xlu0 %508 }
  0xe4   : > { %8087 = vst [vmem:[#allocation63_spill] sm:$0xff] %v4736_v9  ;;  %516 = vperm.xlu1 %3897, %v4413_v4   ;;  %v1235_v9 = vmul.f32 %v4579_v42, %v4725_v26  ;;  %v915_v42 = vmul.f32 %v4573_v40, %v4691_v54  ;;  %v8100_v40 = vmov 2   ;;  %v1362_v43 = vmul.f32 %v1234_v18, %v4733_v10 }
  0xe5   : > { %v1040_v18 = vmul.f32 %v912_v37, %v4695_v22 }
  0xe6   : > { %v1363_v50 = vmul.f32 %v1235_v9, %v4725_v26  ;;  %v1041_v9 = vmul.f32 %v913_v12, %v4687_v51  ;;  %v1043_v25 = vmul.f32 %v915_v42, %v4691_v54  ;;  %v4837_v12 = vsub.f32 %v4540_v29, %v4801_v21 }
  0xe7   : > { %v4784_v5 = vpop.permute.xlu1 %548  ;;  %v4849_v20 = vadd.f32 %v1362_v43, %v1042_v13  ;;  %v4856_v21 = vmul.f32 %v1243_v19, %v4766_v16  ;;  %v4859_v29 = vmul.f32 %v1240_v53, %v4770_v17  ;;  %v4867_v13 = vsub.f32 %v4587_v46, %v4621_v60 }
  0xe8   : > { %8095 = vst [vmem:[#allocation71_spill] sm:$0xff] %v4784_v5  ;;  %3898 = vset.pattern.permute.xlu1 %v8100_v40  ;;  %v4804_v2 = vpop.permute.xlu0 %797  ;;  %v4825_v40 = vsub.f32 %v4567_v38, %v4615_v58  ;;  %v4829_v5 = vsub.f32 %v4567_v38, %v4618_v59  ;;  %8103 = vst [vmem:[#allocation77_spill] sm:$0xff] %v4837_v12  ;;  %v4843_v39 = vadd.f32 %v1361_v8, %v1041_v9 }
  0xe9   : > { %8101 = vst [vmem:[#allocation75_spill] sm:$0xff] %v4804_v2  ;;  %753 = vperm.xlu1 %3898, %v4424_v7   ;;  %v4845_v36 = vadd.f32 %v1363_v50, %v1043_v25  ;;  %v4847_v2 = vadd.f32 %v1360_v49, %v1040_v18  ;;  %v4853_v38 = vmul.f32 %v1241_v23, %v4762_v41 }
  0xea   : > { %8102 = vst [vmem:[#allocation76_spill] sm:$0xff] %v4829_v5  ;;  %v8106_v5 = vmov 3   ;;  %v4862_v8 = vmul.f32 %v1242_v34, %v4774_v14  ;;  %v4871_v43 = vsub.f32 %v4598_v52, %v4621_v60  ;;  %v4875_v23 = vsub.f32 %v4598_v52, %v4624_v61 }
  0xeb   : > { %v4879_v49 = vsub.f32 %v4598_v52, %v4627_v62  ;;  %v4883_v50 = vsub.f32 %v4587_v46, %v4624_v61  ;;  %v4891_v19 = vsub.f32 %v4587_v46, %v4635_v3  ;;  %v4895_v53 = vsub.f32 %v4598_v52, %v4635_v3 }
  0xec   : > { %v4839_v42 = vpop.permute.xlu1 %785  ;;  %v4841_v37 = vpop.permute.xlu0 %789  ;;  %8107 = vst [vmem:[#allocation80_spill] sm:$0xff] %v4862_v8  ;;  %v4901_v9 = vsub.f32 %v4585_v45, %v4612_v57  ;;  %v4905_v25 = vsub.f32 %v4585_v45, %v4615_v58  ;;  %v4909_v18 = vsub.f32 %v4585_v45, %v4618_v59  ;;  %v4919_v12 = vsub.f32 %v4553_v33, %v4612_v57 }
  0xed   : > { %8104 = vst [vmem:[#allocation78_spill] sm:$0xff] %v4839_v42  ;;  %8105 = vst [vmem:[#allocation79_spill] sm:$0xff] %v4841_v37  ;;  %3900 = vset.pattern.permute.xlu1 %v8106_v5  ;;  %v4927_v14 = vsub.f32 %v4553_v33, %v4618_v59  ;;  %v4931_v17 = vsub.f32 %v4553_v33, %v4630_v63  ;;  %v1216_v16 = vmul.f32 %v4559_v35, %v4879_v49 }
  0xee   : > { %1525 = vperm.xlu1 %3900, %v4421_v6   ;;  %v4887_v6 = vsub.f32 %v4587_v46, %v4627_v62  ;;  %8108 = vst [vmem:[#allocation81_spill] sm:$0xff] %v4895_v53  ;;  %v4913_v46 = vsub.f32 %v4585_v45, %v4630_v63  ;;  %8112 = vst [vmem:[#allocation85_spill] sm:$0xff] %v4919_v12  ;;  %v1217_v45 = vmul.f32 %v4559_v35, %v4871_v43 }
  0xef   : > { %8114 = vst [vmem:[#allocation87_spill] sm:$0xff] %v4927_v14  ;;  %8115 = vst [vmem:[#allocation88_spill] sm:$0xff] %v4931_v17  ;;  %v1219_v12 = vmul.f32 %v4559_v35, %v4875_v23  ;;  %v4949_v17 = vsub.f32 %v4593_v48, %v4624_v61  ;;  %v4953_v14 = vsub.f32 %v4593_v48, %v4627_v62 }
  0xf0   : > { %v4897_v34 = vpop.permute.xlu0 %777  ;;  %8110 = vst [vmem:[#allocation83_spill] sm:$0xff] %v4913_v46  ;;  %v1225_v8 = vmul.f32 %v4632_v0, %v4867_v13 }
  0xf1   : > { %8109 = vst [vmem:[#allocation82_spill] sm:$0xff] %v4897_v34  ;;  %v4915_v52 = vpop.permute.xlu1 %1557  ;;  %v4923_v34 = vsub.f32 %v4553_v33, %v4615_v58  ;;  %v1218_v33 = vmul.f32 %v4559_v35, %v4895_v53  ;;  %8117 = vst [vmem:[#allocation90_spill] sm:$0xff] %v4949_v17  ;;  %v1683_v35 = vmul.f32 %v4717_v24, %v4691_v54  ;;  %v8121_v17 = vsub.s32 5, %v4589_v47 }
  0xf2   : > { %8111 = vst [vmem:[#allocation84_spill] sm:$0xff] %v4915_v52  ;;  %3901 = vset.pattern.permute.xlu1 %v8086_v32  ;;  %8118 = vst [vmem:[#allocation91_spill] sm:$0xff] %v4953_v14  ;;  %v4957_v32 = vsub.f32 %v4593_v48, %v4635_v3  ;;  %v1224_v54 = vmul.f32 %v4632_v0, %v4887_v6  ;;  %v1226_v47 = vmul.f32 %v4632_v0, %v4891_v19 }
  0xf3   : > { %8113 = vst [vmem:[#allocation86_spill] sm:$0xff] %v4923_v34  ;;  %v4942_v34 = vsub.f32 %v4593_v48, %v4621_v60  ;;  %512 = vperm.xlu1 %3901, %v4403_v1   ;;  %v4970_v46 = vrot.slane %v4606_v55, %v8121_v17  ;;  %v1680_v48 = vmul.f32 %v4717_v24, %v4695_v22 }
  0xf4   : > { %8119 = vst [vmem:[#allocation92_spill] sm:$0xff] %v4957_v32  ;;  %v4959_v41 = vpop.permute.xlu0 %761  ;;  %v4985_v55 = vmul.f32 %v1217_v45, %v4871_v43  ;;  %v4988_v17 = vmul.f32 %v1219_v12, %v4875_v23  ;;  %v4991_v22 = vmul.f32 %v1216_v16, %v4879_v49  ;;  %v5007_v45 = vsub.f32 %v4542_v30, %v4618_v59 }
  0xf5   : > { %8116 = vst [vmem:[#allocation89_spill] sm:$0xff] %v4942_v34  ;;  %8120 = vst [vmem:[#allocation93_spill] sm:$0xff] %v4959_v41  ;;  %v1681_v34 = vmul.f32 %v4717_v24, %v4687_v51  ;;  %v1682_v41 = vmul.f32 %v4717_v24, %v4699_v15  ;;  %v1227_v51 = vmul.f32 %v4632_v0, %v4883_v50  ;;  %v8124_v15 = vmov 4  }
  0xf6   : > { %8122 = vst [vmem:[#allocation94_spill] sm:$0xff] %v4970_v46  ;;  %v4980_v32 = vpop.permute.xlu1 %306  ;;  %v4995_v24 = vmul.f32 %v1218_v33, %v4895_v53  ;;  %v4999_v46 = vsub.f32 %v4542_v30, %v4612_v57  ;;  %v5003_v0 = vsub.f32 %v4542_v30, %v4615_v58  ;;  %8127 = vst [vmem:[#allocation98_spill] sm:$0xff] %v5007_v45 }
  0xf7   : > { %8123 = vst [vmem:[#allocation95_spill] sm:$0xff] %v4980_v32  ;;  %3902 = vset.pattern.permute.xlu1 %v8124_v15  ;;  %v1809_v12 = vmul.f32 %v1681_v34, %v4721_v31  ;;  %v1811_v33 = vmul.f32 %v1683_v35, %v4725_v26  ;;  %v1353_v14 = vmul.f32 %v1225_v8, %v4867_v13 }
  0xf8   : > { %8125 = vst [vmem:[#allocation96_spill] sm:$0xff] %v4999_v46  ;;  %8126 = vst [vmem:[#allocation97_spill] sm:$0xff] %v5003_v0  ;;  %1069 = vperm.xlu1 %3902, %v4413_v4   ;;  %v5010_v16 = vpop.permute.xlu0 %749  ;;  %v5017_v46 = vsub.f32 %v4542_v30, %v4630_v63  ;;  %v1808_v0 = vmul.f32 %v1680_v48, %v4729_v11  ;;  %v1810_v53 = vmul.f32 %v1682_v41, %v4733_v10 }
  0xf9   : > { %8128 = vst [vmem:[#allocation99_spill] sm:$0xff] %v5010_v16  ;;  %v1355_v45 = vmul.f32 %v1227_v51, %v4883_v50  ;;  %v1352_v4 = vmul.f32 %v1224_v54, %v4887_v6  ;;  %v5024_v16 = vmul.f32 %v1226_v47, %v4891_v19  ;;  %v5028_v26 = vsub.f32 %v4536_v28, %v4612_v57 }
  0xfa   : > { %8129 = vst [vmem:[#allocation100_spill] sm:$0xff] %v5017_v46  ;;  %v5032_v31 = vsub.f32 %v4536_v28, %v4615_v58  ;;  %v5036_v35 = vsub.f32 %v4536_v28, %v4618_v59  ;;  %v905_v48 = vmul.f32 %v4841_v37, %v4788_v27  ;;  %v5044_v47 = vsub.f32 %v4609_v56, %v4621_v60 }
  0xfb   : > { %8130 = vst [vmem:[#allocation101_spill] sm:$0xff] %v5028_v26  ;;  %v5038_v41 = vpop.permute.xlu1 %781  ;;  %v5048_v10 = vsub.f32 %v4609_v56, %v4624_v61  ;;  %v5052_v11 = vsub.f32 %v4536_v28, %v4630_v63  ;;  %v5056_v8 = vadd.f32 %v1809_v12, %v4843_v39  ;;  %v5059_v34 = vadd.f32 %v1811_v33, %v4845_v36  ;;  %v8144_v33 = vld [vmem:[#allocation54_spill] sm:$0xff] }
  0xfc   : > { %8131 = vst [vmem:[#allocation102_spill] sm:$0xff] %v5032_v31  ;;  %8132 = vst [vmem:[#allocation103_spill] sm:$0xff] %v5036_v35  ;;  %3903 = vset.pattern.permute.xlu1 %v8106_v5  ;;  %v5063_v51 = vsub.f32 %v4609_v56, %v4627_v62  ;;  %v5067_v54 = vsub.f32 %v4609_v56, %v4635_v3  ;;  %v5071_v28 = vadd.f32 %v1808_v0, %v4847_v2  ;;  %v5080_v12 = vpop.permute.xlu0 %741  ;;  %v8146_v35 = vld [vmem:[#allocation55_spill] sm:$0xff]  ;;  %v8147_v31 = vld [vmem:[#allocation76_spill] sm:$0xff] }
  0xfd   : > { %8133 = vst [vmem:[#allocation104_spill] sm:$0xff] %v5038_v41  ;;  %8134 = vst [vmem:[#allocation105_spill] sm:$0xff] %v5044_v47  ;;  %1521 = vperm.xlu1 %3903, %v4424_v7   ;;  %v5074_v30 = vadd.f32 %v1810_v53, %v4849_v20  ;;  %v1673_v36 = vmul.f32 %v4915_v52, %v4788_v27  ;;  %v907_v39 = vmul.f32 %v4841_v37, %v4825_v40  ;;  %v8148_v0 = vld [vmem:[#allocation71_spill] sm:$0xff]  ;;  %v8149_v53 = vld [vmem:[#allocation56_spill] sm:$0xff] }
  0xfe   : > { %8135 = vst [vmem:[#allocation106_spill] sm:$0xff] %v5048_v10  ;;  %8136 = vst [vmem:[#allocation107_spill] sm:$0xff] %v5052_v11  ;;  %v8145_v11 = vld [vmem:[#allocation75_spill] sm:$0xff]  ;;  %v904_v2 = vmul.f32 %v4841_v37, %v8147_v31  ;;  %v5090_v20 = vsub.f32 %v8148_v0, %v4621_v60  ;;  %v1033_v46 = vmul.f32 %v905_v48, %v4788_v27  ;;  %v8151_v10 = vld [vmem:[#allocation57_spill] sm:$0xff]  ;;  %v8153_v48 = vmov 2  }
  0xff   : > { %8137 = vst [vmem:[#allocation108_spill] sm:$0xff] %v5056_v8  ;;  %8138 = vst [vmem:[#allocation109_spill] sm:$0xff] %v5059_v34  ;;  %v921_v56 = vmul.f32 %v8145_v11, %v8144_v33  ;;  %v923_v7 = vmul.f32 %v8145_v11, %v8146_v35  ;;  %v920_v26 = vmul.f32 %v8145_v11, %v8149_v53 }
 0x100   : > { %8139 = vst [vmem:[#allocation110_spill] sm:$0xff] %v5063_v51  ;;  %8140 = vst [vmem:[#allocation111_spill] sm:$0xff] %v5067_v54  ;;  %v5099_v54 = vsub.f32 %v8148_v0, %v4624_v61  ;;  %v5101_v51 = vpop.permute.xlu1 %1101  ;;  %v922_v47 = vmul.f32 %v8145_v11, %v8151_v10  ;;  %v1672_v60 = vmul.f32 %v4915_v52, %v8147_v31  ;;  %v2065_v61 = vsub.f32 0.0, %v5056_v8 }
 0x101   : > { %8141 = vst [vmem:[#allocation112_spill] sm:$0xff] %v5071_v28  ;;  %8142 = vst [vmem:[#allocation113_spill] sm:$0xff] %v5074_v30  ;;  %v5109_v63 = vsub.f32 %v8148_v0, %v4627_v62  ;;  %v5113_v27 = vsub.f32 %v8148_v0, %v4635_v3  ;;  %3905 = vset.pattern.permute.xlu1 %v8153_v48  ;;  %v1801_v59 = vmul.f32 %v1673_v36, %v4867_v13  ;;  %v5130_v36 = vpop.permute.xlu0 %1565 }
 0x102   : > { %8143 = vst [vmem:[#allocation114_spill] sm:$0xff] %v5080_v12  ;;  %v1675_v12 = vmul.f32 %v4915_v52, %v4825_v40  ;;  %8150 = vst [vmem:[#allocation54_spill] sm:$0xff] %v5101_v51  ;;  %v1035_v5 = vmul.f32 %v907_v39, %v4825_v40  ;;  %v906_v11 = vmul.f32 %v4841_v37, %v4833_v44  ;;  %745 = vperm.xlu1 %3905, %v4403_v1  }
 0x103   : > { %8152 = vst [vmem:[#allocation55_spill] sm:$0xff] %v5109_v63  ;;  %v1049_v62 = vmul.f32 %v921_v56, %v8144_v33  ;;  %v1051_v63 = vmul.f32 %v923_v7, %v8146_v35  ;;  %v2067_v0 = vsub.f32 0.0, %v5059_v34  ;;  %v1032_v3 = vmul.f32 %v904_v2, %v8147_v31  ;;  %8154 = vst [vmem:[#allocation76_spill] sm:$0xff] %v5130_v36 }
 0x104   : > { %v1048_v48 = vmul.f32 %v920_v26, %v8149_v53  ;;  %v1481_v8 = vadd.f32 %v1353_v14, %v1033_v46  ;;  %v1803_v13 = vmul.f32 %v1675_v12, %v4883_v50  ;;  %v1674_v40 = vmul.f32 %v4915_v52, %v4833_v44 }
 0x105   : > { %v1050_v39 = vmul.f32 %v922_v47, %v8151_v10  ;;  %v2064_v56 = vsub.f32 0.0, %v5071_v28  ;;  %v2066_v7 = vsub.f32 0.0, %v5074_v30  ;;  %v1800_v37 = vmul.f32 %v1672_v60, %v4887_v6  ;;  %v5136_v34 = vpop.permute.xlu1 %301 }
 0x106   : > { %8155 = vst [vmem:[#allocation56_spill] sm:$0xff] %v5136_v34  ;;  %v5138_v31 = vadd.f32 %v1801_v59, %v1481_v8  ;;  %v1483_v46 = vadd.f32 %v1355_v45, %v1035_v5  ;;  %v1034_v14 = vmul.f32 %v906_v11, %v4833_v44  ;;  %v897_v50 = vmul.f32 %v4839_v42, %v4901_v9 }
 0x107   : > { %3906 = vset.pattern.permute.xlu1 %v8124_v15  ;;  %v2306_v26 = vmul.f32 1.442695, %v2065_v61  ;;  %v1480_v47 = vadd.f32 %v1352_v4, %v1032_v3  ;;  %v899_v12 = vmul.f32 %v4839_v42, %v4905_v25  ;;  %v896_v60 = vmul.f32 %v4839_v42, %v4909_v18 }
 0x108   : > { %8156 = vst [vmem:[#allocation57_spill] sm:$0xff] %v5138_v31  ;;  %1065 = vperm.xlu1 %3906, %v4403_v1   ;;  %v1497_v59 = vadd.f32 %v4853_v38, %v1049_v62  ;;  %v2310_v5 = vmul.f32 1.442695, %v2067_v0  ;;  %v5150_v6 = vadd.f32 %v1803_v13, %v1483_v46  ;;  %v1802_v44 = vmul.f32 %v1674_v40, %v4891_v19  ;;  %v5160_v38 = vpop.permute.xlu0 %1553  ;;  %v8164_v13 = vld [vmem:[#allocation10_spill] sm:$0xff] }
 0x109   : > { %v1499_v45 = vadd.f32 %v4856_v21, %v1051_v63  ;;  %v1496_v61 = vadd.f32 %v4859_v29, %v1048_v48  ;;  %v2304_v3 = vmul.f32 1.442695, %v2064_v56  ;;  %v5155_v4 = vadd.f32 %v1800_v37, %v1480_v47  ;;  %8159 = vst [vmem:[#allocation117_spill] sm:$0xff] %v5160_v38  ;;  %v8161_v29 = vld [vmem:[#allocation83_spill] sm:$0xff]  ;;  %v8165_v56 = vld [vmem:[#allocation80_spill] sm:$0xff] }
 0x10a   : > { %8157 = vst [vmem:[#allocation115_spill] sm:$0xff] %v5150_v6  ;;  %v2308_v11 = vmul.f32 1.442695, %v2066_v7  ;;  %v2057_v8 = vsub.f32 0.0, %v5138_v31  ;;  %v1482_v2 = vadd.f32 %v5024_v16, %v1034_v14  ;;  %v1025_v52 = vmul.f32 %v897_v50, %v4901_v9  ;;  %v5162_v62 = vpop.permute.xlu1 %540 }
 0x10b   : > { %8158 = vst [vmem:[#allocation116_spill] sm:$0xff] %v5155_v4  ;;  %8160 = vst [vmem:[#allocation118_spill] sm:$0xff] %v5162_v62  ;;  %3918 = vpow2.f32 %v2306_v26  ;;  %v1027_v19 = vmul.f32 %v899_v12, %v4905_v25  ;;  %v1024_v21 = vmul.f32 %v896_v60, %v4909_v18  ;;  %v898_v63 = vmul.f32 %v4839_v42, %v8161_v29  ;;  %v8167_v60 = vld [vmem:[#allocation67_spill] sm:$0xff]  ;;  %v8180_v42 = vld [vmem:[#allocation61_spill] sm:$0xff] }
 0x10c   : > { %v8162_v37 = vmov 5   ;;  %v1689_v0 = vmul.f32 %v5130_v36, %v8144_v33  ;;  %3920 = vpow2.f32 %v2310_v5  ;;  %v2059_v16 = vsub.f32 0.0, %v5150_v6 }
 0x10d   : > { %3907 = vset.pattern.permute.xlu1 %v8162_v37  ;;  %v5172_v48 = vadd.f32 %v1802_v44, %v1482_v2  ;;  %v1691_v40 = vmul.f32 %v5130_v36, %v8146_v35  ;;  %v1498_v7 = vadd.f32 %v8165_v56, %v1050_v39  ;;  %3922 = vpow2.f32 %v2304_v3  ;;  %v8171_v2 = vld [vmem:[#allocation8_spill] sm:$0xff] }
 0x10e   : > { %2397 = vperm.xlu1 %3907, %v8164_v13   ;;  %v2056_v46 = vsub.f32 0.0, %v5155_v4  ;;  %v1688_v14 = vmul.f32 %v5130_v36, %v8149_v53  ;;  %3924 = vpow2.f32 %v2308_v11  ;;  %v2290_v33 = vmul.f32 1.442695, %v2057_v8  ;;  %v8175_v13 = vld [vmem:[#allocation70_spill] sm:$0xff] }
 0x10f   : > { %8163 = vst [vmem:[#allocation83_spill] sm:$0xff] %v5172_v48  ;;  %v1473_v50 = vadd.f32 %v4985_v55, %v1025_v52  ;;  %v1690_v26 = vmul.f32 %v5130_v36, %v8151_v10  ;;  %v1475_v47 = vadd.f32 %v4988_v17, %v1027_v19  ;;  %v1472_v12 = vadd.f32 %v4991_v22, %v1024_v21  ;;  %v5187_v39 = vpop.permute.xlu1 %1097  ;;  %v5193_v52 = vpop.permute.xlu0 %1541  ;;  %v8170_v10 = vld [vmem:[#allocation68_spill] sm:$0xff]  ;;  %v8172_v19 = vld [vmem:[#allocation69_spill] sm:$0xff] }
 0x110   : > { %v1026_v35 = vmul.f32 %v898_v63, %v8161_v29  ;;  %8166 = vst [vmem:[#allocation10_spill] sm:$0xff] %v5187_v39  ;;  %v1817_v5 = vmul.f32 %v1689_v0, %v8167_v60  ;;  %v2294_v44 = vmul.f32 1.442695, %v2059_v16  ;;  %v2058_v53 = vsub.f32 0.0, %v5172_v48  ;;  %8168 = vst [vmem:[#allocation80_spill] sm:$0xff] %v5193_v52  ;;  %v8174_v0 = vld [vmem:[#allocation59_spill] sm:$0xff] }
 0x111   : > { %v1665_v3 = vmul.f32 %v5160_v38, %v4901_v9  ;;  %v8169_v55 = vmov 1   ;;  %v1819_v17 = vmul.f32 %v1691_v40, %v8170_v10  ;;  %v2288_v11 = vmul.f32 1.442695, %v2056_v46  ;;  %v8173_v9 = vld [vmem:[#allocation58_spill] sm:$0xff] }
 0x112   : > { %3908 = vset.pattern.permute.xlu1 %v8169_v55  ;;  %v5199_v22 = vsub.f32 %v4980_v32, %v4612_v57  ;;  %v5203_v8 = vsub.f32 %v4980_v32, %v4615_v58  ;;  %v1816_v21 = vmul.f32 %v1688_v14, %v8172_v19  ;;  %3926 = vpow2.f32 %v2290_v33 }
 0x113   : > { %504 = vperm.xlu1 %3908, %v8171_v2   ;;  %v889_v63 = vmul.f32 %v5038_v41, %v8173_v9  ;;  %v891_v16 = vmul.f32 %v5038_v41, %v8174_v0  ;;  %v1818_v40 = vmul.f32 %v1690_v26, %v8175_v13  ;;  %v1667_v56 = vmul.f32 %v5160_v38, %v4905_v25  ;;  %v8179_v13 = vld [vmem:[#allocation60_spill] sm:$0xff] }
 0x114   : > { %v1664_v46 = vmul.f32 %v5160_v38, %v4909_v18  ;;  %v1474_v60 = vadd.f32 %v4995_v24, %v1026_v35  ;;  %v5217_v55 = vadd.f32 %v1817_v5, %v1497_v59  ;;  %3928 = vpow2.f32 %v2294_v44  ;;  %v5220_v10 = vpop.permute.xlu1 %1549  ;;  %v8183_v35 = vld [vmem:[#allocation9_spill] sm:$0xff] }
 0x115   : > { %v2292_v14 = vmul.f32 1.442695, %v2058_v53  ;;  %v1793_v33 = vmul.f32 %v1665_v3, %v4871_v43  ;;  %8177 = vst [vmem:[#allocation68_spill] sm:$0xff] %v5220_v10  ;;  %v5222_v19 = vadd.f32 %v1819_v17, %v1499_v45  ;;  %v1666_v26 = vmul.f32 %v5160_v38, %v8161_v29  ;;  %v5235_v45 = vpop.permute.xlu0 %1529  ;;  %v8185_v53 = vld [vmem:[#allocation82_spill] sm:$0xff] }
 0x116   : > { %8176 = vst [vmem:[#allocation67_spill] sm:$0xff] %v5217_v55  ;;  %v888_v25 = vmul.f32 %v5038_v41, %v8179_v13  ;;  %v890_v18 = vmul.f32 %v5038_v41, %v8180_v42  ;;  %v5231_v24 = vadd.f32 %v1816_v21, %v1496_v61  ;;  %3930 = vpow2.f32 %v2288_v11  ;;  %8182 = vst [vmem:[#allocation58_spill] sm:$0xff] %v5235_v45 }
 0x117   : > { %8178 = vst [vmem:[#allocation8_spill] sm:$0xff] %v5222_v19  ;;  %3910 = vset.pattern.permute.xlu1 %v8124_v15  ;;  %v1017_v43 = vmul.f32 %v889_v63, %v8173_v9  ;;  %v1019_v59 = vmul.f32 %v891_v16, %v8174_v0  ;;  %v5238_v29 = vadd.f32 %v1818_v40, %v1498_v7  ;;  %v2073_v17 = vsub.f32 0.0, %v5217_v55  ;;  %v8188_v40 = vld [vmem:[#allocation55_spill] sm:$0xff] }
 0x118   : > { %8181 = vst [vmem:[#allocation69_spill] sm:$0xff] %v5231_v24  ;;  %1061 = vperm.xlu1 %3910, %v8183_v35   ;;  %v1795_v5 = vmul.f32 %v1667_v56, %v4875_v23  ;;  %v1792_v44 = vmul.f32 %v1664_v46, %v4879_v49  ;;  %v881_v3 = vmul.f32 %v8185_v53, %v5199_v22  ;;  %v5244_v61 = vpop.eup %3918  ;;  %v2075_v23 = vsub.f32 0.0, %v5222_v19  ;;  %v8187_v49 = vld [vmem:[#allocation81_spill] sm:$0xff] }
 0x119   : > { %8184 = vst [vmem:[#allocation59_spill] sm:$0xff] %v5238_v29  ;;  %v5247_v11 = vadd.f32 %v1793_v33, %v1473_v50  ;;  %v1209_v21 = vmul.f32 %v5101_v51, %v5090_v20  ;;  %v1211_v7 = vmul.f32 %v5101_v51, %v5099_v54  ;;  %v5253_v63 = vpop.eup %3920  ;;  %v1794_v16 = vmul.f32 %v1666_v26, %v8187_v49  ;;  %v5263_v33 = vpop.permute.xlu1 %536 }
 0x11a   : > { %v1208_v56 = vmul.f32 %v5101_v51, %v8188_v40  ;;  %v1210_v46 = vmul.f32 %v5101_v51, %v5113_v27  ;;  %v5261_v50 = vpop.eup %3922  ;;  %8189 = vst [vmem:[#allocation60_spill] sm:$0xff] %v5263_v33  ;;  %v2072_v35 = vsub.f32 0.0, %v5231_v24  ;;  %3932 = vpow2.f32 %v2292_v14  ;;  %v5282_v31 = vpop.permute.xlu0 %1517 }
 0x11b   : > { %8186 = vst [vmem:[#allocation70_spill] sm:$0xff] %v5247_v11  ;;  %v1016_v41 = vmul.f32 %v888_v25, %v8179_v13  ;;  %v1018_v38 = vmul.f32 %v890_v18, %v8180_v42  ;;  %v5268_v36 = vpop.eup %3924  ;;  %v8190_v26 = vmov 3   ;;  %v2074_v49 = vsub.f32 0.0, %v5238_v29  ;;  %8193 = vst [vmem:[#allocation81_spill] sm:$0xff] %v5282_v31  ;;  %v8204_v31 = vld [vmem:[#allocation89_spill] sm:$0xff] }
 0x11c   : > { %3911 = vset.pattern.permute.xlu1 %v8190_v26  ;;  %v5272_v48 = vadd.f32 %v1795_v5, %v1475_v47  ;;  %v5274_v51 = vadd.f32 %v1792_v44, %v1472_v12  ;;  %v883_v4 = vmul.f32 %v8185_v53, %v5203_v8  ;;  %v2322_v14 = vmul.f32 1.442695, %v2073_v17 }
 0x11d   : > { %1513 = vperm.xlu1 %3911, %v4403_v1   ;;  %v2049_v25 = vsub.f32 0.0, %v5247_v11  ;;  %v1337_v18 = vmul.f32 %v1209_v21, %v5090_v20  ;;  %v1339_v6 = vmul.f32 %v1211_v7, %v5099_v54  ;;  %v2326_v30 = vmul.f32 1.442695, %v2075_v23  ;;  %v8195_v1 = vld [vmem:[#allocation39_spill] sm:$0xff] }
 0x11e   : > { %8191 = vst [vmem:[#allocation61_spill] sm:$0xff] %v5272_v48  ;;  %8192 = vst [vmem:[#allocation9_spill] sm:$0xff] %v5274_v51  ;;  %v5284_v28 = vadd.f32 %v1794_v16, %v1474_v60  ;;  %v1336_v47 = vmul.f32 %v1208_v56, %v8188_v40  ;;  %v1338_v12 = vmul.f32 %v1210_v46, %v5113_v27  ;;  %v2320_v5 = vmul.f32 1.442695, %v2072_v35  ;;  %v8196_v21 = vld [vmem:[#allocation43_spill] sm:$0xff]  ;;  %v5301_v60 = vpop.permute.xlu1 %773  ;;  %v8199_v46 = vld [vmem:[#allocation105_spill] sm:$0xff] }
 0x11f   : > { %v5289_v44 = vmul.f32 %v881_v3, %v5199_v22  ;;  %v5293_v17 = vsub.f32 %v4980_v32, %v8195_v1  ;;  %v5297_v7 = vsub.f32 %v4980_v32, %v8196_v21  ;;  %v5299_v11 = vpop.eup %3926  ;;  %8198 = vst [vmem:[#allocation120_spill] sm:$0xff] %v5301_v60  ;;  %v2324_v23 = vmul.f32 1.442695, %v2074_v49  ;;  %v8200_v3 = vld [vmem:[#allocation27_spill] sm:$0xff] }
 0x120   : > { %8194 = vst [vmem:[#allocation55_spill] sm:$0xff] %v5284_v28  ;;  %8197 = vst [vmem:[#allocation119_spill] sm:$0xff] %v5299_v11  ;;  %v2051_v16 = vsub.f32 0.0, %v5272_v48  ;;  %v2048_v56 = vsub.f32 0.0, %v5274_v51  ;;  %v5307_v35 = vmul.f32 %v8200_v3, %v8199_v46  ;;  %v8202_v29 = vmov 2  }
 0x121   : > { %3912 = vset.pattern.permute.xlu1 %v8202_v29  ;;  %3934 = vpow2.f32 %v2322_v14  ;;  %v2274_v24 = vmul.f32 1.442695, %v2049_v25  ;;  %v1465_v19 = vadd.f32 %v1337_v18, %v1017_v43  ;;  %v1467_v32 = vadd.f32 %v1339_v6, %v1019_v59  ;;  %v5310_v55 = vpop.eup %3928  ;;  %v8209_v18 = vld [vmem:[#allocation40_spill] sm:$0xff] }
 0x122   : > { %8201 = vst [vmem:[#allocation105_spill] sm:$0xff] %v5307_v35  ;;  %8203 = vst [vmem:[#allocation121_spill] sm:$0xff] %v5310_v55  ;;  %737 = vperm.xlu1 %3912, %v8171_v2   ;;  %3936 = vpow2.f32 %v2326_v30  ;;  %v2050_v49 = vsub.f32 0.0, %v5284_v28  ;;  %v1464_v11 = vadd.f32 %v1336_v47, %v1016_v41  ;;  %v5314_v48 = vadd.f32 %v1338_v12, %v1018_v38  ;;  %v5324_v2 = vpop.permute.xlu0 %1509  ;;  %v8211_v55 = vld [vmem:[#allocation92_spill] sm:$0xff] }
 0x123   : > { %3938 = vpow2.f32 %v2320_v5  ;;  %v1657_v51 = vmul.f32 %v5220_v10, %v8173_v9  ;;  %v1201_v29 = vmul.f32 %v5187_v39, %v8204_v31  ;;  %v880_v6 = vmul.f32 %v8185_v53, %v5293_v17  ;;  %v5322_v43 = vpop.eup %3930  ;;  %8206 = vst [vmem:[#allocation122_spill] sm:$0xff] %v5324_v2  ;;  %v5328_v59 = vpop.permute.xlu1 %1545  ;;  %v8208_v9 = vld [vmem:[#allocation90_spill] sm:$0xff] }
 0x124   : > { %8205 = vst [vmem:[#allocation89_spill] sm:$0xff] %v5322_v43  ;;  %3940 = vpow2.f32 %v2324_v23  ;;  %v2278_v30 = vmul.f32 1.442695, %v2051_v16  ;;  %v2272_v41 = vmul.f32 1.442695, %v2048_v56  ;;  %v1659_v38 = vmul.f32 %v5220_v10, %v8174_v0  ;;  %8207 = vst [vmem:[#allocation123_spill] sm:$0xff] %v5328_v59 }
 0x125   : > { %3942 = vpow2.f32 %v2274_v24  ;;  %v1203_v14 = vmul.f32 %v5187_v39, %v8208_v9  ;;  %v448_v25 = vsub.f32 %v5136_v34, %v4612_v57  ;;  %v681_v47 = vsub.f32 %v5162_v62, %v8209_v18  ;;  %v8210_v23 = vld [vmem:[#allocation91_spill] sm:$0xff]  ;;  %v5344_v16 = vld [vmem:[%s4392_s26] sm:$0xff] }
 0x126   : > { %3913 = vset.pattern.permute.xlu1 %v8124_v15  ;;  %v2276_v12 = vmul.f32 1.442695, %v2050_v49  ;;  %v1656_v5 = vmul.f32 %v5220_v10, %v8179_v13  ;;  %v1200_v0 = vmul.f32 %v5187_v39, %v8210_v23  ;;  %v882_v24 = vmul.f32 %v8185_v53, %v5297_v7  ;;  %v5361_v45 = vpop.permute.xlu0 %2393 }
 0x127   : > { %1057 = vperm.xlu1 %3913, %v5344_v16   ;;  %v1785_v56 = vmul.f32 %v1657_v51, %v5090_v20  ;;  %v1329_v43 = vmul.f32 %v1201_v29, %v8204_v31  ;;  %v1202_v15 = vmul.f32 %v5187_v39, %v8211_v55  ;;  %v873_v49 = vmul.f32 %v5301_v60, %v448_v25  ;;  %v5352_v13 = vpop.eup %3932  ;;  %v8213_v29 = vld [vmem:[#allocation25_spill] sm:$0xff] }
 0x128   : > { %8212 = vst [vmem:[#allocation90_spill] sm:$0xff] %v5352_v13  ;;  %3944 = vpow2.f32 %v2278_v30  ;;  %v1787_v28 = vmul.f32 %v1659_v38, %v5099_v54  ;;  %v1658_v53 = vmul.f32 %v5220_v10, %v8180_v42  ;;  %v1011_v2 = vmul.f32 %v883_v4, %v5203_v8  ;;  %8214 = vst [vmem:[#allocation40_spill] sm:$0xff] %v5361_v45  ;;  %v5363_v35 = vpop.permute.xlu1 %291 }
 0x129   : > { %3946 = vpow2.f32 %v2272_v41  ;;  %v1331_v51 = vmul.f32 %v1203_v14, %v8208_v9  ;;  %v1008_v20 = vmul.f32 %v880_v6, %v5293_v17  ;;  %v1193_v39 = vmul.f32 %v8213_v29, %v681_v47  ;;  %8215 = vst [vmem:[#allocation91_spill] sm:$0xff] %v5363_v35  ;;  %v4175_v14 = vld [vmem:[%s4392_s26 + $0x68] sm:$0xff] }
 0x12a   : > { %3948 = vpow2.f32 %v2276_v12  ;;  %v1784_v54 = vmul.f32 %v1656_v5, %v8188_v40  ;;  %v1328_v30 = vmul.f32 %v1200_v0, %v8210_v23  ;;  %v1010_v42 = vmul.f32 %v882_v24, %v5297_v7  ;;  %v8218_v0 = vld [vmem:[#allocation41_spill] sm:$0xff] }
 0x12b   : > { %3915 = vset.pattern.permute.xlu1 %v8162_v37  ;;  %v5369_v4 = vadd.f32 %v1785_v56, %v1465_v19  ;;  %v5372_v41 = vadd.f32 %v1329_v43, %v5289_v44  ;;  %v1330_v6 = vmul.f32 %v1202_v15, %v8211_v55  ;;  %v1001_v38 = vmul.f32 %v873_v49, %v448_v25 }
 0x12c   : > { %2389 = vperm.xlu1 %3915, %v4175_v14   ;;  %v5376_v10 = vadd.f32 %v1787_v28, %v1467_v32  ;;  %v1786_v40 = vmul.f32 %v1658_v53, %v5113_v27  ;;  %v1641_v12 = vmul.f32 %v5193_v52, %v448_v25  ;;  %v450_v5 = vsub.f32 %v5136_v34, %v4615_v58 }
 0x12d   : > { %8216 = vst [vmem:[#allocation92_spill] sm:$0xff] %v5369_v4  ;;  %v5384_v19 = vmul.f32 %v5244_v61, %v5361_v45  ;;  %v5388_v44 = vmul.f32 %v5253_v63, %v5361_v45  ;;  %v1321_v43 = vmul.f32 %v1193_v39, %v681_v47  ;;  %v5392_v28 = vsub.f32 %v5162_v62, %v8218_v0  ;;  %v5408_v63 = vpop.permute.xlu1 %769 }
 0x12e   : > { %8217 = vst [vmem:[#allocation124_spill] sm:$0xff] %v5376_v10  ;;  %v5394_v32 = vpop.eup %3934  ;;  %v5398_v27 = vmul.f32 %v5261_v50, %v5361_v45  ;;  %v5400_v53 = vadd.f32 %v1784_v54, %v1464_v11  ;;  %v5402_v25 = vadd.f32 %v1331_v51, %v1011_v2  ;;  %v5404_v61 = vadd.f32 %v1328_v30, %v1008_v20 }
 0x12f   : > { %v5406_v24 = vpop.eup %3936  ;;  %8220 = vst [vmem:[#allocation126_spill] sm:$0xff] %v5408_v63  ;;  %v5412_v39 = vmul.f32 %v5268_v36, %v5361_v45  ;;  %v2041_v56 = vsub.f32 0.0, %v5369_v4  ;;  %v1449_v15 = vadd.f32 %v1321_v43, %v1001_v38  ;;  %v875_v50 = vmul.f32 %v5301_v60, %v450_v5 }
 0x130   : > { %8219 = vst [vmem:[#allocation125_spill] sm:$0xff] %v5400_v53  ;;  %v5416_v49 = vpop.eup %3938  ;;  %3916 = vset.pattern.permute.xlu1 %v8190_v26  ;;  %v5420_v11 = vadd.f32 %v1786_v40, %v5314_v48  ;;  %v1649_v2 = vmul.f32 %v5328_v59, %v5199_v22  ;;  %v5424_v51 = vadd.f32 %v1330_v6, %v1010_v42  ;;  %v2043_v38 = vsub.f32 0.0, %v5376_v10  ;;  %v8224_v42 = vld [vmem:[#allocation42_spill] sm:$0xff]  ;;  %v5441_v40 = vpop.permute.xlu0 %2385 }
 0x131   : > { %8221 = vst [vmem:[#allocation127_spill] sm:$0xff] %v5416_v49  ;;  %v1769_v20 = vmul.f32 %v1641_v12, %v681_v47  ;;  %v5426_v36 = vpop.eup %3940  ;;  %1505 = vperm.xlu1 %3916, %v5344_v16   ;;  %v1195_v48 = vmul.f32 %v8213_v29, %v5392_v28  ;;  %v1651_v22 = vmul.f32 %v5328_v59, %v5203_v8  ;;  %8225 = vst [vmem:[#allocation130_spill] sm:$0xff] %v5441_v40 }
 0x132   : > { %8222 = vst [vmem:[#allocation128_spill] sm:$0xff] %v5420_v11  ;;  %8223 = vst [vmem:[#allocation129_spill] sm:$0xff] %v5426_v36  ;;  %v3943_v26 = vpop.eup %3942  ;;  %v447_v47 = vsub.f32 %v5136_v34, %v8195_v1  ;;  %v680_v6 = vsub.f32 %v5162_v62, %v8224_v42  ;;  %v2258_v43 = vmul.f32 1.442695, %v2041_v56  ;;  %v1003_v54 = vmul.f32 %v875_v50, %v450_v5  ;;  %v5446_v45 = vpop.permute.xlu1 %1089 }
 0x133   : > { %v5444_v30 = vadd.f32 %v1769_v20, %v1449_v15  ;;  %8227 = vst [vmem:[#allocation132_spill] sm:$0xff] %v5446_v45  ;;  %v1777_v14 = vmul.f32 %v1649_v2, %v8204_v31  ;;  %v1648_v8 = vmul.f32 %v5328_v59, %v5293_v17  ;;  %v1650_v10 = vmul.f32 %v5328_v59, %v5297_v7  ;;  %v8228_v20 = vld [vmem:[#allocation45_spill] sm:$0xff]  ;;  %v4176_v17 = vld [vmem:[%s4392_s26 + $0x58] sm:$0xff] }
 0x134   : > { %v872_v4 = vmul.f32 %v5301_v60, %v447_v47  ;;  %v1323_v56 = vmul.f32 %v1195_v48, %v5392_v28  ;;  %v1643_v15 = vmul.f32 %v5193_v52, %v450_v5  ;;  %v449_v50 = vsub.f32 %v5136_v34, %v8196_v21 }
 0x135   : > { %8226 = vst [vmem:[#allocation131_spill] sm:$0xff] %v5444_v30  ;;  %v3945_v13 = vpop.eup %3944  ;;  %3917 = vset.pattern.permute.xlu1 %v8162_v37  ;;  %v682_v31 = vsub.f32 %v5162_v62, %v8228_v20  ;;  %v5463_v7 = vmul.f32 %v3943_v26, %v5441_v40  ;;  %v2262_v12 = vmul.f32 1.442695, %v2043_v38  ;;  %v1779_v59 = vmul.f32 %v1651_v22, %v8208_v9 }
 0x136   : > { %v3947_v2 = vpop.eup %3946  ;;  %2381 = vperm.xlu1 %3917, %v4176_v17   ;;  %v1192_v37 = vmul.f32 %v8213_v29, %v680_v6  ;;  %v2040_v5 = vsub.f32 0.0, %v5400_v53  ;;  %v2025_v34 = vsub.f32 0.0, %v5444_v30  ;;  %v1451_v36 = vadd.f32 %v1323_v56, %v1003_v54  ;;  %v4177_v56 = vld [vmem:[%s4392_s26 + $0x50] sm:$0xff] }
 0x137   : > { %v3949_v48 = vpop.eup %3948  ;;  %v874_v62 = vmul.f32 %v5301_v60, %v449_v50  ;;  %v5471_v49 = vmul.f32 %v3945_v13, %v5441_v40  ;;  %3950 = vpow2.f32 %v2258_v43  ;;  %v1776_v26 = vmul.f32 %v1648_v8, %v8210_v23  ;;  %v5474_v17 = vpop.permute.xlu1 %528 }
 0x138   : > { %v1000_v38 = vmul.f32 %v872_v4, %v447_v47  ;;  %8229 = vst [vmem:[#allocation133_spill] sm:$0xff] %v5474_v17  ;;  %v5477_v9 = vadd.f32 %v1777_v14, %v5372_v41  ;;  %v1778_v22 = vmul.f32 %v1650_v10, %v8211_v55  ;;  %v1771_v53 = vmul.f32 %v1643_v15, %v5392_v28 }
 0x139   : > { %v1194_v54 = vmul.f32 %v8213_v29, %v682_v31  ;;  %v2042_v13 = vsub.f32 0.0, %v5420_v11  ;;  %v5485_v43 = vadd.f32 %v1779_v59, %v5402_v25  ;;  %v1320_v23 = vmul.f32 %v1192_v37, %v680_v6 }
 0x13a   : > { %8230 = vst [vmem:[#allocation134_spill] sm:$0xff] %v5477_v9  ;;  %2377 = vperm.xlu1 %3917, %v4177_v56   ;;  %v1640_v4 = vmul.f32 %v5193_v52, %v447_v47  ;;  %v2226_v14 = vmul.f32 1.442695, %v2025_v34  ;;  %v5489_v8 = vadd.f32 %v1771_v53, %v1451_v36  ;;  %v1002_v55 = vmul.f32 %v874_v62, %v449_v50  ;;  %v4178_v53 = vld [vmem:[%s4392_s26 + $0x40] sm:$0xff] }
 0x13b   : > { %8231 = vst [vmem:[#allocation135_spill] sm:$0xff] %v5485_v43  ;;  %v5492_v10 = vmul.f32 %v3947_v2, %v5441_v40  ;;  %3952 = vpow2.f32 %v2262_v12  ;;  %v5495_v28 = vadd.f32 %v1776_v26, %v5404_v61  ;;  %v1448_v15 = vadd.f32 %v1320_v23, %v1000_v38  ;;  %v4179_v23 = vld [vmem:[%s4392_s26 + $0x30] sm:$0xff] }
 0x13c   : > { %8232 = vst [vmem:[#allocation136_spill] sm:$0xff] %v5489_v8  ;;  %v2033_v59 = vsub.f32 0.0, %v5477_v9  ;;  %v5499_v25 = vadd.f32 %v1778_v22, %v5424_v51  ;;  %v1322_v47 = vmul.f32 %v1194_v54, %v682_v31  ;;  %v1642_v37 = vmul.f32 %v5193_v52, %v449_v50  ;;  %v5502_v34 = vpop.permute.xlu1 %765 }
 0x13d   : > { %8233 = vst [vmem:[#allocation137_spill] sm:$0xff] %v5495_v28  ;;  %8235 = vst [vmem:[#allocation139_spill] sm:$0xff] %v5502_v34  ;;  %v2256_v36 = vmul.f32 1.442695, %v2040_v5  ;;  %v2035_v61 = vsub.f32 0.0, %v5485_v43  ;;  %v1768_v12 = vmul.f32 %v1640_v4, %v680_v6  ;;  %3954 = vpow2.f32 %v2226_v14  ;;  %v8250_v43 = vld [vmem:[#allocation110_spill] sm:$0xff] }
 0x13e   : > { %8234 = vst [vmem:[#allocation138_spill] sm:$0xff] %v5499_v25  ;;  %2369 = vperm.xlu1 %3917, %v4178_v53   ;;  %v2260_v2 = vmul.f32 1.442695, %v2042_v13  ;;  %v2027_v26 = vsub.f32 0.0, %v5489_v8  ;;  %v1450_v51 = vadd.f32 %v1322_v47, %v1002_v55  ;;  %v5509_v38 = vmul.f32 %v3949_v48, %v5441_v40  ;;  %v8239_v53 = vld [vmem:[#allocation85_spill] sm:$0xff]  ;;  %v8242_v48 = vld [vmem:[#allocation87_spill] sm:$0xff] }
 0x13f   : > { %v2032_v50 = vsub.f32 0.0, %v5495_v28  ;;  %v5512_v22 = vadd.f32 %v1768_v12, %v1448_v15  ;;  %v5516_v54 = vsub.f32 %v5263_v33, %v8209_v18  ;;  %v2242_v5 = vmul.f32 1.442695, %v2033_v59 }
 0x140   : > { %v2034_v56 = vsub.f32 0.0, %v5499_v25  ;;  %v1770_v6 = vmul.f32 %v1642_v37, %v682_v31  ;;  %v5521_v13 = vsub.f32 %v5263_v33, %v8218_v0  ;;  %3956 = vpow2.f32 %v2256_v36 }
 0x141   : > { %8236 = vst [vmem:[#allocation140_spill] sm:$0xff] %v5512_v22  ;;  %v2246_v4 = vmul.f32 1.442695, %v2035_v61  ;;  %v1185_v14 = vmul.f32 %v5446_v45, %v5516_v54  ;;  %v5527_v55 = vpop.permute.xlu1 %1537  ;;  %3958 = vpow2.f32 %v2260_v2  ;;  %v2230_v15 = vmul.f32 1.442695, %v2027_v26 }
 0x142   : > { %2361 = vperm.xlu1 %3917, %v4179_v23   ;;  %8237 = vst [vmem:[#allocation141_spill] sm:$0xff] %v5527_v55  ;;  %v5529_v59 = vadd.f32 %v1770_v6, %v1450_v51  ;;  %v1187_v31 = vmul.f32 %v5446_v45, %v5521_v13  ;;  %v2240_v47 = vmul.f32 1.442695, %v2032_v50  ;;  %v2024_v37 = vsub.f32 0.0, %v5512_v22  ;;  %v8241_v51 = vld [vmem:[#allocation86_spill] sm:$0xff]  ;;  %v4180_v23 = vld [vmem:[%s4392_s26 + $0x20] sm:$0xff] }
 0x143   : > { %v865_v36 = vmul.f32 %v5408_v63, %v8239_v53  ;;  %v5538_v61 = vsub.f32 %v5263_v33, %v8224_v42  ;;  %3960 = vpow2.f32 %v2242_v5  ;;  %v2244_v26 = vmul.f32 1.442695, %v2034_v56 }
 0x144   : > { %8238 = vst [vmem:[#allocation142_spill] sm:$0xff] %v5529_v59  ;;  %v5540_v12 = vpop.eup %3950  ;;  %v867_v6 = vmul.f32 %v5408_v63, %v8241_v51  ;;  %3962 = vpow2.f32 %v2246_v4  ;;  %v1313_v50 = vmul.f32 %v1185_v14, %v5516_v54  ;;  %v864_v62 = vmul.f32 %v5408_v63, %v8242_v48 }
 0x145   : > { %8240 = vst [vmem:[#allocation85_spill] sm:$0xff] %v5540_v12  ;;  %v1184_v41 = vmul.f32 %v5446_v45, %v5538_v61  ;;  %3964 = vpow2.f32 %v2230_v15  ;;  %v2026_v2 = vsub.f32 0.0, %v5529_v59  ;;  %v1315_v5 = vmul.f32 %v1187_v31, %v5521_v13 }
 0x146   : > { %2353 = vperm.xlu1 %3917, %v4180_v23   ;;  %v674_v56 = vsub.f32 %v5263_v33, %v8228_v20  ;;  %v5555_v29 = vpop.permute.xlu1 %524  ;;  %3966 = vpow2.f32 %v2240_v47  ;;  %v2224_v4 = vmul.f32 1.442695, %v2024_v37  ;;  %v993_v14 = vmul.f32 %v865_v36, %v8239_v53  ;;  %v8244_v23 = vld [vmem:[#allocation88_spill] sm:$0xff]  ;;  %v4181_v33 = vld [vmem:[%s4392_s26 + $0x10] sm:$0xff] }
 0x147   : > { %8243 = vst [vmem:[#allocation86_spill] sm:$0xff] %v5555_v29  ;;  %v866_v52 = vmul.f32 %v5408_v63, %v8244_v23  ;;  %3968 = vpow2.f32 %v2244_v26  ;;  %v995_v15 = vmul.f32 %v867_v6, %v8241_v51  ;;  %v432_v31 = vsub.f32 %v5363_v35, %v4612_v57 }
 0x148   : > { %v5560_v60 = vpop.eup %3952  ;;  %v1186_v40 = vmul.f32 %v5446_v45, %v674_v56  ;;  %v1441_v25 = vadd.f32 %v1313_v50, %v993_v14  ;;  %v992_v47 = vmul.f32 %v864_v62, %v8242_v48  ;;  %v1312_v37 = vmul.f32 %v1184_v41, %v5538_v61  ;;  %v8247_v50 = vld [vmem:[#allocation106_spill] sm:$0xff] }
 0x149   : > { %8245 = vst [vmem:[#allocation87_spill] sm:$0xff] %v5560_v60  ;;  %v434_v36 = vsub.f32 %v5363_v35, %v4615_v58  ;;  %v2228_v63 = vmul.f32 1.442695, %v2026_v2  ;;  %v1633_v26 = vmul.f32 %v5527_v55, %v8239_v53  ;;  %v1443_v6 = vadd.f32 %v1315_v5, %v995_v15  ;;  %v5574_v60 = vpop.permute.xlu0 %2373 }
 0x14a   : > { %2345 = vperm.xlu1 %3917, %v4181_v33   ;;  %v857_v45 = vmul.f32 %v5502_v34, %v432_v31  ;;  %v3955_v28 = vpop.eup %3954  ;;  %8246 = vst [vmem:[#allocation88_spill] sm:$0xff] %v5574_v60  ;;  %3970 = vpow2.f32 %v2224_v4  ;;  %v994_v33 = vmul.f32 %v866_v52, %v8244_v23  ;;  %v1179_v41 = vmul.f32 %v8200_v3, %v8247_v50  ;;  %v8249_v4 = vld [vmem:[#allocation105_spill] sm:$0xff] }
 0x14b   : > { %v859_v62 = vmul.f32 %v5502_v34, %v434_v36  ;;  %v5580_v14 = vpop.permute.xlu1 %1081  ;;  %v1635_v2 = vmul.f32 %v5527_v55, %v8241_v51  ;;  %v1632_v53 = vmul.f32 %v5527_v55, %v8242_v48  ;;  %v1314_v5 = vmul.f32 %v1186_v40, %v674_v56 }
 0x14c   : > { %8248 = vst [vmem:[#allocation106_spill] sm:$0xff] %v5580_v14  ;;  %v1634_v15 = vmul.f32 %v5527_v55, %v8244_v23  ;;  %v1440_v52 = vadd.f32 %v1312_v37, %v992_v47  ;;  %v1305_v12 = vmul.f32 %v8249_v4, %v8199_v46  ;;  %v1176_v9 = vmul.f32 %v8200_v3, %v8250_v43 }
 0x14d   : > { %v657_v11 = vsub.f32 %v5474_v17, %v8209_v18  ;;  %v5595_v51 = vpop.eup %3956  ;;  %v5598_v48 = vmul.f32 %v3955_v28, %v5574_v60  ;;  %3972 = vpow2.f32 %v2228_v63  ;;  %v1761_v40 = vmul.f32 %v1633_v26, %v5516_v54 }
 0x14e   : > { %2337 = vperm.xlu1 %3917, %v5344_v16   ;;  %8251 = vst [vmem:[#allocation105_spill] sm:$0xff] %v5595_v51  ;;  %v985_v23 = vmul.f32 %v857_v45, %v432_v31  ;;  %v5601_v16 = vpop.eup %3958  ;;  %v987_v47 = vmul.f32 %v859_v62, %v434_v36  ;;  %v1307_v37 = vmul.f32 %v1179_v41, %v8247_v50  ;;  %v8256_v41 = vld [vmem:[#allocation96_spill] sm:$0xff]  ;;  %vm2769_vm0 = vcmp.ge.f32.partialorder %v5384_v19, 0.003921569 }
 0x14f   : > { %8252 = vst [vmem:[#allocation110_spill] sm:$0xff] %v5598_v48  ;;  %8253 = vst [vmem:[#allocation143_spill] sm:$0xff] %v5601_v16  ;;  %v431_v4 = vsub.f32 %v5363_v35, %v8195_v1  ;;  %v1169_v55 = vmul.f32 %v5580_v14, %v657_v11  ;;  %v1763_v59 = vmul.f32 %v1635_v2, %v5521_v13  ;;  %v8257_v16 = vld [vmem:[#allocation93_spill] sm:$0xff]  ;;  %vm2771_vm1 = vcmp.ge.f32.partialorder %v5388_v44, 0.003921569 }
 0x150   : > { %v1760_v51 = vmul.f32 %v1632_v53, %v5538_v61  ;;  %v1442_v28 = vadd.f32 %v1314_v5, %v994_v33  ;;  %v1762_v22 = vmul.f32 %v1634_v15, %v674_v56  ;;  %v5609_v63 = vpop.eup %3960  ;;  %v5611_v54 = vpop.permute.xlu1 %1533  ;;  %v1304_v26 = vmul.f32 %v1176_v9, %v8250_v43  ;;  %v8260_v9 = vld [vmem:[#allocation111_spill] sm:$0xff] }
 0x151   : > { %8254 = vst [vmem:[#allocation144_spill] sm:$0xff] %v5609_v63  ;;  %8255 = vst [vmem:[#allocation145_spill] sm:$0xff] %v5611_v54  ;;  %v856_v45 = vmul.f32 %v5502_v34, %v431_v4  ;;  %v433_v62 = vsub.f32 %v5363_v35, %v8196_v21  ;;  %v849_v8 = vmul.f32 %v8257_v16, %v8256_v41  ;;  %v5619_v30 = vpop.eup %3962  ;;  %vm2768_vm7 = vcmp.ge.f32.partialorder %v5398_v27, 0.003921569 }
 0x152   : > { %8258 = vst [vmem:[#allocation96_spill] sm:$0xff] %v5619_v30  ;;  %v5622_v61 = vadd.f32 %v1761_v40, %v1441_v25  ;;  %v1433_v56 = vadd.f32 %v1305_v12, %v985_v23  ;;  %v1625_v33 = vmul.f32 %v5611_v54, %v432_v31  ;;  %v3965_v2 = vpop.eup %3964  ;;  %v1435_v53 = vadd.f32 %v1307_v37, %v987_v47  ;;  %v8265_v25 = vld [vmem:[#allocation58_spill] sm:$0xff] }
 0x153   : > { %v858_v5 = vmul.f32 %v5502_v34, %v433_v62  ;;  %v1178_v15 = vmul.f32 %v8200_v3, %v8260_v9  ;;  %v1297_v35 = vmul.f32 %v1169_v55, %v657_v11  ;;  %v5628_v63 = vpop.eup %3966  ;;  %v5630_v21 = vadd.f32 %v1763_v59, %v1443_v6 }
 0x154   : > { %8259 = vst [vmem:[#allocation146_spill] sm:$0xff] %v5622_v61  ;;  %8261 = vst [vmem:[#allocation111_spill] sm:$0xff] %v5628_v63  ;;  %v5632_v30 = vadd.f32 %v1760_v51, %v1440_v52  ;;  %v5634_v13 = vadd.f32 %v1762_v22, %v1442_v28  ;;  %v1617_v12 = vmul.f32 %v8265_v25, %v8256_v41  ;;  %v5638_v31 = vpop.eup %3968  ;;  %v2017_v22 = vsub.f32 0.0, %v5622_v61 }
 0x155   : > { %8262 = vst [vmem:[#allocation147_spill] sm:$0xff] %v5630_v21  ;;  %8266 = vst [vmem:[#allocation150_spill] sm:$0xff] %v5638_v31  ;;  %v1627_v40 = vmul.f32 %v5611_v54, %v434_v36  ;;  %v1624_v23 = vmul.f32 %v5611_v54, %v431_v4  ;;  %v977_v47 = vmul.f32 %v849_v8, %v8256_v41  ;;  %v5645_v59 = vpop.permute.xlu1 %757  ;;  %v2019_v41 = vsub.f32 0.0, %v5630_v21  ;;  %v8290_v21 = vld [vmem:[#allocation52_spill] sm:$0xff] }
 0x156   : > { %8263 = vst [vmem:[#allocation148_spill] sm:$0xff] %v5632_v30  ;;  %8264 = vst [vmem:[#allocation149_spill] sm:$0xff] %v5634_v13  ;;  %v659_v55 = vsub.f32 %v5474_v17, %v8218_v0  ;;  %v5648_v6 = vmul.f32 %v3965_v2, %v5574_v60  ;;  %v1753_v52 = vmul.f32 %v1625_v33, %v8199_v46  ;;  %v2016_v34 = vsub.f32 0.0, %v5632_v30 }
 0x157   : > { %8267 = vst [vmem:[#allocation151_spill] sm:$0xff] %v5645_v59  ;;  %v984_v51 = vmul.f32 %v856_v45, %v431_v4  ;;  %v986_v37 = vmul.f32 %v858_v5, %v433_v62  ;;  %v1626_v36 = vmul.f32 %v5611_v54, %v433_v62  ;;  %v1425_v28 = vadd.f32 %v1297_v35, %v977_v47  ;;  %v3971_v8 = vpop.eup %3970  ;;  %v8269_v45 = vld [vmem:[#allocation97_spill] sm:$0xff] }
 0x158   : > { %8268 = vst [vmem:[#allocation152_spill] sm:$0xff] %v5648_v6  ;;  %v1171_v3 = vmul.f32 %v5580_v14, %v659_v55  ;;  %v2018_v31 = vsub.f32 0.0, %v5634_v13  ;;  %v1306_v2 = vmul.f32 %v1178_v15, %v8260_v9  ;;  %v1755_v63 = vmul.f32 %v1627_v40, %v8247_v50 }
 0x159   : > { %v1752_v46 = vmul.f32 %v1624_v23, %v8250_v43  ;;  %v1745_v4 = vmul.f32 %v1617_v12, %v657_v11  ;;  %v851_v62 = vmul.f32 %v8257_v16, %v8269_v45  ;;  %v2210_v33 = vmul.f32 1.442695, %v2017_v22 }
 0x15a   : > { %v5663_v5 = vadd.f32 %v1753_v52, %v1433_v56  ;;  %v1432_v47 = vadd.f32 %v1304_v26, %v984_v51  ;;  %v3973_v54 = vpop.eup %3972  ;;  %v5665_v30 = vpop.permute.xlu1 %1077  ;;  %v5668_v13 = vmul.f32 %v3971_v8, %v5574_v60  ;;  %v1754_v50 = vmul.f32 %v1626_v36, %v8260_v9  ;;  %v8278_v36 = vld [vmem:[#allocation98_spill] sm:$0xff] }
 0x15b   : > { %8271 = vst [vmem:[#allocation153_spill] sm:$0xff] %v5665_v30  ;;  %v5671_v15 = vadd.f32 %v1745_v4, %v1425_v28  ;;  %v1299_v11 = vmul.f32 %v1171_v3, %v659_v55  ;;  %v2214_v43 = vmul.f32 1.442695, %v2019_v41  ;;  %v2208_v12 = vmul.f32 1.442695, %v2016_v34 }
 0x15c   : > { %8270 = vst [vmem:[#allocation97_spill] sm:$0xff] %v5663_v5  ;;  %8272 = vst [vmem:[#allocation154_spill] sm:$0xff] %v5668_v13  ;;  %v2212_v40 = vmul.f32 1.442695, %v2018_v31  ;;  %v1434_v23 = vadd.f32 %v1306_v2, %v986_v37  ;;  %v5673_v35 = vadd.f32 %v1755_v63, %v1435_v53  ;;  %v5675_v56 = vadd.f32 %v1752_v46, %v1432_v47 }
 0x15d   : > { %8273 = vst [vmem:[#allocation155_spill] sm:$0xff] %v5671_v15  ;;  %v979_v26 = vmul.f32 %v851_v62, %v8269_v45  ;;  %v1619_v22 = vmul.f32 %v8265_v25, %v8269_v45  ;;  %3974 = vpow2.f32 %v2210_v33  ;;  %v2009_v52 = vsub.f32 0.0, %v5663_v5  ;;  %v8279_v62 = vld [vmem:[#allocation100_spill] sm:$0xff]  ;;  %v8308_v5 = vld [vmem:[#allocation47_spill] sm:$0xff] }
 0x15e   : > { %8274 = vst [vmem:[#allocation156_spill] sm:$0xff] %v5673_v35  ;;  %8275 = vst [vmem:[#allocation157_spill] sm:$0xff] %v5675_v56  ;;  %v656_v9 = vsub.f32 %v5474_v17, %v8224_v42  ;;  %v658_v3 = vsub.f32 %v5474_v17, %v8228_v20  ;;  %v5686_v63 = vadd.f32 %v1754_v50, %v1434_v23  ;;  %v2001_v53 = vsub.f32 0.0, %v5671_v15 }
 0x15f   : > { %v1427_v31 = vadd.f32 %v1299_v11, %v979_v26  ;;  %v5689_v51 = vpop.permute.xlu1 %516  ;;  %v5692_v37 = vmul.f32 %v3973_v54, %v5574_v60  ;;  %v848_v28 = vmul.f32 %v8257_v16, %v8278_v36  ;;  %3976 = vpow2.f32 %v2214_v43 }
 0x160   : > { %8276 = vst [vmem:[#allocation158_spill] sm:$0xff] %v5686_v63  ;;  %8277 = vst [vmem:[#allocation159_spill] sm:$0xff] %v5689_v51  ;;  %v1168_v8 = vmul.f32 %v5580_v14, %v656_v9  ;;  %v1170_v41 = vmul.f32 %v5580_v14, %v658_v3  ;;  %v2011_v2 = vsub.f32 0.0, %v5673_v35  ;;  %v2008_v46 = vsub.f32 0.0, %v5675_v56 }
 0x161   : > { %v1747_v4 = vmul.f32 %v1619_v22, %v659_v55  ;;  %3978 = vpow2.f32 %v2208_v12  ;;  %v2194_v45 = vmul.f32 1.442695, %v2009_v52  ;;  %v850_v33 = vmul.f32 %v8257_v16, %v8279_v62 }
 0x162   : > { %v649_v54 = vsub.f32 %v5555_v29, %v8209_v18  ;;  %3980 = vpow2.f32 %v2212_v40  ;;  %v2010_v47 = vsub.f32 0.0, %v5686_v63  ;;  %v5705_v50 = vmul.f32 1.442695, %v2001_v53 }
 0x163   : > { %v5707_v11 = vadd.f32 %v1747_v4, %v1427_v31  ;;  %v976_v43 = vmul.f32 %v848_v28, %v8278_v36  ;;  %v1296_v23 = vmul.f32 %v1168_v8, %v656_v9  ;;  %v1298_v26 = vmul.f32 %v1170_v41, %v658_v3  ;;  %v8282_v28 = vld [vmem:[#allocation49_spill] sm:$0xff] }
 0x164   : > { %v1161_v55 = vmul.f32 %v5665_v30, %v649_v54  ;;  %v5711_v12 = vpop.permute.xlu1 %753  ;;  %v2198_v22 = vmul.f32 1.442695, %v2011_v2  ;;  %v2192_v52 = vmul.f32 1.442695, %v2008_v46  ;;  %v1616_v34 = vmul.f32 %v8265_v25, %v8278_v36 }
 0x165   : > { %8280 = vst [vmem:[#allocation98_spill] sm:$0xff] %v5707_v11  ;;  %8281 = vst [vmem:[#allocation100_spill] sm:$0xff] %v5711_v12  ;;  %v651_v40 = vsub.f32 %v5555_v29, %v8218_v0  ;;  %3982 = vpow2.f32 %v2194_v45  ;;  %v978_v53 = vmul.f32 %v850_v33, %v8279_v62  ;;  %v1618_v31 = vmul.f32 %v8265_v25, %v8279_v62  ;;  %v8283_v45 = vld [vmem:[#allocation50_spill] sm:$0xff]  ;;  %v8284_v62 = vld [vmem:[#allocation51_spill] sm:$0xff] }
 0x166   : > { %v841_v8 = vmul.f32 %v5645_v59, %v8282_v28  ;;  %v2196_v41 = vmul.f32 1.442695, %v2010_v47  ;;  %v2003_v4 = vsub.f32 0.0, %v5707_v11  ;;  %v648_v36 = vsub.f32 %v5555_v29, %v8224_v42 }
 0x167   : > { %v1163_v2 = vmul.f32 %v5665_v30, %v651_v40  ;;  %v1424_v46 = vadd.f32 %v1296_v23, %v976_v43  ;;  %v1426_v14 = vadd.f32 %v1298_v26, %v978_v53  ;;  %v1289_v16 = vmul.f32 %v1161_v55, %v649_v54 }
 0x168   : > { %v843_v33 = vmul.f32 %v5645_v59, %v8283_v45  ;;  %3984 = vpow2.f32 %v2198_v22  ;;  %v1744_v17 = vmul.f32 %v1616_v34, %v656_v9  ;;  %v840_v25 = vmul.f32 %v5645_v59, %v8284_v62 }
 0x169   : > { %v1160_v47 = vmul.f32 %v5665_v30, %v648_v36  ;;  %v5731_v60 = vpop.permute.xlu1 %1525  ;;  %3986 = vpow2.f32 %v2192_v52  ;;  %v1746_v11 = vmul.f32 %v1618_v31, %v658_v3  ;;  %v969_v15 = vmul.f32 %v841_v8, %v8282_v28 }
 0x16a   : > { %8285 = vst [vmem:[#allocation49_spill] sm:$0xff] %v5731_v60  ;;  %v650_v43 = vsub.f32 %v5555_v29, %v8228_v20  ;;  %v5736_v23 = vpop.eup %3974  ;;  %v1609_v26 = vmul.f32 %v5731_v60, %v8282_v28  ;;  %v1291_v9 = vmul.f32 %v1163_v2, %v651_v40  ;;  %v1611_v34 = vmul.f32 %v5731_v60, %v8283_v45 }
 0x16b   : > { %8286 = vst [vmem:[#allocation50_spill] sm:$0xff] %v5736_v23  ;;  %v1608_v55 = vmul.f32 %v5731_v60, %v8284_v62  ;;  %v5744_v22 = vadd.f32 %v1744_v17, %v1424_v46  ;;  %v5746_v3 = vadd.f32 %v1746_v11, %v1426_v14  ;;  %v1417_v52 = vadd.f32 %v1289_v16, %v969_v15  ;;  %v8291_v17 = vld [vmem:[#allocation53_spill] sm:$0xff] }
 0x16c   : > { %v971_v53 = vmul.f32 %v843_v33, %v8283_v45  ;;  %v1737_v31 = vmul.f32 %v1609_v26, %v649_v54  ;;  %v968_v8 = vmul.f32 %v840_v25, %v8284_v62  ;;  %v1288_v29 = vmul.f32 %v1160_v47, %v648_v36  ;;  %v5751_v2 = vpop.eup %3976  ;;  %v8296_v47 = vld [vmem:[#allocation101_spill] sm:$0xff] }
 0x16d   : > { %8287 = vst [vmem:[#allocation51_spill] sm:$0xff] %v5744_v22  ;;  %8288 = vst [vmem:[#allocation160_spill] sm:$0xff] %v5746_v3  ;;  %v1162_v28 = vmul.f32 %v5665_v30, %v650_v43  ;;  %v1739_v23 = vmul.f32 %v1611_v34, %v651_v40  ;;  %v842_v61 = vmul.f32 %v5645_v59, %v8290_v21  ;;  %v2182_v33 = vmul.f32 1.442695, %v2003_v4  ;;  %v8297_v34 = vld [vmem:[#allocation102_spill] sm:$0xff]  ;;  %v8299_v4 = vld [vmem:[#allocation29_spill] sm:$0xff] }
 0x16e   : > { %8289 = vst [vmem:[#allocation161_spill] sm:$0xff] %v5751_v2  ;;  %v5757_v46 = vsub.f32 %v8291_v17, %v8209_v18  ;;  %v5761_v14 = vsub.f32 %v8291_v17, %v8218_v0  ;;  %v5763_v16 = vpop.eup %3978  ;;  %v5765_v25 = vpop.permute.xlu1 %512  ;;  %v5767_v15 = vadd.f32 %v1737_v31, %v1417_v52  ;;  %v1419_v54 = vadd.f32 %v1291_v9, %v971_v53 }
 0x16f   : > { %8292 = vst [vmem:[#allocation52_spill] sm:$0xff] %v5763_v16  ;;  %8293 = vst [vmem:[#allocation162_spill] sm:$0xff] %v5765_v25  ;;  %v1736_v11 = vmul.f32 %v1608_v55, %v648_v36  ;;  %v1610_v40 = vmul.f32 %v5731_v60, %v8290_v21  ;;  %v5771_v45 = vpop.eup %3980  ;;  %v2000_v62 = vsub.f32 0.0, %v5744_v22  ;;  %v833_v26 = vmul.f32 %v5711_v12, %v8296_v47 }
 0x170   : > { %8294 = vst [vmem:[#allocation163_spill] sm:$0xff] %v5767_v15  ;;  %8295 = vst [vmem:[#allocation164_spill] sm:$0xff] %v5771_v45  ;;  %v835_v30 = vmul.f32 %v5711_v12, %v8297_v34  ;;  %v2002_v59 = vsub.f32 0.0, %v5746_v3  ;;  %v5779_v52 = vadd.f32 %v1739_v23, %v1419_v54  ;;  %v1416_v9 = vadd.f32 %v1288_v29, %v968_v8  ;;  %v5787_v45 = vpop.permute.xlu0 %2365 }
 0x171   : > { %v1290_v36 = vmul.f32 %v1162_v28, %v650_v43  ;;  %3988 = vpow2.f32 %v5705_v50  ;;  %v1993_v55 = vsub.f32 0.0, %v5767_v15  ;;  %v1153_v53 = vmul.f32 %v8299_v4, %v5757_v46  ;;  %8300 = vst [vmem:[#allocation102_spill] sm:$0xff] %v5787_v45 }
 0x172   : > { %8298 = vst [vmem:[#allocation101_spill] sm:$0xff] %v5779_v52  ;;  %v1155_v31 = vmul.f32 %v8299_v4, %v5761_v14  ;;  %v3983_v60 = vpop.eup %3982  ;;  %3990 = vpow2.f32 %v2196_v41  ;;  %v5789_v16 = vadd.f32 %v1736_v11, %v1416_v9  ;;  %v970_v23 = vmul.f32 %v842_v61, %v8290_v21 }
 0x173   : > { %v1738_v29 = vmul.f32 %v1610_v40, %v650_v43  ;;  %v5792_v8 = vpop.permute.xlu1 %1069  ;;  %3992 = vpow2.f32 %v2182_v33  ;;  %v5794_v50 = vmul.f32 1.442695, %v2000_v62  ;;  %v961_v28 = vmul.f32 %v833_v26, %v8296_v47 }
 0x174   : > { %8301 = vst [vmem:[#allocation165_spill] sm:$0xff] %v5789_v16  ;;  %8302 = vst [vmem:[#allocation166_spill] sm:$0xff] %v5792_v8  ;;  %v963_v54 = vmul.f32 %v835_v30, %v8297_v34  ;;  %v5798_v3 = vmul.f32 1.442695, %v2002_v59  ;;  %v1995_v22 = vsub.f32 0.0, %v5779_v52  ;;  %v1418_v2 = vadd.f32 %v1290_v36, %v970_v23  ;;  %v8304_v23 = vld [vmem:[#allocation46_spill] sm:$0xff] }
 0x175   : > { %v640_v41 = vsub.f32 %v8291_v17, %v8224_v42  ;;  %v3985_v11 = vpop.eup %3984  ;;  %v5804_v21 = vmul.f32 %v3983_v60, %v5787_v45  ;;  %v2162_v61 = vmul.f32 1.442695, %v1993_v55  ;;  %v1281_v43 = vmul.f32 %v1153_v53, %v5757_v46  ;;  %v8303_v60 = vld [vmem:[#allocation103_spill] sm:$0xff] }
 0x176   : > { %v1283_v40 = vmul.f32 %v1155_v31, %v5761_v14  ;;  %v3987_v33 = vpop.eup %3986  ;;  %v1992_v30 = vsub.f32 0.0, %v5789_v16  ;;  %v5809_v59 = vadd.f32 %v1738_v29, %v1418_v2  ;;  %v642_v62 = vsub.f32 %v8291_v17, %v8228_v20  ;;  %v8305_v53 = vld [vmem:[#allocation99_spill] sm:$0xff] }
 0x177   : > { %v633_v26 = vsub.f32 %v5689_v51, %v8209_v18  ;;  %v1409_v9 = vadd.f32 %v1281_v43, %v961_v28  ;;  %v832_v55 = vmul.f32 %v5711_v12, %v8303_v60  ;;  %v825_v52 = vmul.f32 %v8305_v53, %v8304_v23  ;;  %v8307_v29 = vld [vmem:[#allocation107_spill] sm:$0xff] }
 0x178   : > { %v1411_v36 = vadd.f32 %v1283_v40, %v963_v54  ;;  %v5819_v31 = vpop.permute.xlu1 %1521  ;;  %v2166_v15 = vmul.f32 1.442695, %v1995_v22  ;;  %v1152_v2 = vmul.f32 %v8299_v4, %v640_v41  ;;  %v834_v16 = vmul.f32 %v5711_v12, %v8307_v29 }
 0x179   : > { %8306 = vst [vmem:[#allocation103_spill] sm:$0xff] %v5819_v31  ;;  %v1145_v17 = vmul.f32 %v5792_v8, %v633_v26  ;;  %3994 = vpow2.f32 %v2162_v61  ;;  %v1601_v28 = vmul.f32 %v5819_v31, %v8296_v47  ;;  %v1603_v54 = vmul.f32 %v5819_v31, %v8297_v34 }
 0x17a   : > { %v1600_v43 = vmul.f32 %v5819_v31, %v8303_v60  ;;  %v1154_v40 = vmul.f32 %v8299_v4, %v642_v62  ;;  %v1602_v22 = vmul.f32 %v5819_v31, %v8307_v29  ;;  %v635_v12 = vsub.f32 %v5689_v51, %v8218_v0 }
 0x17b   : > { %v1273_v63 = vmul.f32 %v1145_v17, %v633_v26  ;;  %v1729_v61 = vmul.f32 %v1601_v28, %v5757_v46  ;;  %v1731_v56 = vmul.f32 %v1603_v54, %v5761_v14  ;;  %v960_v47 = vmul.f32 %v832_v55, %v8303_v60  ;;  %v8310_v46 = vld [vmem:[#allocation81_spill] sm:$0xff] }
 0x17c   : > { %v953_v34 = vmul.f32 %v825_v52, %v8304_v23  ;;  %3996 = vpow2.f32 %v2166_v15  ;;  %v962_v35 = vmul.f32 %v834_v16, %v8307_v29  ;;  %v827_v4 = vmul.f32 %v8305_v53, %v8308_v5 }
 0x17d   : > { %v1147_v31 = vmul.f32 %v5792_v8, %v635_v12  ;;  %v5844_v17 = vpop.permute.xlu1 %745  ;;  %v1280_v13 = vmul.f32 %v1152_v2, %v640_v41  ;;  %v1728_v6 = vmul.f32 %v1600_v43, %v640_v41  ;;  %v1593_v14 = vmul.f32 %v8310_v46, %v8304_v23  ;;  %v8315_v23 = vld [vmem:[#allocation108_spill] sm:$0xff] }
 0x17e   : > { %8309 = vst [vmem:[#allocation46_spill] sm:$0xff] %v5844_v17  ;;  %v1401_v48 = vadd.f32 %v1273_v63, %v953_v34  ;;  %v5848_v28 = vpop.eup %3988  ;;  %v1994_v15 = vsub.f32 0.0, %v5809_v59  ;;  %v1282_v16 = vmul.f32 %v1154_v40, %v642_v62  ;;  %v1730_v52 = vmul.f32 %v1602_v22, %v642_v62  ;;  %v8316_v22 = vld [vmem:[#allocation109_spill] sm:$0xff] }
 0x17f   : > { %8311 = vst [vmem:[#allocation107_spill] sm:$0xff] %v5848_v28  ;;  %v1275_v60 = vmul.f32 %v1147_v31, %v635_v12  ;;  %v3991_v55 = vpop.eup %3990  ;;  %v5853_v29 = vadd.f32 %v1729_v61, %v1409_v9  ;;  %v5855_v2 = vadd.f32 %v1731_v56, %v1411_v36  ;;  %v1408_v63 = vadd.f32 %v1280_v13, %v960_v47  ;;  %v8321_v47 = vld [vmem:[#allocation8_spill] sm:$0xff] }
 0x180   : > { %v1721_v41 = vmul.f32 %v1593_v14, %v633_v26  ;;  %v5857_v54 = vpop.eup %3992  ;;  %vm2641_vm2 = vcmp.ge.f32.partialorder %v8315_v23, 0.0  ;;  %v5861_v43 = vmul.f32 %v3985_v11, %v5787_v45  ;;  %v5864_v40 = vmul.f32 %v3987_v33, %v5787_v45  ;;  %v8319_v11 = vld [vmem:[#allocation67_spill] sm:$0xff] }
 0x181   : > { %8312 = vst [vmem:[#allocation47_spill] sm:$0xff] %v5853_v29  ;;  %8313 = vst [vmem:[#allocation167_spill] sm:$0xff] %v5855_v2  ;;  %v1410_v62 = vadd.f32 %v1282_v16, %v962_v35  ;;  %v955_v31 = vmul.f32 %v827_v4, %v8308_v5  ;;  %vm2643_vm3 = vcmp.ge.f32.partialorder %v8316_v22, 0.0  ;;  %v2160_v9 = vmul.f32 1.442695, %v1992_v30  ;;  %v8322_v30 = vld [vmem:[#allocation69_spill] sm:$0xff] }
 0x182   : > { %8314 = vst [vmem:[#allocation168_spill] sm:$0xff] %v5857_v54  ;;  %v5868_v56 = vadd.f32 %v1728_v6, %v1408_v63  ;;  %v5870_v13 = vadd.f32 %v1721_v41, %v1401_v48  ;;  %v1595_v26 = vmul.f32 %v8310_v46, %v8308_v5  ;;  %vm2649_vm4 = vcmp.ge.f32.partialorder %v8319_v11, 0.0  ;;  %v8323_v16 = vld [vmem:[#allocation59_spill] sm:$0xff]  ;;  %v8325_v63 = vld [vmem:[#allocation112_spill] sm:$0xff]  ;;  %vm5927_vm12 = vmand %vm2641_vm2, %vm2769_vm0 }
 0x183   : > { %v5874_v36 = vpop.permute.xlu1 %1065  ;;  %v5878_v33 = vmul.f32 %v3991_v55, %v5787_v45  ;;  %v2164_v35 = vmul.f32 1.442695, %v1994_v15  ;;  %v5880_v61 = vadd.f32 %v1730_v52, %v1410_v62  ;;  %v1403_v4 = vadd.f32 %v1275_v60, %v955_v31  ;;  %v5898_v55 = vpop.permute.xlu0 %2357  ;;  %v8328_v15 = vld [vmem:[#allocation48_spill] sm:$0xff]  ;;  %v8329_v41 = vld [vmem:[#allocation127_spill] sm:$0xff]  ;;  %vm5941_vm15 = vmand %vm2643_vm3, %vm2771_vm1 }
 0x184   : > { %8317 = vst [vmem:[#allocation108_spill] sm:$0xff] %v5868_v56  ;;  %8318 = vst [vmem:[#allocation109_spill] sm:$0xff] %v5874_v36  ;;  %vm2651_vm5 = vcmp.ge.f32.partialorder %v8321_v47, 0.0  ;;  %3998 = vpow2.f32 %v5794_v50  ;;  %v1985_v48 = vsub.f32 0.0, %v5853_v29  ;;  %v1987_v6 = vsub.f32 0.0, %v5855_v2  ;;  %v8336_v47 = vld [vmem:[#allocation64_spill] sm:$0xff] }
 0x185   : > { %8320 = vst [vmem:[#allocation67_spill] sm:$0xff] %v5880_v61  ;;  %v1723_v5 = vmul.f32 %v1595_v26, %v635_v12  ;;  %vm2648_vm6 = vcmp.ge.f32.partialorder %v8322_v30, 0.0  ;;  %4000 = vpow2.f32 %v5798_v3  ;;  %vm2650_vm8 = vcmp.ge.f32.partialorder %v8323_v16, 0.0  ;;  %8324 = vst [vmem:[#allocation8_spill] sm:$0xff] %v5898_v55 }
 0x186   : > { %vm2770_vm9 = vcmp.ge.f32.partialorder %v5412_v39, 0.003921569  ;;  %4002 = vpow2.f32 %v2160_v9  ;;  %v1984_v50 = vsub.f32 0.0, %v5868_v56  ;;  %v1977_v12 = vsub.f32 0.0, %v5870_v13  ;;  %v3995_v60 = vpop.eup %3994  ;;  %v8327_v9 = vld [vmem:[#allocation113_spill] sm:$0xff] }
 0x187   : > { %v5896_v52 = vadd.f32 %v1723_v5, %v1403_v4  ;;  %vm2640_vm10 = vcmp.ge.f32.partialorder %v8325_v63, 0.0  ;;  %4004 = vpow2.f32 %v2164_v35  ;;  %v1986_v62 = vsub.f32 0.0, %v5880_v61 }
 0x188   : > { %v5907_v26 = vmul.f32 1.442695, %v1985_v48  ;;  %v5909_v4 = vmul.f32 1.442695, %v1987_v6  ;;  %v632_v5 = vsub.f32 %v5689_v51, %v8224_v42  ;;  %v824_v14 = vmul.f32 %v8305_v53, %v8328_v15  ;;  %v8330_v48 = vld [vmem:[#allocation129_spill] sm:$0xff] }
 0x189   : > { %v5904_v31 = vpop.permute.xlu1 %2397  ;;  %v3997_v6 = vpop.eup %3996  ;;  %v5934_v56 = vmul.f32 1.442695, %v1984_v50  ;;  %v1592_v28 = vmul.f32 %v8310_v46, %v8328_v15  ;;  %v625_v30 = vsub.f32 %v5765_v25, %v8209_v18  ;;  %v8340_v61 = vmin.f32 %v5398_v27, 0.999 }
 0x18a   : > { %8326 = vst [vmem:[#allocation69_spill] sm:$0xff] %v5904_v31  ;;  %v2521_v3 = vmul.f32 %v5394_v32, %v5904_v31  ;;  %v2523_v35 = vmul.f32 %v5406_v24, %v5904_v31  ;;  %v2520_v34 = vmul.f32 %v8329_v41, %v5904_v31  ;;  %v2522_v45 = vmul.f32 %v8330_v48, %v5904_v31 }
 0x18b   : > { %v5932_v32 = vmul.f32 %v3995_v60, %v5898_v55  ;;  %v2130_v24 = vmul.f32 1.442695, %v1977_v12  ;;  %v1979_v41 = vsub.f32 0.0, %v5896_v52  ;;  %v1144_v48 = vmul.f32 %v5792_v8, %v632_v5 }
 0x18c   : > { %vm2777_vm13 = vcmp.ge.f32.partialorder %v2521_v3, 0.003921569  ;;  %v3033_v54 = vmin.f32 %v2521_v3, 0.999  ;;  %vm2779_vm14 = vcmp.ge.f32.partialorder %v2523_v35, 0.003921569  ;;  %v952_v60 = vmul.f32 %v824_v14, %v8328_v15 }
 0x18d   : > { %vm2905_vm0 = vmand %vm2649_vm4, %vm2777_vm13  ;;  %v3035_v50 = vmin.f32 %v2523_v35, 0.999  ;;  %vm2776_vm2 = vcmp.ge.f32.partialorder %v2520_v34, 0.003921569  ;;  %v3032_v12 = vmin.f32 %v2520_v34, 0.999  ;;  %v1272_v31 = vmul.f32 %v1144_v48, %v632_v5 }
 0x18e   : > { %v5949_v3 = vpop.permute.xlu1 %504  ;;  %3647 = vmatprep.subr.msk.mxu0 %vm2905_vm0, %v3033_v54  ;;  %vm2907_vm11 = vmand %vm2651_vm5, %vm2779_vm14  ;;  %vm2778_vm1 = vcmp.ge.f32.partialorder %v2522_v45, 0.003921569  ;;  %v3034_v22 = vmin.f32 %v2522_v45, 0.999  ;;  %v5958_v11 = vmul.f32 %v3997_v6, %v5898_v55  ;;  %v5960_v34 = vmul.f32 1.442695, %v1986_v62 }
 0x18f   : > { %8335 = vst [vmem:[#allocation59_spill] sm:$0xff] %v5949_v3  ;;  %3679 = vmatprep.subr.msk.mxu1 %vm2907_vm11, %v3035_v50  ;;  %vm2904_vm3 = vmand %vm2648_vm6, %vm2776_vm2  ;;  %v634_v54 = vsub.f32 %v5689_v51, %v8228_v20  ;;  %v826_v14 = vmul.f32 %v8305_v53, %v8336_v47  ;;  %v2134_v45 = vmul.f32 1.442695, %v1979_v41  ;;  %v1400_v15 = vadd.f32 %v1272_v31, %v952_v60  ;;  %v8342_v6 = vld [vmem:[#allocation65_spill] sm:$0xff] }
 0x190   : > { %3648 = vmatpush1.msk.msra.mxu0 %vm2904_vm3, %v3032_v12  ;;  %vm2906_vm4 = vmand %vm2650_vm8, %vm2778_vm1  ;;  %v1720_v35 = vmul.f32 %v1592_v28, %v632_v5  ;;  %v8337_v62 = vmin.f32 %v5384_v19, 0.999  ;;  %v1594_v31 = vmul.f32 %v8310_v46, %v8336_v47  ;;  %v627_v28 = vsub.f32 %v5765_v25, %v8218_v0  ;;  %v8349_v53 = vld [vmem:[#allocation73_spill] sm:$0xff] }
 0x191   : > { %3680 = vmatpush1.msk.msra.mxu1 %vm2906_vm4, %v3034_v22  ;;  %vm2896_vm5 = vmand %vm2640_vm10, %vm2768_vm7  ;;  %v1146_v16 = vmul.f32 %v5792_v8, %v634_v54  ;;  %v5983_v5 = vpop.eup %3998  ;;  %v8339_v19 = vmin.f32 %v5388_v44, 0.999  ;;  %vm8341_vm6 = vcmp.ge.f32.partialorder %v8327_v9, 0.0  ;;  %4006 = vpow2.f32 %v2130_v24 }
 0x192   : > { %3649 = vmatprep.subr.msk.mxu0 %vm5927_vm12, %v8337_v62  ;;  %8338 = vst [vmem:[#allocation112_spill] sm:$0xff] %v5983_v5  ;;  %vm2898_vm7 = vmand %vm8341_vm6, %vm2770_vm9  ;;  %v5995_v63 = vadd.f32 %v1720_v35, %v1400_v15  ;;  %v817_v41 = vmul.f32 %v5844_v17, %v8342_v6  ;;  %v1137_v48 = vmul.f32 %v5874_v36, %v625_v30  ;;  %v6000_v44 = vpop.eup %4000  ;;  %v8344_v23 = vmin.f32 %v5412_v39, 0.999  ;;  %v8346_v35 = vld [vmem:[#allocation66_spill] sm:$0xff] }
 0x193   : > { %3681 = vmatprep.subr.msk.mxu1 %vm5941_vm15, %v8339_v19  ;;  %3650 = vmatpush1.msk.msra.mxu0 %vm2896_vm5, %v8340_v61  ;;  %8343 = vst [vmem:[#allocation113_spill] sm:$0xff] %v6000_v44  ;;  %v6004_v27 = vpop.permute.xlu1 %1061  ;;  %v954_v50 = vmul.f32 %v826_v14, %v8336_v47  ;;  %v1274_v12 = vmul.f32 %v1146_v16, %v634_v54  ;;  %v4003_v60 = vpop.eup %4002  ;;  %4008 = vpow2.f32 %v2134_v45  ;;  %v7973_v39 = vmov 0.0   ;;  %v8347_v19 = vld [vmem:[#allocation72_spill] sm:$0xff] }
 0x194   : > { %3682 = vmatpush1.msk.msra.mxu1 %vm2898_vm7, %v8344_v23  ;;  %8345 = vst [vmem:[#allocation48_spill] sm:$0xff] %v6004_v27  ;;  %v1139_v9 = vmul.f32 %v5874_v36, %v627_v28  ;;  %v624_v24 = vsub.f32 %v5765_v25, %v8224_v42  ;;  %v1976_v22 = vsub.f32 0.0, %v5995_v63  ;;  %v1265_v15 = vmul.f32 %v1137_v48, %v625_v30  ;;  %v4005_v47 = vpop.eup %4004 }
 0x195   : > { %v819_v62 = vmul.f32 %v5844_v17, %v8346_v35  ;;  %3241 = vmatprep.mubr.f32.mxu0 %v7973_v39  ;;  %3312 = vmatprep.mubr.f32.mxu1 %v7973_v39  ;;  %v1402_v14 = vadd.f32 %v1274_v12, %v954_v50  ;;  %v1722_v16 = vmul.f32 %v1594_v31, %v634_v54  ;;  %4010 = vpow2.f32 %v5907_v26 }
 0x196   : > { %v816_v61 = vmul.f32 %v5844_v17, %v8347_v19  ;;  %v1136_v23 = vmul.f32 %v5874_v36, %v624_v24  ;;  %v2128_v45 = vmul.f32 1.442695, %v1976_v22  ;;  %v945_v46 = vmul.f32 %v817_v41, %v8342_v6 }
 0x197   : > { %v1267_v48 = vmul.f32 %v1139_v9, %v627_v28  ;;  %v626_v8 = vsub.f32 %v5765_v25, %v8228_v20  ;;  %v6023_v39 = vadd.f32 %v1722_v16, %v1402_v14  ;;  %4012 = vpow2.f32 %v5909_v4 }
 0x198   : > { %v1264_v50 = vmul.f32 %v1136_v23, %v624_v24  ;;  %v6025_v54 = vpop.permute.xlu1 %1513  ;;  %v1393_v31 = vadd.f32 %v1265_v15, %v945_v46  ;;  %v947_v12 = vmul.f32 %v819_v62, %v8346_v35  ;;  %4014 = vpow2.f32 %v2128_v45  ;;  %v8350_v45 = vld [vmem:[#allocation14_spill] sm:$0xff] }
 0x199   : > { %8348 = vst [vmem:[#allocation127_spill] sm:$0xff] %v6025_v54  ;;  %v1138_v41 = vmul.f32 %v5874_v36, %v626_v8  ;;  %v1978_v9 = vsub.f32 0.0, %v6023_v39  ;;  %v944_v22 = vmul.f32 %v816_v61, %v8347_v19  ;;  %v818_v26 = vmul.f32 %v5844_v17, %v8349_v53 }
 0x19a   : > { %v1585_v14 = vmul.f32 %v6025_v54, %v8342_v6  ;;  %v1395_v16 = vadd.f32 %v1267_v48, %v947_v12  ;;  %v1587_v4 = vmul.f32 %v6025_v54, %v8346_v35  ;;  %v1584_v46 = vmul.f32 %v6025_v54, %v8347_v19 }
 0x19b   : > { %v2132_v15 = vmul.f32 1.442695, %v1978_v9  ;;  %v1392_v62 = vadd.f32 %v1264_v50, %v944_v22  ;;  %v1266_v23 = vmul.f32 %v1138_v41, %v626_v8  ;;  %v384_v36 = vsub.f32 %v8350_v45, %v4612_v57  ;;  %v8356_v9 = vld [vmem:[#allocation70_spill] sm:$0xff] }
 0x19c   : > { %v1713_v61 = vmul.f32 %v1585_v14, %v625_v30  ;;  %v1715_v25 = vmul.f32 %v1587_v4, %v627_v28  ;;  %v1712_v51 = vmul.f32 %v1584_v46, %v624_v24  ;;  %v1586_v17 = vmul.f32 %v6025_v54, %v8349_v53  ;;  %v8364_v54 = vld [vmem:[#allocation115_spill] sm:$0xff] }
 0x19d   : > { %v6044_v6 = vpop.permute.xlu1 %737  ;;  %v6048_v35 = vmul.f32 %v4003_v60, %v5898_v55  ;;  %4016 = vpow2.f32 %v5934_v56  ;;  %v946_v19 = vmul.f32 %v818_v26, %v8349_v53  ;;  %vm2753_vm8 = vcmp.ge.f32.partialorder %v5463_v7, 0.003921569  ;;  %v8355_v56 = vld [vmem:[#allocation63_spill] sm:$0xff]  ;;  %v6071_v26 = vpop.permute.xlu0 %2349 }
 0x19e   : > { %8351 = vst [vmem:[#allocation129_spill] sm:$0xff] %v6044_v6  ;;  %v6053_v50 = vadd.f32 %v1713_v61, %v1393_v31  ;;  %v6055_v30 = vadd.f32 %v1715_v25, %v1395_v16  ;;  %v6057_v28 = vadd.f32 %v1712_v51, %v1392_v62  ;;  %v1714_v24 = vmul.f32 %v1586_v17, %v626_v8  ;;  %v4007_v12 = vpop.eup %4006  ;;  %v8357_v51 = vld [vmem:[#allocation114_spill] sm:$0xff] }
 0x19f   : > { %vm2755_vm9 = vcmp.ge.f32.partialorder %v5471_v49, 0.003921569  ;;  %v6061_v41 = vmul.f32 %v4005_v47, %v5898_v55  ;;  %4018 = vpow2.f32 %v2132_v15  ;;  %v1394_v60 = vadd.f32 %v1266_v23, %v946_v19  ;;  %8358 = vst [vmem:[#allocation72_spill] sm:$0xff] %v6071_v26  ;;  %v8359_v47 = vld [vmem:[#allocation61_spill] sm:$0xff]  ;;  %v8363_v19 = vld [vmem:[#allocation122_spill] sm:$0xff] }
 0x1a0   : > { %8352 = vst [vmem:[#allocation64_spill] sm:$0xff] %v6053_v50  ;;  %8353 = vst [vmem:[#allocation65_spill] sm:$0xff] %v6055_v30  ;;  %v617_v53 = vsub.f32 %v8355_v56, %v8209_v18  ;;  %vm2625_vm10 = vcmp.ge.f32.partialorder %v8356_v9, 0.0  ;;  %v1969_v31 = vsub.f32 0.0, %v6053_v50  ;;  %v1971_v25 = vsub.f32 0.0, %v6055_v30  ;;  %v4009_v17 = vpop.eup %4008  ;;  %v8362_v15 = vld [vmem:[#allocation57_spill] sm:$0xff] }
 0x1a1   : > { %8354 = vst [vmem:[#allocation66_spill] sm:$0xff] %v6057_v28  ;;  %v809_v22 = vmul.f32 %v8357_v51, %v384_v36  ;;  %v386_v8 = vsub.f32 %v8350_v45, %v4615_v58  ;;  %vm2627_vm11 = vcmp.ge.f32.partialorder %v8359_v47, 0.0  ;;  %4020 = vpow2.f32 %v5960_v34  ;;  %v8372_v50 = vld [vmem:[#allocation55_spill] sm:$0xff]  ;;  %vm6127_vm4 = vmand %vm2625_vm10, %vm2753_vm8 }
 0x1a2   : > { %v1968_v16 = vsub.f32 0.0, %v6057_v28  ;;  %v6077_v4 = vadd.f32 %v1714_v24, %v1394_v60  ;;  %v6079_v46 = vpop.permute.xlu1 %1057  ;;  %vm2633_vm12 = vcmp.ge.f32.partialorder %v8362_v15, 0.0  ;;  %v2114_v62 = vmul.f32 1.442695, %v1969_v31  ;;  %v6090_v58 = vpop.eup %4010  ;;  %v8367_v28 = vld [vmem:[#allocation116_spill] sm:$0xff]  ;;  %vm6143_vm8 = vmand %vm2627_vm11, %vm2755_vm9 }
 0x1a3   : > { %8361 = vst [vmem:[#allocation70_spill] sm:$0xff] %v6079_v46  ;;  %v2118_v23 = vmul.f32 1.442695, %v1971_v25  ;;  %v1129_v61 = vmul.f32 %v6004_v27, %v617_v53  ;;  %v1577_v48 = vmul.f32 %v8363_v19, %v384_v36  ;;  %vm2635_vm13 = vcmp.ge.f32.partialorder %v8364_v54, 0.0  ;;  %8366 = vst [vmem:[#allocation61_spill] sm:$0xff] %v6090_v58  ;;  %v8391_v54 = vld [vmem:[#allocation124_spill] sm:$0xff] }
 0x1a4   : > { %8360 = vst [vmem:[#allocation73_spill] sm:$0xff] %v6077_v4  ;;  %v1970_v34 = vsub.f32 0.0, %v6077_v4  ;;  %v619_v24 = vsub.f32 %v8355_v56, %v8218_v0  ;;  %vm2632_vm14 = vcmp.ge.f32.partialorder %v8367_v28, 0.0  ;;  %v6095_v31 = vmul.f32 %v4007_v12, %v6071_v26  ;;  %v6098_v46 = vpop.eup %4012  ;;  %v8369_v4 = vld [vmem:[#allocation83_spill] sm:$0xff]  ;;  %v8370_v12 = vld [vmem:[#allocation9_spill] sm:$0xff] }
 0x1a5   : > { %v937_v25 = vmul.f32 %v809_v22, %v384_v36  ;;  %v1257_v30 = vmul.f32 %v1129_v61, %v617_v53  ;;  %v811_v14 = vmul.f32 %v8357_v51, %v386_v8  ;;  %8368 = vst [vmem:[#allocation57_spill] sm:$0xff] %v6098_v46  ;;  %vm2634_vm0 = vcmp.ge.f32.partialorder %v8369_v4, 0.0  ;;  %v4015_v58 = vpop.eup %4014  ;;  %v8395_v28 = vld [vmem:[#allocation125_spill] sm:$0xff] }
 0x1a6   : > { %v6103_v55 = vmul.f32 %v4009_v17, %v6071_v26  ;;  %4022 = vpow2.f32 %v2114_v62  ;;  %v2112_v60 = vmul.f32 1.442695, %v1968_v16  ;;  %v1131_v0 = vmul.f32 %v6004_v27, %v619_v24  ;;  %v8373_v62 = vld [vmem:[#allocation119_spill] sm:$0xff]  ;;  %v8401_v4 = vld [vmem:[#allocation97_spill] sm:$0xff] }
 0x1a7   : > { %4024 = vpow2.f32 %v2118_v23  ;;  %v1385_v36 = vadd.f32 %v1257_v30, %v937_v25  ;;  %v1705_v22 = vmul.f32 %v1577_v48, %v617_v53  ;;  %v1579_v61 = vmul.f32 %v8363_v19, %v386_v8  ;;  %v6108_v46 = vpop.permute.xlu1 %2389  ;;  %v8374_v23 = vld [vmem:[#allocation121_spill] sm:$0xff]  ;;  %v8376_v25 = vld [vmem:[#allocation90_spill] sm:$0xff] }
 0x1a8   : > { %8371 = vst [vmem:[#allocation115_spill] sm:$0xff] %v6108_v46  ;;  %v2116_v44 = vmul.f32 1.442695, %v1970_v34  ;;  %v939_v5 = vmul.f32 %v811_v14, %v386_v8  ;;  %v1259_v17 = vmul.f32 %v1131_v0, %v619_v24  ;;  %v6113_v16 = vsub.f32 %v8350_v45, %v8195_v1  ;;  %v8375_v48 = vld [vmem:[#allocation89_spill] sm:$0xff]  ;;  %v8379_v8 = vld [vmem:[#allocation110_spill] sm:$0xff] }
 0x1a9   : > { %v2505_v2 = vmul.f32 %v8373_v62, %v6108_v46  ;;  %v2507_v30 = vmul.f32 %v8374_v23, %v6108_v46  ;;  %v2504_v53 = vmul.f32 %v8375_v48, %v6108_v46  ;;  %v2506_v29 = vmul.f32 %v8376_v25, %v6108_v46  ;;  %v8384_v25 = vld [vmem:[#allocation152_spill] sm:$0xff] }
 0x1aa   : > { %v6133_v14 = vmul.f32 %v4015_v58, %v6071_v26  ;;  %4026 = vpow2.f32 %v2112_v60  ;;  %v6135_v34 = vadd.f32 %v1705_v22, %v1385_v36  ;;  %v1387_v62 = vadd.f32 %v1259_v17, %v939_v5  ;;  %v6137_v23 = vpop.eup %4016  ;;  %v8385_v58 = vld [vmem:[#allocation154_spill] sm:$0xff]  ;;  %v8386_v36 = vld [vmem:[#allocation131_spill] sm:$0xff]  ;;  %v8390_v46 = vld [vmem:[#allocation140_spill] sm:$0xff] }
 0x1ab   : > { %8381 = vst [vmem:[#allocation83_spill] sm:$0xff] %v6137_v23  ;;  %vm2761_vm6 = vcmp.ge.f32.partialorder %v2505_v2, 0.003921569  ;;  %v3017_v48 = vmin.f32 %v2505_v2, 0.999  ;;  %v1707_v60 = vmul.f32 %v1579_v61, %v619_v24  ;;  %vm2601_vm1 = vcmp.ge.f32.partialorder %v8386_v36, 0.0 }
 0x1ac   : > { %8380 = vst [vmem:[#allocation116_spill] sm:$0xff] %v6135_v34  ;;  %vm2763_vm7 = vcmp.ge.f32.partialorder %v2507_v30, 0.003921569  ;;  %vm2731_vm10 = vcmp.ge.f32.partialorder %v8384_v25, 0.003921569  ;;  %vm2889_vm3 = vmand %vm2633_vm12, %vm2761_vm6  ;;  %v808_v47 = vmul.f32 %v8357_v51, %v6113_v16  ;;  %v4019_v22 = vpop.eup %4018  ;;  %v6155_v17 = vpop.permute.xlu1 %1505  ;;  %v8388_v24 = vld [vmem:[#allocation92_spill] sm:$0xff]  ;;  %v616_v23 = vsub.f32 %v8355_v56, %v8224_v42 }
 0x1ad   : > { %v3019_v5 = vmin.f32 %v2507_v30, 0.999  ;;  %vm2760_vm2 = vcmp.ge.f32.partialorder %v2504_v53, 0.003921569  ;;  %v3016_v2 = vmin.f32 %v2504_v53, 0.999  ;;  %3651 = vmatprep.subr.msk.mxu0 %vm2889_vm3, %v3017_v48  ;;  %vm2891_vm9 = vmand %vm2635_vm13, %vm2763_vm7  ;;  %4028 = vpow2.f32 %v2116_v44 }
 0x1ae   : > { %8387 = vst [vmem:[#allocation9_spill] sm:$0xff] %v6155_v17  ;;  %vm2762_vm11 = vcmp.ge.f32.partialorder %v2506_v29, 0.003921569  ;;  %v3018_v15 = vmin.f32 %v2506_v29, 0.999  ;;  %vm2617_vm12 = vcmp.ge.f32.partialorder %v8388_v24, 0.0  ;;  %vm2888_vm3 = vmand %vm2632_vm14, %vm2760_vm2  ;;  %v6176_v6 = vpop.eup %4020  ;;  %v1576_v44 = vmul.f32 %v8363_v19, %v6113_v16 }
 0x1af   : > { %v8389_v61 = vld [vmem:[#allocation136_spill] sm:$0xff]  ;;  %vm2600_vm5 = vcmp.ge.f32.partialorder %v8390_v46, 0.0  ;;  %v1961_v1 = vsub.f32 0.0, %v6135_v34  ;;  %3683 = vmatprep.subr.msk.mxu1 %vm2891_vm9, %v3019_v5  ;;  %vm2619_vm13 = vcmp.ge.f32.partialorder %v8391_v54, 0.0  ;;  %v8392_v30 = vld [vmem:[#allocation142_spill] sm:$0xff]  ;;  %v6174_v34 = vadd.f32 %v1707_v60, %v1387_v62  ;;  %8394 = vst [vmem:[#allocation119_spill] sm:$0xff] %v6176_v6  ;;  %3652 = vmatpush1.msk.msra.mxu0 %vm2888_vm3, %v3016_v2  ;;  %vm2890_vm14 = vmand %vm2634_vm0, %vm2762_vm11 }
 0x1b0   : > { %vm2603_vm6 = vcmp.ge.f32.partialorder %v8389_v61, 0.0  ;;  %vm2602_vm7 = vcmp.ge.f32.partialorder %v8392_v30, 0.0  ;;  %v1128_v5 = vmul.f32 %v6004_v27, %v616_v23  ;;  %v8396_v62 = vld [vmem:[#allocation43_spill] sm:$0xff]  ;;  %3684 = vmatpush1.msk.msra.mxu1 %vm2890_vm14, %v3018_v15  ;;  %v8397_v29 = vmin.f32 %v5463_v7, 0.999  ;;  %v8444_v54 = vld [vmem:[#allocation150_spill] sm:$0xff] }
 0x1b1   : > { %8393 = vst [vmem:[#allocation55_spill] sm:$0xff] %v6174_v34  ;;  %v2098_v53 = vmul.f32 1.442695, %v1961_v1  ;;  %v385_v60 = vsub.f32 %v8350_v45, %v8396_v62  ;;  %vm8398_vm0 = vcmp.ge.f32.partialorder %v5492_v10, 0.003921569  ;;  %vm8399_vm11 = vcmp.ge.f32.partialorder %v8370_v12, 0.0 }
 0x1b2   : > { %3653 = vmatprep.subr.msk.mxu0 %vm6127_vm4, %v8397_v29  ;;  %vm2880_vm3 = vmand %vm8399_vm11, %vm8398_vm0  ;;  %v8400_v1 = vld [vmem:[#allocation128_spill] sm:$0xff]  ;;  %v6201_v2 = vmul.f32 %v4019_v22, %v6071_v26  ;;  %v1963_v15 = vsub.f32 0.0, %v6174_v34  ;;  %v936_v7 = vmul.f32 %v808_v47, %v6113_v16  ;;  %v6207_v0 = vsub.f32 %v8355_v56, %v8228_v20  ;;  %v8406_v22 = vld [vmem:[#allocation134_spill] sm:$0xff] }
 0x1b3   : > { %v8402_v12 = vmin.f32 %v5471_v49, 0.999  ;;  %v8403_v29 = vmin.f32 %v5492_v10, 0.999  ;;  %vm8404_vm4 = vcmp.ge.f32.partialorder %v5509_v38, 0.003921569  ;;  %v1256_v49 = vmul.f32 %v1128_v5, %v616_v23  ;;  %v6237_v45 = vpop.eup %4022 }
 0x1b4   : > { %vm8405_vm14 = vcmp.ge.f32.partialorder %v8372_v50, 0.0  ;;  %v8407_v16 = vld [vmem:[#allocation156_spill] sm:$0xff]  ;;  %v8408_v47 = vld [vmem:[#allocation157_spill] sm:$0xff]  ;;  %v810_v9 = vmul.f32 %v8357_v51, %v385_v60  ;;  %v6230_v50 = vpop.permute.xlu1 %2381  ;;  %v8412_v48 = vld [vmem:[#allocation135_spill] sm:$0xff]  ;;  %4030 = vpow2.f32 %v2098_v53  ;;  %v2102_v17 = vmul.f32 1.442695, %v1963_v15 }
 0x1b5   : > { %3685 = vmatprep.subr.msk.mxu1 %vm6143_vm8, %v8402_v12  ;;  %3654 = vmatpush1.msk.msra.mxu0 %vm2880_vm3, %v8403_v29  ;;  %vm2882_vm0 = vmand %vm8405_vm14, %vm8404_vm4  ;;  %v8409_v12 = vld [vmem:[#allocation12_spill] sm:$0xff]  ;;  %v8410_v29 = vmin.f32 %v5509_v38, 0.999  ;;  %8411 = vst [vmem:[#allocation121_spill] sm:$0xff] %v6230_v50  ;;  %v8413_v56 = vld [vmem:[#allocation158_spill] sm:$0xff]  ;;  %v1704_v5 = vmul.f32 %v1576_v44, %v616_v23  ;;  %v1130_v51 = vmul.f32 %v6004_v27, %v6207_v0  ;;  %v6250_v23 = vpop.eup %4024  ;;  %vm8442_vm9 = vcmp.ge.f32.partialorder %v8395_v28, 0.0 }
 0x1b6   : > { %v6226_v10 = vsub.f32 %v8409_v12, %v4612_v57  ;;  %8414 = vst [vmem:[#allocation89_spill] sm:$0xff] %v6237_v45  ;;  %v8415_v57 = vld [vmem:[#allocation85_spill] sm:$0xff]  ;;  %v8418_v42 = vld [vmem:[#allocation143_spill] sm:$0xff]  ;;  %8420 = vst [vmem:[#allocation90_spill] sm:$0xff] %v6250_v23  ;;  %4032 = vpow2.f32 %v2102_v17 }
 0x1b7   : > { %3686 = vmatpush1.msk.msra.mxu1 %vm2882_vm0, %v8410_v29  ;;  %v2489_v38 = vmul.f32 %v8415_v57, %v6230_v50  ;;  %v8416_v29 = vld [vmem:[#allocation87_spill] sm:$0xff]  ;;  %v8417_v20 = vld [vmem:[#allocation105_spill] sm:$0xff]  ;;  %v2490_v12 = vmul.f32 %v8418_v42, %v6230_v50  ;;  %v8421_v44 = vld [vmem:[#allocation138_spill] sm:$0xff]  ;;  %v1384_v57 = vadd.f32 %v1256_v49, %v936_v7  ;;  %vm8423_vm0 = vcmp.ge.f32.partialorder %v8379_v8, 0.003921569  ;;  %v6293_v61 = vpop.eup %4026 }
 0x1b8   : > { %v2491_v26 = vmul.f32 %v8416_v29, %v6230_v50  ;;  %v2488_v62 = vmul.f32 %v8417_v20, %v6230_v50  ;;  %v8419_v53 = vld [vmem:[#allocation137_spill] sm:$0xff]  ;;  %v8422_v15 = vld [vmem:[#allocation163_spill] sm:$0xff]  ;;  %v938_v20 = vmul.f32 %v810_v9, %v385_v60  ;;  %v1578_v29 = vmul.f32 %v8363_v19, %v385_v60  ;;  %vm6260_vm4 = vmand %vm2601_vm1, %vm8423_vm0  ;;  %v6268_v60 = vpop.permute.xlu1 %2377 }
 0x1b9   : > { %vm2745_vm2 = vcmp.ge.f32.partialorder %v2489_v38, 0.003921569  ;;  %v3001_v42 = vmin.f32 %v2489_v38, 0.999  ;;  %v8426_v50 = vld [vmem:[#allocation146_spill] sm:$0xff]  ;;  %v8427_v23 = vld [vmem:[#allocation101_spill] sm:$0xff]  ;;  %v1258_v7 = vmul.f32 %v1130_v51, %v6207_v0  ;;  %vm6276_vm1 = vmand %vm2603_vm6, %vm2731_vm10  ;;  %v6291_v38 = vadd.f32 %v1704_v5, %v1384_v57 }
 0x1ba   : > { %vm2747_vm14 = vcmp.ge.f32.partialorder %v2491_v26, 0.003921569  ;;  %v8428_v17 = vld [vmem:[#allocation165_spill] sm:$0xff]  ;;  %8429 = vst [vmem:[#allocation110_spill] sm:$0xff] %v6268_v60  ;;  %vm2873_vm11 = vmand %vm2617_vm12, %vm2745_vm2  ;;  %v3003_v49 = vmin.f32 %v2491_v26, 0.999  ;;  %v2482_v30 = vmul.f32 %v8444_v54, %v6268_v60 }
 0x1bb   : > { %vm2744_vm15 = vcmp.ge.f32.partialorder %v2488_v62, 0.003921569  ;;  %v3000_v36 = vmin.f32 %v2488_v62, 0.999  ;;  %vm8432_vm0 = vcmp.ge.f32.partialorder %v8385_v58, 0.003921569  ;;  %3655 = vmatprep.subr.msk.mxu0 %vm2873_vm11, %v3001_v42  ;;  %vm2875_vm10 = vmand %vm2619_vm13, %vm2747_vm14  ;;  %v6326_v62 = vsub.f32 %v5949_v3, %v8209_v18 }
 0x1bc   : > { %vm6284_vm3 = vmand %vm2600_vm5, %vm8432_vm0  ;;  %v8435_v24 = vld [vmem:[#allocation147_spill] sm:$0xff]  ;;  %vm2746_vm6 = vcmp.ge.f32.partialorder %v2490_v12, 0.003921569  ;;  %v3002_v46 = vmin.f32 %v2490_v12, 0.999  ;;  %v8436_v19 = vld [vmem:[#allocation144_spill] sm:$0xff]  ;;  %3687 = vmatprep.subr.msk.mxu1 %vm2875_vm10, %v3003_v49  ;;  %v1386_v18 = vadd.f32 %v1258_v7, %v938_v20  ;;  %v1706_v7 = vmul.f32 %v1578_v29, %v6207_v0 }
 0x1bd   : > { %v2481_v45 = vmul.f32 %v8436_v19, %v6268_v60  ;;  %v8437_v34 = vld [vmem:[#allocation96_spill] sm:$0xff]  ;;  %vm8438_vm5 = vcmp.ge.f32.partialorder %v5692_v37, 0.003921569  ;;  %vm2872_vm2 = vmand %vm8442_vm9, %vm2744_vm15  ;;  %v8443_v19 = vld [vmem:[#allocation111_spill] sm:$0xff]  ;;  %v1960_v42 = vsub.f32 0.0, %v6291_v38  ;;  %vm8446_vm15 = vcmp.ge.f32.partialorder %v8400_v1, 0.0  ;;  %v6342_v1 = vpop.permute.xlu1 %2369 }
 0x1be   : > { %v2483_v6 = vmul.f32 %v8437_v34, %v6268_v60  ;;  %vm6306_vm0 = vmand %vm2602_vm7, %vm8438_vm5  ;;  %v8441_v26 = vld [vmem:[#allocation148_spill] sm:$0xff]  ;;  %v2480_v34 = vmul.f32 %v8443_v19, %v6268_v60  ;;  %v8445_v57 = vld [vmem:[#allocation149_spill] sm:$0xff]  ;;  %3656 = vmatpush1.msk.msra.mxu0 %vm2872_vm2, %v3000_v36  ;;  %vm8447_vm13 = vcmp.ge.f32.partialorder %v5804_v21, 0.003921569  ;;  %vm8448_vm5 = vcmp.ge.f32.partialorder %v8401_v4, 0.0  ;;  %v6365_v36 = vpop.eup %4028 }
 0x1bf   : > { %vm2874_vm9 = vmand %vm8446_vm15, %vm2746_vm6  ;;  %vm2737_vm10 = vcmp.ge.f32.partialorder %v2481_v45, 0.003921569  ;;  %v2993_v28 = vmin.f32 %v2481_v45, 0.999  ;;  %v8451_v19 = vld [vmem:[#allocation155_spill] sm:$0xff]  ;;  %vm8452_vm6 = vcmp.ge.f32.partialorder %v8406_v22, 0.0 }
 0x1c0   : > { %vm6335_vm7 = vmand %vm8448_vm5, %vm8447_vm13  ;;  %3688 = vmatpush1.msk.msra.mxu1 %vm2874_vm9, %v3002_v46  ;;  %v2995_v45 = vmin.f32 %v2483_v6, 0.999  ;;  %v2992_v4 = vmin.f32 %v2480_v34, 0.999  ;;  %vm8453_vm13 = vcmp.ge.f32.partialorder %v5861_v43, 0.003921569 }
 0x1c1   : > { %vm2865_vm15 = vmand %vm8452_vm6, %vm2737_vm10  ;;  %vm8454_vm5 = vcmp.ge.f32.partialorder %v8407_v16, 0.0  ;;  %vm8457_vm2 = vcmp.ge.f32.partialorder %v5864_v40, 0.003921569  ;;  %vm8458_vm9 = vcmp.ge.f32.partialorder %v8408_v47, 0.0  ;;  %v8459_v20 = vmov 0  ;;  %v8461_v22 = vld [vmem:[#allocation98_spill] sm:$0xff] }
 0x1c2   : > { %vm6350_vm14 = vmand %vm8454_vm5, %vm8453_vm13  ;;  %3657 = vmatprep.subr.msk.mxu0 %vm2865_vm15, %v2993_v28  ;;  %vm8462_vm13 = vcmp.ge.f32.partialorder %v2483_v6, 0.003921569  ;;  %vm8463_vm5 = vcmp.ge.f32.partialorder %v8412_v48, 0.0  ;;  %vm2738_vm8 = vcmp.ge.f32.partialorder %v2482_v30, 0.003921569  ;;  %v8464_v47 = vld [vmem:[#allocation50_spill] sm:$0xff] }
 0x1c3   : > { %vm6358_vm12 = vmand %vm8458_vm9, %vm8457_vm2  ;;  %v2994_v16 = vmin.f32 %v2482_v30, 0.999  ;;  %v2465_v46 = vmul.f32 %v8464_v47, %v6342_v1  ;;  %v8465_v54 = vld [vmem:[#allocation161_spill] sm:$0xff]  ;;  %vm8466_vm2 = vcmp.ge.f32.partialorder %v5878_v33, 0.003921569  ;;  %vm8467_vm9 = vcmp.ge.f32.partialorder %v8413_v56, 0.0 }
 0x1c4   : > { %v8460_v20 = vsel %vm6358_vm12, 4294967295, %v8459_v20  ;;  %vm2867_vm11 = vmand %vm8463_vm5, %vm8462_vm13  ;;  %v2467_v60 = vmul.f32 %v8465_v54, %v6342_v1  ;;  %v8468_v0 = vmov 0  ;;  %v8470_v6 = vld [vmem:[#allocation51_spill] sm:$0xff]  ;;  %vm8471_vm13 = vcmp.ge.f32.partialorder %v2480_v34, 0.003921569  ;;  %v8473_v48 = vld [vmem:[#allocation52_spill] sm:$0xff] }
 0x1c5   : > { %vm6378_vm6 = vmand %vm8467_vm9, %vm8466_vm2  ;;  %3689 = vmatprep.subr.msk.mxu1 %vm2867_vm11, %v2995_v45  ;;  %vm8472_vm5 = vcmp.ge.f32.partialorder %v8419_v53, 0.0  ;;  %v2464_v29 = vmul.f32 %v8473_v48, %v6342_v1  ;;  %v8474_v30 = vld [vmem:[#allocation164_spill] sm:$0xff]  ;;  %v2096_v56 = vmul.f32 1.442695, %v1960_v42  ;;  %v8476_v54 = vld [vmem:[#allocation129_spill] sm:$0xff]  ;;  %vm8477_vm2 = vcmp.ge.f32.partialorder %v8421_v44, 0.0  ;;  %v6410_v44 = vpop.permute.xlu1 %2361 }
 0x1c6   : > { %v8469_v0 = vsel %vm6378_vm6, 4294967295, %v8468_v0  ;;  %vm2864_vm10 = vmand %vm8472_vm5, %vm8471_vm13  ;;  %v2466_v28 = vmul.f32 %v8474_v30, %v6342_v1  ;;  %v8475_v47 = vld [vmem:[#allocation160_spill] sm:$0xff]  ;;  %v801_v3 = vmul.f32 %v8476_v54, %v6226_v10  ;;  %vm2721_vm9 = vcmp.ge.f32.partialorder %v2465_v46, 0.003921569  ;;  %v8482_v45 = vld [vmem:[#allocation47_spill] sm:$0xff] }
 0x1c7   : > { %3658 = vmatpush1.msk.msra.mxu0 %vm2864_vm10, %v2992_v4  ;;  %vm2866_vm11 = vmand %vm8477_vm2, %vm2738_vm8  ;;  %v2977_v34 = vmin.f32 %v2465_v46, 0.999  ;;  %vm8478_vm13 = vcmp.ge.f32.partialorder %v5932_v32, 0.003921569  ;;  %vm8479_vm5 = vcmp.ge.f32.partialorder %v8422_v15, 0.0  ;;  %v6404_v42 = vadd.f32 %v1706_v7, %v1386_v18  ;;  %v4031_v18 = vpop.eup %4030  ;;  %v6435_v7 = vpop.permute.xlu0 %2341  ;;  %v8503_v9 = vld [vmem:[#allocation168_spill] sm:$0xff] }
 0x1c8   : > { %vm6399_vm6 = vmand %vm8479_vm5, %vm8478_vm13  ;;  %3690 = vmatpush1.msk.msra.mxu1 %vm2866_vm11, %v2994_v16  ;;  %v8483_v4 = vmin.f32 %v8379_v8, 0.999  ;;  %vm8484_vm8 = vcmp.ge.f32.partialorder %v8426_v50, 0.0  ;;  %v2979_v46 = vmin.f32 %v2467_v60, 0.999  ;;  %vm8488_vm11 = vcmp.ge.f32.partialorder %v8427_v23, 0.0 }
 0x1c9   : > { %vm6414_vm10 = vmand %vm8484_vm8, %vm2721_vm9  ;;  %vm2720_vm2 = vcmp.ge.f32.partialorder %v2464_v29, 0.003921569  ;;  %v2976_v48 = vmin.f32 %v2464_v29, 0.999  ;;  %vm8487_vm13 = vcmp.ge.f32.partialorder %v5958_v11, 0.003921569  ;;  %4034 = vpow2.f32 %v2096_v56 }
 0x1ca   : > { %3659 = vmatprep.subr.msk.mxu0 %vm6260_vm4, %v8483_v4  ;;  %vm6422_vm5 = vmand %vm8488_vm11, %vm8487_vm13  ;;  %vm8491_vm4 = vcmp.ge.f32.partialorder %v6048_v35, 0.003921569  ;;  %vm8492_vm12 = vcmp.ge.f32.partialorder %v8428_v17, 0.0  ;;  %v8495_v50 = vld [vmem:[#allocation167_spill] sm:$0xff]  ;;  %v8496_v23 = vmin.f32 %v8384_v25, 0.999  ;;  %v2451_v4 = vmul.f32 %v8503_v9, %v6410_v44  ;;  %v4033_v9 = vpop.eup %4032 }
 0x1cb   : > { %vm6430_vm15 = vmand %vm8492_vm12, %vm8491_vm4  ;;  %v8497_v16 = vmin.f32 %v8385_v58, 0.999  ;;  %vm8498_vm12 = vcmp.ge.f32.partialorder %v2467_v60, 0.003921569  ;;  %vm8499_vm8 = vcmp.ge.f32.partialorder %v8435_v24, 0.0  ;;  %v8502_v56 = vld [vmem:[#allocation107_spill] sm:$0xff]  ;;  %v6481_v5 = vmul.f32 %v801_v3, %v6226_v10 }
 0x1cc   : > { %3691 = vmatprep.subr.msk.mxu1 %vm6276_vm1, %v8496_v23  ;;  %vm6448_vm13 = vmand %vm8499_vm8, %vm8498_vm12  ;;  %vm2722_vm11 = vcmp.ge.f32.partialorder %v2466_v28, 0.003921569  ;;  %v2978_v30 = vmin.f32 %v2466_v28, 0.999  ;;  %v2449_v25 = vmul.f32 %v8502_v56, %v6410_v44  ;;  %vm8504_vm1 = vcmp.ge.f32.partialorder %v6061_v41, 0.003921569  ;;  %v6503_v28 = vpop.permute.xlu1 %2353 }
 0x1cd   : > { %3660 = vmatpush1.msk.msra.mxu0 %vm6284_vm3, %v8497_v16  ;;  %vm8505_vm4 = vcmp.ge.f32.partialorder %v5809_v59, 0.0  ;;  %v8506_v58 = vmov 0  ;;  %v8508_v60 = vld [vmem:[#allocation108_spill] sm:$0xff]  ;;  %v8509_v51 = vmin.f32 %v5692_v37, 0.999  ;;  %vm8510_vm8 = vcmp.ge.f32.partialorder %v8441_v26, 0.0 }
 0x1ce   : > { %vm6460_vm3 = vmand %vm8505_vm4, %vm8504_vm1  ;;  %3661 = vmatprep.subr.msk.mxu0 %vm6414_vm10, %v2977_v34  ;;  %v8511_v59 = vld [vmem:[#allocation112_spill] sm:$0xff]  ;;  %v8512_v23 = vld [vmem:[#allocation113_spill] sm:$0xff]  ;;  %v2938_v37 = vmin.f32 %v6201_v2, 0.999  ;;  %v2961_v26 = vmin.f32 %v2449_v25, 0.999  ;;  %v6529_v17 = vmul.f32 %v4031_v18, %v6435_v7 }
 0x1cf   : > { %v8507_v58 = vsel %vm6460_vm3, 4294967295, %v8506_v58  ;;  %3692 = vmatpush1.msk.msra.mxu1 %vm6306_vm0, %v8509_v51  ;;  %vm2848_vm9 = vmand %vm8510_vm8, %vm2720_vm2  ;;  %v2448_v24 = vmul.f32 %v8511_v59, %v6410_v44  ;;  %v2450_v16 = vmul.f32 %v8512_v23, %v6410_v44  ;;  %v8513_v56 = vld [vmem:[#allocation67_spill] sm:$0xff]  ;;  %vm8514_vm0 = vcmp.ge.f32.partialorder %v8445_v57, 0.0  ;;  %v8519_v3 = vld [vmem:[#allocation64_spill] sm:$0xff] }
 0x1d0   : > { %3693 = vmatprep.subr.msk.mxu1 %vm6448_vm13, %v2979_v46  ;;  %3662 = vmatpush1.msk.msra.mxu0 %vm2848_vm9, %v2976_v48  ;;  %vm2850_vm10 = vmand %vm8514_vm0, %vm2722_vm11  ;;  %vm2705_vm2 = vcmp.ge.f32.partialorder %v2449_v25, 0.003921569  ;;  %vm2707_vm4 = vcmp.ge.f32.partialorder %v2451_v4, 0.003921569  ;;  %vm8515_vm8 = vcmp.ge.f32.partialorder %v6095_v31, 0.003921569 }
 0x1d1   : > { %vm8516_vm1 = vcmp.ge.f32.partialorder %v5870_v13, 0.0  ;;  %v8520_v34 = vld [vmem:[#allocation70_spill] sm:$0xff]  ;;  %3694 = vmatpush1.msk.msra.mxu1 %vm2850_vm10, %v2978_v30  ;;  %v8521_v57 = vmin.f32 %v5804_v21, 0.999  ;;  %vm8522_vm9 = vcmp.ge.f32.partialorder %v8451_v19, 0.0  ;;  %vm8526_vm0 = vcmp.ge.f32.partialorder %v5896_v52, 0.0 }
 0x1d2   : > { %vm6492_vm12 = vmand %vm8516_vm1, %vm8515_vm8  ;;  %v1121_v15 = vmul.f32 %v8520_v34, %v6326_v62  ;;  %v2963_v46 = vmin.f32 %v2451_v4, 0.999  ;;  %vm2704_vm11 = vcmp.ge.f32.partialorder %v2448_v24, 0.003921569  ;;  %v2960_v48 = vmin.f32 %v2448_v24, 0.999 }
 0x1d3   : > { %3663 = vmatprep.subr.msk.mxu0 %vm6335_vm7, %v8521_v57  ;;  %vm6507_vm13 = vmand %vm8522_vm9, %vm2705_vm2  ;;  %vm8525_vm1 = vcmp.ge.f32.partialorder %v6103_v55, 0.003921569  ;;  %vm8529_vm7 = vcmp.ge.f32.partialorder %v6133_v14, 0.003921569  ;;  %vm8530_vm8 = vcmp.ge.f32.partialorder %v5995_v63, 0.0  ;;  %v8533_v19 = vld [vmem:[#allocation65_spill] sm:$0xff]  ;;  %vm8536_vm9 = vnez %v8460_v20 }
 0x1d4   : > { %vm6515_vm10 = vmand %vm8526_vm0, %vm8525_vm1  ;;  %v8534_v30 = vmin.f32 %v5861_v43, 0.999  ;;  %v8535_v52 = vmin.f32 %v5864_v40, 0.999  ;;  %vm8537_vm1 = vcmp.ge.f32.partialorder %v8461_v22, 0.0  ;;  %v8538_v25 = vld [vmem:[#allocation61_spill] sm:$0xff] }
 0x1d5   : > { %vm6523_vm3 = vmand %vm8530_vm8, %vm8529_vm7  ;;  %v2962_v63 = vmin.f32 %v2450_v16, 0.999  ;;  %v2433_v18 = vmul.f32 %v8538_v25, %v6503_v28  ;;  %v8539_v51 = vld [vmem:[#allocation57_spill] sm:$0xff]  ;;  %vm8540_vm8 = vcmp.ge.f32.partialorder %v6201_v2, 0.003921569  ;;  %v8544_v12 = vld [vmem:[#allocation66_spill] sm:$0xff] }
 0x1d6   : > { %3695 = vmatprep.subr.msk.mxu1 %vm6350_vm14, %v8534_v30  ;;  %3664 = vmatpush1.msk.msra.mxu0 %vm8536_vm9, %v8535_v52  ;;  %vm2835_vm0 = vmand %vm8537_vm1, %vm2707_vm4  ;;  %v2435_v43 = vmul.f32 %v8539_v51, %v6503_v28  ;;  %vm8541_vm14 = vcmp.ge.f32.partialorder %v6023_v39, 0.0  ;;  %v8545_v20 = vmin.f32 %v5878_v33, 0.999  ;;  %vm8546_vm4 = vnez %v8469_v0  ;;  %v8548_v39 = vld [vmem:[#allocation83_spill] sm:$0xff]  ;;  %v8550_v23 = vld [vmem:[#allocation73_spill] sm:$0xff] }
 0x1d7   : > { %vm6550_vm2 = vmand %vm8541_vm14, %vm8540_vm8  ;;  %3665 = vmatprep.subr.msk.mxu0 %vm6507_vm13, %v2961_v26  ;;  %vm8547_vm1 = vcmp.ge.f32.partialorder %v8470_v6, 0.0  ;;  %v2432_v22 = vmul.f32 %v8548_v39, %v6503_v28  ;;  %v8549_v4 = vld [vmem:[#allocation119_spill] sm:$0xff]  ;;  %vm2546_vm8 = vcmp.ge.f32.partialorder %v8550_v23, 0.0  ;;  %v6570_v33 = vmul.f32 %v4033_v9, %v6435_v7  ;;  %v8553_v24 = vld [vmem:[#allocation116_spill] sm:$0xff]  ;;  %v6582_v9 = vpop.permute.xlu1 %2345 }
 0x1d8   : > { %3696 = vmatpush1.msk.msra.mxu1 %vm8546_vm4, %v8545_v20  ;;  %vm2832_vm7 = vmand %vm8547_vm1, %vm2704_vm11  ;;  %v2434_v59 = vmul.f32 %v8549_v4, %v6503_v28  ;;  %v1962_v0 = vsub.f32 0.0, %v6404_v42  ;;  %vm8551_vm13 = vcmp.ge.f32.partialorder %v2450_v16, 0.003921569  ;;  %vm8552_vm14 = vcmp.ge.f32.partialorder %v8475_v47, 0.0  ;;  %v8556_v13 = vld [vmem:[#allocation55_spill] sm:$0xff]  ;;  %v8573_v25 = vld [vmem:[#allocation12_spill] sm:$0xff] }
 0x1d9   : > { %3697 = vmatprep.subr.msk.mxu1 %vm2835_vm0, %v2963_v46  ;;  %3666 = vmatpush1.msk.msra.mxu0 %vm2832_vm7, %v2960_v48  ;;  %vm2834_vm4 = vmand %vm8552_vm14, %vm8551_vm13  ;;  %vm2689_vm11 = vcmp.ge.f32.partialorder %v2433_v18, 0.003921569  ;;  %v2945_v6 = vmin.f32 %v2433_v18, 0.999  ;;  %vm2691_vm1 = vcmp.ge.f32.partialorder %v2435_v43, 0.003921569  ;;  %v1249_v26 = vmul.f32 %v1121_v15, %v6326_v62 }
 0x1da   : > { %vm2537_vm9 = vcmp.ge.f32.partialorder %v8553_v24, 0.0  ;;  %3698 = vmatpush1.msk.msra.mxu1 %vm2834_vm4, %v2962_v63  ;;  %v8554_v57 = vmin.f32 %v5932_v32, 0.999  ;;  %vm8555_vm0 = vcmp.ge.f32.partialorder %v8482_v45, 0.0  ;;  %v2947_v47 = vmin.f32 %v2435_v43, 0.999 }
 0x1db   : > { %vm2817_vm7 = vmand %vm8555_vm0, %vm2689_vm11  ;;  %vm2688_vm13 = vcmp.ge.f32.partialorder %v2432_v22, 0.003921569  ;;  %v2944_v16 = vmin.f32 %v2432_v22, 0.999  ;;  %v8557_v46 = vld [vmem:[#allocation9_spill] sm:$0xff]  ;;  %v2418_v8 = vmul.f32 %v6365_v36, %v6582_v9  ;;  %v8577_v40 = vld [vmem:[#allocation39_spill] sm:$0xff] }
 0x1dc   : > { %3667 = vmatprep.subr.msk.mxu0 %vm6399_vm6, %v8554_v57  ;;  %v1569_v48 = vmul.f32 %v8557_v46, %v6226_v10  ;;  %v8558_v15 = vmin.f32 %v5958_v11, 0.999  ;;  %v8559_v32 = vmin.f32 %v6048_v35, 0.999  ;;  %vm8560_vm6 = vcmp.ge.f32.partialorder %v8495_v50, 0.0  ;;  %v8561_v45 = vld [vmem:[#allocation89_spill] sm:$0xff] }
 0x1dd   : > { %vm2819_vm4 = vmand %vm8560_vm6, %vm2691_vm1  ;;  %vm2690_vm11 = vcmp.ge.f32.partialorder %v2434_v59, 0.003921569  ;;  %v2946_v53 = vmin.f32 %v2434_v59, 0.999  ;;  %v2417_v30 = vmul.f32 %v8561_v45, %v6582_v9  ;;  %v8562_v10 = vld [vmem:[#allocation90_spill] sm:$0xff]  ;;  %v2416_v35 = vmul.f32 %v6293_v61, %v6582_v9  ;;  %v8575_v2 = vld [vmem:[#allocation41_spill] sm:$0xff] }
 0x1de   : > { %3699 = vmatprep.subr.msk.mxu1 %vm6422_vm5, %v8558_v15  ;;  %3668 = vmatpush1.msk.msra.mxu0 %vm6430_vm15, %v8559_v32  ;;  %v2419_v52 = vmul.f32 %v8562_v10, %v6582_v9  ;;  %v8563_v11 = vmin.f32 %v6061_v41, 0.999  ;;  %vm8564_vm5 = vnez %v8507_v58  ;;  %vm8565_vm15 = vcmp.ge.f32.partialorder %v8508_v60, 0.0  ;;  %v8579_v22 = vld [vmem:[#allocation42_spill] sm:$0xff]  ;;  %v8582_v57 = vld [vmem:[#allocation45_spill] sm:$0xff] }
 0x1df   : > { %3669 = vmatprep.subr.msk.mxu0 %vm2817_vm7, %v2945_v6  ;;  %vm2816_vm14 = vmand %vm8565_vm15, %vm2688_vm13  ;;  %vm2665_vm1 = vcmp.ge.f32.partialorder %v6529_v17, 0.003921569  ;;  %v2921_v27 = vmin.f32 %v6529_v17, 0.999  ;;  %vm8566_vm6 = vcmp.ge.f32.partialorder %v8513_v56, 0.0  ;;  %v1377_v50 = vadd.f32 %v1249_v26, %v6481_v5  ;;  %v4035_v56 = vpop.eup %4034 }
 0x1e0   : > { %3700 = vmatpush1.msk.msra.mxu1 %vm8564_vm5, %v8563_v11  ;;  %3670 = vmatpush1.msk.msra.mxu0 %vm2816_vm14, %v2944_v16  ;;  %vm2818_vm0 = vmand %vm8566_vm6, %vm2690_vm11  ;;  %vm2673_vm5 = vcmp.ge.f32.partialorder %v2417_v30, 0.003921569  ;;  %v2929_v41 = vmin.f32 %v2417_v30, 0.999  ;;  %vm2675_vm7 = vcmp.ge.f32.partialorder %v2419_v52, 0.003921569  ;;  %v1697_v60 = vmul.f32 %v1569_v48, %v6326_v62 }
 0x1e1   : > { %3701 = vmatprep.subr.msk.mxu1 %vm2819_vm4, %v2947_v47  ;;  %v8567_v61 = vmin.f32 %v6095_v31, 0.999  ;;  %vm8568_vm13 = vcmp.ge.f32.partialorder %v8519_v3, 0.0  ;;  %v2931_v36 = vmin.f32 %v2419_v52, 0.999  ;;  %v8572_v3 = vld [vmem:[#allocation38_spill] sm:$0xff] }
 0x1e2   : > { %3702 = vmatpush1.msk.msra.mxu1 %vm2818_vm0, %v2946_v53  ;;  %vm2801_vm15 = vmand %vm8568_vm13, %vm2673_vm5  ;;  %vm2672_vm4 = vcmp.ge.f32.partialorder %v2416_v35, 0.003921569  ;;  %v2928_v58 = vmin.f32 %v2416_v35, 0.999  ;;  %v8569_v63 = vmin.f32 %v6103_v55, 0.999  ;;  %v378_v62 = vsub.f32 %v8573_v25, %v8572_v3 }
 0x1e3   : > { %3671 = vmatprep.subr.msk.mxu0 %vm6492_vm12, %v8567_v61  ;;  %v8570_v5 = vmin.f32 %v6133_v14, 0.999  ;;  %vm8571_vm12 = vcmp.ge.f32.partialorder %v8533_v19, 0.0  ;;  %vm2674_vm11 = vcmp.ge.f32.partialorder %v2418_v8, 0.003921569  ;;  %v2408_v14 = vmul.f32 %v4035_v56, %v6435_v7  ;;  %v8583_v16 = vld [vmem:[#allocation94_spill] sm:$0xff] }
 0x1e4   : > { %3703 = vmatprep.subr.msk.mxu1 %vm6515_vm10, %v8569_v63  ;;  %vm2803_vm14 = vmand %vm8571_vm12, %vm2675_vm7  ;;  %v2930_v31 = vmin.f32 %v2418_v8, 0.999  ;;  %v2100_v29 = vmul.f32 1.442695, %v1962_v0  ;;  %vm8574_vm10 = vcmp.ge.f32.partialorder %v8544_v12, 0.0  ;;  %v6647_v21 = vadd.f32 %v1697_v60, %v1377_v50  ;;  %v8585_v11 = vld [vmem:[#allocation77_spill] sm:$0xff] }
 0x1e5   : > { %3672 = vmatpush1.msk.msra.mxu0 %vm6523_vm3, %v8570_v5  ;;  %3704 = vmatpush1.msk.msra.mxu1 %vm6550_vm2, %v2938_v37  ;;  %vm2800_vm0 = vmand %vm8574_vm10, %vm2672_vm4  ;;  %vm2667_vm3 = vcmp.ge.f32.partialorder %v6570_v33, 0.003921569  ;;  %v2923_v55 = vmin.f32 %v6570_v33, 0.999  ;;  %v8576_v37 = vld [vmem:[#allocation59_spill] sm:$0xff]  ;;  %v803_v19 = vmul.f32 %v8476_v54, %v378_v62  ;;  %v1571_v18 = vmul.f32 %v8557_v46, %v378_v62  ;;  %v8588_v50 = vld [vmem:[#allocation76_spill] sm:$0xff] }
 0x1e6   : > { %3673 = vmatprep.subr.msk.mxu0 %vm2801_vm15, %v2929_v41  ;;  %3705 = vmatprep.subr.msk.mxu1 %vm2803_vm14, %v2931_v36  ;;  %vm2802_vm6 = vmand %vm2546_vm8, %vm2674_vm11  ;;  %4036 = vpow2.f32 %v2100_v29  ;;  %v611_v49 = vsub.f32 %v8576_v37, %v8575_v2  ;;  %vm2664_vm5 = vcmp.ge.f32.partialorder %v2408_v14, 0.003921569  ;;  %v2920_v51 = vmin.f32 %v2408_v14, 0.999  ;;  %v8581_v33 = vld [vmem:[#allocation43_spill] sm:$0xff]  ;;  %v8589_v3 = vld [vmem:[#allocation34_spill] sm:$0xff] }
 0x1e7   : > { %3674 = vmatpush1.msk.msra.mxu0 %vm2800_vm0, %v2928_v58  ;;  %3706 = vmatpush1.msk.msra.mxu1 %vm2802_vm6, %v2930_v31  ;;  %vm2793_vm2 = vmand %vm2537_vm9, %vm2665_vm1  ;;  %v1953_v43 = vsub.f32 0.0, %v6647_v21  ;;  %v375_v12 = vsub.f32 %v8573_v25, %v8577_v40  ;;  %vm8578_vm8 = vcmp.ge.f32.partialorder %v8556_v13, 0.0  ;;  %v931_v20 = vmul.f32 %v803_v19, %v378_v62  ;;  %v8584_v13 = vld [vmem:[#allocation31_spill] sm:$0xff]  ;;  %v4182_v29 = vld [vmem:[%s4386_s9] ss:$2 sm:$0xff] }
 0x1e8   : > { %3675 = vmatprep.subr.msk.mxu0 %vm2793_vm2, %v2921_v27  ;;  %vm2795_vm7 = vmand %vm8578_vm8, %vm2667_vm3  ;;  %v1123_v39 = vmul.f32 %v8520_v34, %v611_v49  ;;  %v1699_v17 = vmul.f32 %v1571_v18, %v611_v49  ;;  %v608_v4 = vsub.f32 %v8576_v37, %v8579_v22  ;;  %vm8580_vm9 = vcmp.ge.f32.partialorder %v6291_v38, 0.0  ;;  %v8586_v35 = vld [vmem:[#allocation75_spill] sm:$0xff]  ;;  %v8587_v27 = vld [vmem:[#allocation24_spill] sm:$0xff] }
 0x1e9   : > { %3707 = vmatprep.subr.msk.mxu1 %vm2795_vm7, %v2923_v55  ;;  %vm2792_vm1 = vmand %vm8580_vm9, %vm2664_vm5  ;;  %v2082_v59 = vmul.f32 1.442695, %v1953_v43  ;;  %v800_v23 = vmul.f32 %v8476_v54, %v375_v12  ;;  %v1568_v0 = vmul.f32 %v8557_v46, %v375_v12  ;;  %v377_v6 = vsub.f32 %v8573_v25, %v8581_v33  ;;  %v8591_v18 = vld [vmem:[#allocation17_spill] sm:$0xff] }
 0x1ea   : > { %3676 = vmatpush1.msk.msra.mxu0 %vm2792_vm1, %v2920_v51  ;;  %v1251_v24 = vmul.f32 %v1123_v39, %v611_v49  ;;  %v1120_v26 = vmul.f32 %v8520_v34, %v608_v4  ;;  %v610_v47 = vsub.f32 %v8576_v37, %v8582_v57  ;;  %v733_v48 = vsub.f32 %v8584_v13, %v8583_v16  ;;  %v4183_v43 = vld [vmem:[%s4386_s9 + $0x1] ss:$2 sm:$0xff] }
 0x1eb   : > { %4038 = vpow2.f32 %v2082_v59  ;;  %v928_v38 = vmul.f32 %v800_v23, %v375_v12  ;;  %v1696_v15 = vmul.f32 %v1568_v0, %v608_v4  ;;  %v802_v32 = vmul.f32 %v8476_v54, %v377_v6 }
 0x1ec   : > { %v1379_v53 = vadd.f32 %v1251_v24, %v931_v20  ;;  %v1248_v45 = vmul.f32 %v1120_v26, %v608_v4  ;;  %v1122_v30 = vmul.f32 %v8520_v34, %v610_v47  ;;  %v1570_v10 = vmul.f32 %v8557_v46, %v377_v6 }
 0x1ed   : > { %v930_v52 = vmul.f32 %v802_v32, %v377_v6  ;;  %v925_v8 = vmul.f32 %v8586_v35, %v8585_v11  ;;  %v1245_v41 = vmul.f32 %v8587_v27, %v733_v48  ;;  %v1693_v61 = vmul.f32 %v8588_v50, %v8585_v11 }
 0x1ee   : > { %v6688_v36 = vadd.f32 %v1699_v17, %v1379_v53  ;;  %v1376_v58 = vadd.f32 %v1248_v45, %v928_v38  ;;  %v1250_v60 = vmul.f32 %v1122_v30, %v610_v47  ;;  %v1698_v56 = vmul.f32 %v1570_v10, %v610_v47 }
 0x1ef   : > { %v1053_v63 = vmul.f32 %v925_v8, %v8585_v11  ;;  %v1373_v5 = vmul.f32 %v1245_v41, %v733_v48  ;;  %v1821_v31 = vmul.f32 %v1693_v61, %v733_v48  ;;  %v8590_v62 = vsub.s32 7, %v8589_v3  ;;  %v6721_v48 = vpop.permute.xlu1 %2337  ;;  %v8593_v11 = vld [vmem:[#allocation74_spill] sm:$0xff]  ;;  %v8594_v8 = vld [vmem:[#allocation19_spill] sm:$0xff] }
 0x1f0   : > { %v1955_v14 = vsub.f32 0.0, %v6688_v36  ;;  %v6697_v2 = vadd.f32 %v1696_v15, %v1376_v58  ;;  %v1378_v49 = vadd.f32 %v1250_v60, %v930_v52  ;;  %v353_v22 = vsub.s32 4, %v8589_v3 }
 0x1f1   : > { %v6694_v55 = vrot.slane %v4182_v29, %v8590_v62  ;;  %v1501_v19 = vadd.f32 %v1373_v5, %v1053_v63  ;;  %v8592_v40 = vmov %v8590_v62  ;;  %vm2538_vm13 = vcmp.ge.f32.partialorder %v6404_v42, 0.0 }
 0x1f2   : > { %v6704_v12 = vrot.slane %v4183_v43, %v8592_v40  ;;  %v2086_v20 = vmul.f32 1.442695, %v1955_v14  ;;  %v1952_v39 = vsub.f32 0.0, %v6697_v2  ;;  %v6707_v17 = vadd.f32 %v1698_v56, %v1378_v49 }
 0x1f3   : > { %v502_v51 = vsub.f32 %v8591_v18, %v6694_v55  ;;  %v4037_v4 = vpop.eup %4036  ;;  %v6710_v59 = vadd.f32 %v1821_v31, %v1501_v19  ;;  %vm2529_vm15 = vcmp.ge.f32.partialorder %v6647_v21, 0.0  ;;  %v6724_v30 = vrot.slane %v4182_v29, %v353_v22  ;;  %v8595_v31 = vld [vmem:[#allocation22_spill] sm:$0xff] }
 0x1f4   : > { %v735_v23 = vsub.f32 %v8584_v13, %v6704_v12  ;;  %v2410_v6 = vmul.f32 %v4037_v4, %v6435_v7  ;;  %4040 = vpow2.f32 %v2086_v20  ;;  %v2080_v24 = vmul.f32 1.442695, %v1952_v39  ;;  %v8596_v39 = vld [vmem:[#allocation28_spill] sm:$0xff]  ;;  %v8597_v4 = vld [vmem:[#allocation30_spill] sm:$0xff] }
 0x1f5   : > { %v927_v0 = vmul.f32 %v8586_v35, %v502_v51  ;;  %v1695_v33 = vmul.f32 %v8588_v50, %v502_v51  ;;  %v1954_v26 = vsub.f32 0.0, %v6707_v17  ;;  %v2077_v57 = vsub.f32 0.0, %v6710_v59 }
 0x1f6   : > { %vm2666_vm4 = vcmp.ge.f32.partialorder %v2410_v6, 0.003921569  ;;  %v2922_v38 = vmin.f32 %v2410_v6, 0.999  ;;  %4042 = vpow2.f32 %v2080_v24  ;;  %v1247_v53 = vmul.f32 %v8587_v27, %v735_v23 }
 0x1f7   : > { %v1055_v47 = vmul.f32 %v927_v0, %v502_v51  ;;  %v2084_v15 = vmul.f32 1.442695, %v1954_v26  ;;  %vm2794_vm12 = vmand %vm2538_vm13, %vm2666_vm4  ;;  %v2330_v32 = vmul.f32 1.442695, %v2077_v57  ;;  %v1823_v45 = vmul.f32 %v1695_v33, %v735_v23 }
 0x1f8   : > { %v4039_v10 = vpop.eup %4038  ;;  %3708 = vmatpush1.msk.msra.mxu1 %vm2794_vm12, %v2922_v38  ;;  %v6726_v42 = vrot.slane %v4183_v43, %v353_v22  ;;  %v361_v52 = vsub.s32 6, %v8589_v3  ;;  %v492_v41 = vsub.f32 %v8594_v8, %v8593_v11  ;;  %v1375_v58 = vmul.f32 %v1247_v53, %v735_v23 }
 0x1f9   : > { %4044 = vpow2.f32 %v2084_v15  ;;  %v2401_v61 = vmul.f32 %v4039_v10, %v6721_v48  ;;  %v499_v60 = vsub.f32 %v8591_v18, %v6724_v30  ;;  %v725_v3 = vsub.f32 %v8595_v31, %v8583_v16 }
 0x1fa   : > { %4046 = vpow2.f32 %v2330_v32  ;;  %v732_v56 = vsub.f32 %v8584_v13, %v6726_v42  ;;  %v6736_v63 = vrot.slane %v4182_v29, %v361_v52  ;;  %v6738_v5 = vrot.slane %v4183_v43, %v361_v52 }
 0x1fb   : > { %vm2657_vm14 = vcmp.ge.f32.partialorder %v2401_v61, 0.003921569  ;;  %v2913_v62 = vmin.f32 %v2401_v61, 0.999  ;;  %v1503_v14 = vadd.f32 %v1375_v58, %v1055_v47  ;;  %v924_v49 = vmul.f32 %v8586_v35, %v499_v60 }
 0x1fc   : > { %vm2785_vm11 = vmand %vm2529_vm15, %vm2657_vm14  ;;  %v1244_v19 = vmul.f32 %v8587_v27, %v732_v56  ;;  %v1692_v51 = vmul.f32 %v8588_v50, %v499_v60  ;;  %v501_v29 = vsub.f32 %v8591_v18, %v6736_v63  ;;  %v734_v43 = vsub.f32 %v8584_v13, %v6738_v5 }
 0x1fd   : > { %3677 = vmatprep.subr.msk.mxu0 %vm2785_vm11, %v2913_v62  ;;  %v6751_v40 = vadd.f32 %v1823_v45, %v1503_v14  ;;  %v1052_v20 = vmul.f32 %v924_v49, %v499_v60  ;;  %v917_v22 = vmul.f32 %v8596_v39, %v492_v41  ;;  %v1237_v23 = vmul.f32 %v8597_v4, %v725_v3  ;;  %v8598_v45 = vld [vmem:[#allocation62_spill] sm:$0xff] }
 0x1fe   : > { %v1372_v21 = vmul.f32 %v1244_v19, %v732_v56  ;;  %v1820_v0 = vmul.f32 %v1692_v51, %v732_v56  ;;  %v926_v33 = vmul.f32 %v8586_v35, %v501_v29  ;;  %v1246_v6 = vmul.f32 %v8587_v27, %v734_v43  ;;  %v3176_v19 = vld [vmem:[%s4397_s22] sm:$0xff] }
 0x1ff   : > { %vm2531_vm10 = vcmp.ge.f32.partialorder %v6688_v36, 0.0  ;;  %v2079_v18 = vsub.f32 0.0, %v6751_v40  ;;  %v1694_v13 = vmul.f32 %v8588_v50, %v501_v29  ;;  %v1045_v24 = vmul.f32 %v917_v22, %v492_v41  ;;  %v8599_v36 = vld [vmem:[#allocation69_spill] sm:$0xff] }
 0x200   : > { %v1500_v26 = vadd.f32 %v1372_v21, %v1052_v20  ;;  %v1054_v57 = vmul.f32 %v926_v33, %v501_v29  ;;  %v1374_v47 = vmul.f32 %v1246_v6, %v734_v43  ;;  %v1365_v38 = vmul.f32 %v1237_v23, %v725_v3 }
 0x201   : > { %v4041_v15 = vpop.eup %4040  ;;  %v2334_v32 = vmul.f32 1.442695, %v2079_v18  ;;  %v1822_v53 = vmul.f32 %v1694_v13, %v734_v43  ;;  %v1685_v10 = vmul.f32 %v8598_v45, %v492_v41  ;;  %v494_v35 = vsub.f32 %v8594_v8, %v6694_v55 }
 0x202   : > { %v2403_v27 = vmul.f32 %v4041_v15, %v6721_v48  ;;  %vm2528_vm0 = vcmp.ge.f32.partialorder %v6697_v2, 0.0  ;;  %v6765_v52 = vadd.f32 %v1820_v0, %v1500_v26  ;;  %v1502_v50 = vadd.f32 %v1374_v47, %v1054_v57 }
 0x203   : > { %v4043_v61 = vpop.eup %4042  ;;  %4048 = vpow2.f32 %v2334_v32  ;;  %v1493_v58 = vadd.f32 %v1365_v38, %v1045_v24  ;;  %v1813_v60 = vmul.f32 %v1685_v10, %v725_v3  ;;  %v919_v56 = vmul.f32 %v8596_v39, %v494_v35 }
 0x204   : > { %vm2659_vm3 = vcmp.ge.f32.partialorder %v2403_v27, 0.003921569  ;;  %v2915_v62 = vmin.f32 %v2403_v27, 0.999  ;;  %v2400_v41 = vmul.f32 %v4043_v61, %v6721_v48  ;;  %v2076_v14 = vsub.f32 0.0, %v6765_v52 }
 0x205   : > { %vm2787_vm6 = vmand %vm2531_vm10, %vm2659_vm3  ;;  %vm2530_vm2 = vcmp.ge.f32.partialorder %v6707_v17, 0.0  ;;  %vm2653_vm5 = vcmp.ge.f32.partialorder %v6710_v59, 0.0  ;;  %v6775_v51 = vadd.f32 %v1822_v53, %v1502_v50  ;;  %v6777_v3 = vadd.f32 %v1813_v60, %v1493_v58 }
 0x206   : > { %v4045_v49 = vpop.eup %4044  ;;  %3709 = vmatprep.subr.msk.mxu1 %vm2787_vm6, %v2915_v62  ;;  %vm2656_vm8 = vcmp.ge.f32.partialorder %v2400_v41, 0.003921569  ;;  %v2912_v43 = vmin.f32 %v2400_v41, 0.999  ;;  %v2328_v22 = vmul.f32 1.442695, %v2076_v14  ;;  %v727_v33 = vsub.f32 %v8595_v31, %v6704_v12 }
 0x207   : > { %v4047_v29 = vpop.eup %4046  ;;  %v2402_v20 = vmul.f32 %v4045_v49, %v6721_v48  ;;  %vm2784_vm7 = vmand %vm2528_vm0, %vm2656_vm8  ;;  %v2078_v21 = vsub.f32 0.0, %v6775_v51  ;;  %v2069_v0 = vsub.f32 0.0, %v6777_v3  ;;  %v1047_v18 = vmul.f32 %v919_v56, %v494_v35 }
 0x208   : > { %v2525_v23 = vmul.f32 %v4047_v29, %v8599_v36  ;;  %3678 = vmatpush1.msk.msra.mxu0 %vm2784_vm7, %v2912_v43  ;;  %4050 = vpow2.f32 %v2328_v22  ;;  %v1239_v24 = vmul.f32 %v8597_v4, %v727_v33  ;;  %v1687_v57 = vmul.f32 %v8598_v45, %v494_v35  ;;  %v8602_v22 = vld [vmem:[#allocation33_spill] sm:$0xff] }
 0x209   : > { %vm2658_vm9 = vcmp.ge.f32.partialorder %v2402_v20, 0.003921569  ;;  %v2914_v6 = vmin.f32 %v2402_v20, 0.999  ;;  %3242 = vmatmul.mubr.f32.vlgmr.msra.gmra.mxu0 %v3176_v19  ;;  %v2332_v13 = vmul.f32 1.442695, %v2078_v21  ;;  %v491_v47 = vsub.f32 %v8594_v8, %v6724_v30 }
 0x20a   : > { %vm2786_vm1 = vmand %vm2530_vm2, %vm2658_vm9  ;;  %vm2781_vm13 = vcmp.ge.f32.partialorder %v2525_v23, 0.003921569  ;;  %v3037_v2 = vmin.f32 %v2525_v23, 0.999  ;;  %v2314_v26 = vmul.f32 1.442695, %v2069_v0  ;;  %v724_v17 = vsub.f32 %v8595_v31, %v6726_v42 }
 0x20b   : > { %3710 = vmatpush1.msk.msra.mxu1 %vm2786_vm1, %v2914_v6  ;;  %vm2909_vm15 = vmand %vm2653_vm5, %vm2781_vm13  ;;  %v8600_v38 = vmov 0.0   ;;  %4052 = vpow2.f32 %v2332_v13  ;;  %v1367_v15 = vmul.f32 %v1239_v24, %v727_v33  ;;  %v493_v32 = vsub.f32 %v8594_v8, %v6736_v63  ;;  %v8603_v23 = vld [vmem:[#allocation79_spill] sm:$0xff]  ;;  %v8605_v13 = vld [vmem:[#allocation84_spill] sm:$0xff] }
 0x20c   : > { %3383 = vmatprep.mubr.f32.mxu0 %v8600_v38  ;;  %3313 = vmatmul.mubr.f32.vlgmr.msra.gmra.mxu1 %v3176_v19  ;;  %v726_v59 = vsub.f32 %v8595_v31, %v6738_v5  ;;  %4054 = vpow2.f32 %v2314_v26  ;;  %v1815_v53 = vmul.f32 %v1687_v57, %v727_v33  ;;  %v916_v10 = vmul.f32 %v8596_v39, %v491_v47  ;;  %v8601_v31 = vld [vmem:[#allocation26_spill] sm:$0xff] }
 0x20d   : > { %3711 = vmatprep.subr.msk.mxu0 %vm2909_vm15, %v3037_v2  ;;  %v1236_v35 = vmul.f32 %v8597_v4, %v724_v17  ;;  %3454 = vmatprep.mubr.f32.mxu1 %v8600_v38  ;;  %v1495_v27 = vadd.f32 %v1367_v15, %v1047_v18  ;;  %v1684_v50 = vmul.f32 %v8598_v45, %v491_v47  ;;  %vm2655_vm4 = vcmp.ge.f32.partialorder %v6751_v40, 0.0  ;;  %v8604_v18 = vld [vmem:[#allocation44_spill] sm:$0xff] }
 0x20e   : > { %v918_v61 = vmul.f32 %v8596_v39, %v493_v32  ;;  %v1238_v58 = vmul.f32 %v8597_v4, %v726_v59  ;;  %v1044_v60 = vmul.f32 %v916_v10, %v491_v47  ;;  %v1686_v56 = vmul.f32 %v8598_v45, %v493_v32 }
 0x20f   : > { %v1364_v8 = vmul.f32 %v1236_v35, %v724_v17  ;;  %v484_v62 = vsub.f32 %v8601_v31, %v8593_v11  ;;  %v6811_v41 = vadd.f32 %v1815_v53, %v1495_v27  ;;  %v1812_v14 = vmul.f32 %v1684_v50, %v724_v17 }
 0x210   : > { %v1046_v49 = vmul.f32 %v918_v61, %v493_v32  ;;  %v1366_v19 = vmul.f32 %v1238_v58, %v726_v59  ;;  %v4049_v29 = vpop.eup %4048  ;;  %v1814_v20 = vmul.f32 %v1686_v56, %v726_v59  ;;  %v717_v39 = vsub.f32 %v8602_v22, %v8583_v16 }
 0x211   : > { %v1492_v43 = vadd.f32 %v1364_v8, %v1044_v60  ;;  %v909_v4 = vmul.f32 %v8603_v23, %v484_v62  ;;  %v2527_v21 = vmul.f32 %v4049_v29, %v8599_v36  ;;  %v2071_v45 = vsub.f32 0.0, %v6811_v41  ;;  %v8606_v29 = vld [vmem:[#allocation40_spill] sm:$0xff] }
 0x212   : > { %v1494_v0 = vadd.f32 %v1366_v19, %v1046_v49  ;;  %v1229_v2 = vmul.f32 %v8604_v18, %v717_v39  ;;  %v1677_v24 = vmul.f32 %v8605_v13, %v484_v62  ;;  %vm2652_vm11 = vcmp.ge.f32.partialorder %v6765_v52, 0.0 }
 0x213   : > { %v6819_v33 = vadd.f32 %v1812_v14, %v1492_v43  ;;  %v1037_v6 = vmul.f32 %v909_v4, %v484_v62  ;;  %vm2783_vm12 = vcmp.ge.f32.partialorder %v2527_v21, 0.003921569  ;;  %v3039_v26 = vmin.f32 %v2527_v21, 0.999 }
 0x214   : > { %v2318_v57 = vmul.f32 1.442695, %v2071_v45  ;;  %v6823_v47 = vadd.f32 %v1814_v20, %v1494_v0  ;;  %vm2911_vm14 = vmand %vm2655_vm4, %vm2783_vm12  ;;  %v1357_v17 = vmul.f32 %v1229_v2, %v717_v39  ;;  %v1805_v38 = vmul.f32 %v1677_v24, %v717_v39 }
 0x215   : > { %v2068_v40 = vsub.f32 0.0, %v6819_v33  ;;  %v4051_v15 = vpop.eup %4050  ;;  %3743 = vmatprep.subr.msk.mxu1 %vm2911_vm14, %v3039_v26  ;;  %vm2654_vm10 = vcmp.ge.f32.partialorder %v6775_v51, 0.0  ;;  %v486_v59 = vsub.f32 %v8601_v31, %v6694_v55  ;;  %v719_v27 = vsub.f32 %v8602_v22, %v6704_v12 }
 0x216   : > { %4056 = vpow2.f32 %v2318_v57  ;;  %v2070_v32 = vsub.f32 0.0, %v6823_v47  ;;  %v2524_v53 = vmul.f32 %v4051_v15, %v8599_v36  ;;  %v1485_v35 = vadd.f32 %v1357_v17, %v1037_v6  ;;  %v8607_v17 = vld [vmem:[#allocation32_spill] sm:$0xff] }
 0x217   : > { %v2312_v10 = vmul.f32 1.442695, %v2068_v40  ;;  %vm2645_vm0 = vcmp.ge.f32.partialorder %v6777_v3, 0.0  ;;  %v911_v61 = vmul.f32 %v8603_v23, %v486_v59  ;;  %v1679_v58 = vmul.f32 %v8605_v13, %v486_v59 }
 0x218   : > { %v2316_v50 = vmul.f32 1.442695, %v2070_v32  ;;  %v4053_v60 = vpop.eup %4052  ;;  %vm2780_vm3 = vcmp.ge.f32.partialorder %v2524_v53, 0.003921569  ;;  %v3036_v8 = vmin.f32 %v2524_v53, 0.999  ;;  %v6837_v56 = vadd.f32 %v1805_v38, %v1485_v35 }
 0x219   : > { %4058 = vpow2.f32 %v2312_v10  ;;  %v4055_v62 = vpop.eup %4054  ;;  %vm2908_vm6 = vmand %vm2652_vm11, %vm2780_vm3  ;;  %v2526_v14 = vmul.f32 %v4053_v60, %v8599_v36  ;;  %v1039_v49 = vmul.f32 %v911_v61, %v486_v59  ;;  %v1231_v19 = vmul.f32 %v8604_v18, %v719_v27 }
 0x21a   : > { %4060 = vpow2.f32 %v2316_v50  ;;  %3712 = vmatpush1.msk.msra.mxu0 %vm2908_vm6, %v3036_v8  ;;  %v2517_v43 = vmul.f32 %v4055_v62, %v8606_v29  ;;  %v2061_v20 = vsub.f32 0.0, %v6837_v56  ;;  %v1807_v39 = vmul.f32 %v1679_v58, %v719_v27 }
 0x21b   : > { %v483_v4 = vsub.f32 %v8601_v31, %v6724_v30  ;;  %vm2782_vm2 = vcmp.ge.f32.partialorder %v2526_v14, 0.003921569  ;;  %v3038_v21 = vmin.f32 %v2526_v14, 0.999  ;;  %v1359_v45 = vmul.f32 %v1231_v19, %v719_v27  ;;  %v8609_v27 = vld [vmem:[#allocation78_spill] sm:$0xff] }
 0x21c   : > { %v716_v52 = vsub.f32 %v8602_v22, %v6726_v42  ;;  %vm2910_vm5 = vmand %vm2654_vm10, %vm2782_vm2  ;;  %vm2773_vm8 = vcmp.ge.f32.partialorder %v2517_v43, 0.003921569  ;;  %v3029_v36 = vmin.f32 %v2517_v43, 0.999  ;;  %v2298_v0 = vmul.f32 1.442695, %v2061_v20 }
 0x21d   : > { %v908_v6 = vmul.f32 %v8603_v23, %v483_v4  ;;  %3744 = vmatpush1.msk.msra.mxu1 %vm2910_vm5, %v3038_v21  ;;  %vm2901_vm7 = vmand %vm2645_vm0, %vm2773_vm8  ;;  %v1487_v2 = vadd.f32 %v1359_v45, %v1039_v49  ;;  %v1676_v26 = vmul.f32 %v8605_v13, %v483_v4  ;;  %v485_v57 = vsub.f32 %v8601_v31, %v6736_v63  ;;  %v8608_v31 = vld [vmem:[#allocation36_spill] sm:$0xff]  ;;  %v8611_v43 = vld [vmem:[#allocation117_spill] sm:$0xff] }
 0x21e   : > { %v1228_v24 = vmul.f32 %v8604_v18, %v716_v52  ;;  %3713 = vmatprep.subr.msk.mxu0 %vm2901_vm7, %v3029_v36  ;;  %4062 = vpow2.f32 %v2298_v0  ;;  %v718_v40 = vsub.f32 %v8602_v22, %v6738_v5  ;;  %v476_v38 = vsub.f32 %v8607_v17, %v8593_v11 }
 0x21f   : > { %v1036_v51 = vmul.f32 %v908_v6, %v483_v4  ;;  %v6862_v15 = vadd.f32 %v1807_v39, %v1487_v2  ;;  %v1804_v32 = vmul.f32 %v1676_v26, %v716_v52  ;;  %v910_v59 = vmul.f32 %v8603_v23, %v485_v57  ;;  %v8610_v23 = vld [vmem:[#allocation23_spill] sm:$0xff] }
 0x220   : > { %v1356_v3 = vmul.f32 %v1228_v24, %v716_v52  ;;  %v1230_v53 = vmul.f32 %v8604_v18, %v718_v40  ;;  %v1678_v10 = vmul.f32 %v8605_v13, %v485_v57  ;;  %v709_v35 = vsub.f32 %v8608_v31, %v8583_v16 }
 0x221   : > { %v901_v50 = vmul.f32 %v8609_v27, %v476_v38  ;;  %vm2647_vm9 = vcmp.ge.f32.partialorder %v6811_v41, 0.0  ;;  %v2063_v22 = vsub.f32 0.0, %v6862_v15  ;;  %v1038_v58 = vmul.f32 %v910_v59, %v485_v57 }
 0x222   : > { %v1484_v61 = vadd.f32 %v1356_v3, %v1036_v51  ;;  %v1358_v8 = vmul.f32 %v1230_v53, %v718_v40  ;;  %v1806_v62 = vmul.f32 %v1678_v10, %v718_v40  ;;  %v1221_v49 = vmul.f32 %v8610_v23, %v709_v35 }
 0x223   : > { %v4057_v60 = vpop.eup %4056  ;;  %v1029_v14 = vmul.f32 %v901_v50, %v476_v38  ;;  %v2302_v13 = vmul.f32 1.442695, %v2063_v22  ;;  %v1669_v20 = vmul.f32 %v8611_v43, %v476_v38  ;;  %vm2644_vm1 = vcmp.ge.f32.partialorder %v6819_v33, 0.0 }
 0x224   : > { %v2519_v18 = vmul.f32 %v4057_v60, %v8606_v29  ;;  %v6874_v19 = vadd.f32 %v1804_v32, %v1484_v61  ;;  %v1486_v39 = vadd.f32 %v1358_v8, %v1038_v58  ;;  %v1349_v4 = vmul.f32 %v1221_v49, %v709_v35  ;;  %v8612_v61 = vld [vmem:[#allocation115_spill] sm:$0xff] }
 0x225   : > { %v478_v21 = vsub.f32 %v8607_v17, %v6694_v55  ;;  %4064 = vpow2.f32 %v2302_v13  ;;  %v711_v26 = vsub.f32 %v8608_v31, %v6704_v12  ;;  %v1797_v40 = vmul.f32 %v1669_v20, %v709_v35 }
 0x226   : > { %v4059_v45 = vpop.eup %4058  ;;  %vm2775_vm13 = vcmp.ge.f32.partialorder %v2519_v18, 0.003921569  ;;  %v3031_v52 = vmin.f32 %v2519_v18, 0.999  ;;  %v2060_v36 = vsub.f32 0.0, %v6874_v19  ;;  %v6884_v2 = vadd.f32 %v1806_v62, %v1486_v39 }
 0x227   : > { %v4061_v0 = vpop.eup %4060  ;;  %vm2903_vm15 = vmand %vm2647_vm9, %vm2775_vm13  ;;  %v2516_v6 = vmul.f32 %v4059_v45, %v8606_v29  ;;  %v1477_v24 = vadd.f32 %v1349_v4, %v1029_v14  ;;  %v903_v38 = vmul.f32 %v8609_v27, %v478_v21  ;;  %vm2646_vm12 = vcmp.ge.f32.partialorder %v6823_v47, 0.0 }
 0x228   : > { %3745 = vmatprep.subr.msk.mxu1 %vm2903_vm15, %v3031_v52  ;;  %v2518_v57 = vmul.f32 %v4061_v0, %v8606_v29  ;;  %v2296_v51 = vmul.f32 1.442695, %v2060_v36  ;;  %v2062_v41 = vsub.f32 0.0, %v6884_v2  ;;  %v1223_v10 = vmul.f32 %v8610_v23, %v711_v26 }
 0x229   : > { %vm2772_vm4 = vcmp.ge.f32.partialorder %v2516_v6, 0.003921569  ;;  %v3028_v3 = vmin.f32 %v2516_v6, 0.999  ;;  %v6894_v59 = vadd.f32 %v1797_v40, %v1477_v24  ;;  %v1031_v53 = vmul.f32 %v903_v38, %v478_v21 }
 0x22a   : > { %vm2900_vm14 = vmand %vm2644_vm1, %vm2772_vm4  ;;  %vm2774_vm11 = vcmp.ge.f32.partialorder %v2518_v57, 0.003921569  ;;  %v3030_v32 = vmin.f32 %v2518_v57, 0.999  ;;  %4066 = vpow2.f32 %v2296_v51  ;;  %v2300_v29 = vmul.f32 1.442695, %v2062_v41 }
 0x22b   : > { %3714 = vmatpush1.msk.msra.mxu0 %vm2900_vm14, %v3028_v3  ;;  %vm2902_vm10 = vmand %vm2646_vm12, %vm2774_vm11  ;;  %v1671_v35 = vmul.f32 %v8611_v43, %v478_v21  ;;  %v4063_v50 = vpop.eup %4062  ;;  %vm2637_vm0 = vcmp.ge.f32.partialorder %v6837_v56, 0.0  ;;  %v2053_v33 = vsub.f32 0.0, %v6894_v59  ;;  %v475_v47 = vsub.f32 %v8607_v17, %v6724_v30  ;;  %v8613_v56 = vld [vmem:[#allocation20_spill] sm:$0xff] }
 0x22c   : > { %3746 = vmatpush1.msk.msra.mxu1 %vm2902_vm10, %v3030_v32  ;;  %v708_v22 = vsub.f32 %v8608_v31, %v6726_v42  ;;  %v2509_v58 = vmul.f32 %v4063_v50, %v8612_v61  ;;  %4068 = vpow2.f32 %v2300_v29  ;;  %v1351_v60 = vmul.f32 %v1223_v10, %v711_v26  ;;  %v8615_v32 = vld [vmem:[#allocation104_spill] sm:$0xff] }
 0x22d   : > { %v1799_v8 = vmul.f32 %v1671_v35, %v711_v26  ;;  %v2282_v62 = vmul.f32 1.442695, %v2053_v33  ;;  %v900_v14 = vmul.f32 %v8609_v27, %v475_v47  ;;  %v1668_v18 = vmul.f32 %v8611_v43, %v475_v47  ;;  %v8614_v26 = vld [vmem:[#allocation71_spill] sm:$0xff]  ;;  %v8616_v35 = vld [vmem:[#allocation54_spill] sm:$0xff]  ;;  %v8617_v33 = vld [vmem:[#allocation68_spill] sm:$0xff] }
 0x22e   : > { %v1220_v49 = vmul.f32 %v8610_v23, %v708_v22  ;;  %vm2765_vm3 = vcmp.ge.f32.partialorder %v2509_v58, 0.003921569  ;;  %v3021_v13 = vmin.f32 %v2509_v58, 0.999  ;;  %v1479_v20 = vadd.f32 %v1351_v60, %v1031_v53 }
 0x22f   : > { %v477_v39 = vsub.f32 %v8607_v17, %v6736_v63  ;;  %vm2893_vm6 = vmand %vm2637_vm0, %vm2765_vm3  ;;  %4070 = vpow2.f32 %v2282_v62  ;;  %v1028_v4 = vmul.f32 %v900_v14, %v475_v47  ;;  %v1796_v45 = vmul.f32 %v1668_v18, %v708_v22 }
 0x230   : > { %v1348_v21 = vmul.f32 %v1220_v49, %v708_v22  ;;  %3715 = vmatprep.subr.msk.mxu0 %vm2893_vm6, %v3021_v13  ;;  %v6912_v52 = vadd.f32 %v1799_v8, %v1479_v20  ;;  %v710_v36 = vsub.f32 %v8608_v31, %v6738_v5  ;;  %vm2639_vm2 = vcmp.ge.f32.partialorder %v6862_v15, 0.0 }
 0x231   : > { %v902_v0 = vmul.f32 %v8609_v27, %v477_v39  ;;  %v1670_v6 = vmul.f32 %v8611_v43, %v477_v39  ;;  %v468_v24 = vsub.f32 %v8613_v56, %v8593_v11  ;;  %v701_v57 = vsub.f32 %v8614_v26, %v8583_v16 }
 0x232   : > { %v1476_v17 = vadd.f32 %v1348_v21, %v1028_v4  ;;  %v4065_v51 = vpop.eup %4064  ;;  %v2055_v40 = vsub.f32 0.0, %v6912_v52  ;;  %v1222_v3 = vmul.f32 %v8610_v23, %v710_v36  ;;  %v470_v31 = vsub.f32 %v8613_v56, %v6694_v55 }
 0x233   : > { %v1030_v38 = vmul.f32 %v902_v0, %v477_v39  ;;  %v2511_v27 = vmul.f32 %v4065_v51, %v8612_v61  ;;  %v1798_v41 = vmul.f32 %v1670_v6, %v710_v36  ;;  %v893_v29 = vmul.f32 %v8615_v32, %v468_v24 }
 0x234   : > { %v6928_v43 = vadd.f32 %v1796_v45, %v1476_v17  ;;  %v2286_v53 = vmul.f32 1.442695, %v2055_v40  ;;  %v1350_v10 = vmul.f32 %v1222_v3, %v710_v36  ;;  %v1213_v50 = vmul.f32 %v8616_v35, %v701_v57 }
 0x235   : > { %v1661_v47 = vmul.f32 %v8617_v33, %v468_v24  ;;  %vm2767_vm5 = vcmp.ge.f32.partialorder %v2511_v27, 0.003921569  ;;  %v3023_v22 = vmin.f32 %v2511_v27, 0.999  ;;  %vm2636_vm8 = vcmp.ge.f32.partialorder %v6874_v19, 0.0 }
 0x236   : > { %v2052_v23 = vsub.f32 0.0, %v6928_v43  ;;  %vm2895_vm7 = vmand %vm2639_vm2, %vm2767_vm5  ;;  %4072 = vpow2.f32 %v2286_v53  ;;  %v1478_v60 = vadd.f32 %v1350_v10, %v1030_v38  ;;  %v1021_v8 = vmul.f32 %v893_v29, %v468_v24 }
 0x237   : > { %v4067_v58 = vpop.eup %4066  ;;  %v1341_v62 = vmul.f32 %v1213_v50, %v701_v57  ;;  %3747 = vmatprep.subr.msk.mxu1 %vm2895_vm7, %v3023_v22  ;;  %v1789_v18 = vmul.f32 %v1661_v47, %v701_v57  ;;  %v703_v13 = vsub.f32 %v8614_v26, %v6704_v12  ;;  %v895_v4 = vmul.f32 %v8615_v32, %v470_v31 }
 0x238   : > { %v2508_v14 = vmul.f32 %v4067_v58, %v8612_v61  ;;  %v2280_v49 = vmul.f32 1.442695, %v2052_v23  ;;  %v6940_v20 = vadd.f32 %v1798_v41, %v1478_v60  ;;  %v1663_v15 = vmul.f32 %v8617_v33, %v470_v31 }
 0x239   : > { %v1469_v39 = vadd.f32 %v1341_v62, %v1021_v8  ;;  %v4069_v21 = vpop.eup %4068  ;;  %v1215_v36 = vmul.f32 %v8616_v35, %v703_v13  ;;  %vm2638_vm13 = vcmp.ge.f32.partialorder %v6884_v2, 0.0  ;;  %v1023_v24 = vmul.f32 %v895_v4, %v470_v31  ;;  %v8618_v2 = vld [vmem:[#allocation130_spill] sm:$0xff] }
 0x23a   : > { %vm2764_vm9 = vcmp.ge.f32.partialorder %v2508_v14, 0.003921569  ;;  %v3020_v45 = vmin.f32 %v2508_v14, 0.999  ;;  %4074 = vpow2.f32 %v2280_v49  ;;  %v2510_v0 = vmul.f32 %v4069_v21, %v8612_v61  ;;  %v8620_v21 = vld [vmem:[#allocation35_spill] sm:$0xff] }
 0x23b   : > { %vm2892_vm1 = vmand %vm2636_vm8, %vm2764_vm9  ;;  %v2054_v6 = vsub.f32 0.0, %v6940_v20  ;;  %v6950_v17 = vadd.f32 %v1789_v18, %v1469_v39  ;;  %v1343_v57 = vmul.f32 %v1215_v36, %v703_v13  ;;  %v1791_v51 = vmul.f32 %v1663_v15, %v703_v13  ;;  %v8619_v13 = vld [vmem:[#allocation95_spill] sm:$0xff] }
 0x23c   : > { %3716 = vmatpush1.msk.msra.mxu0 %vm2892_vm1, %v3020_v45  ;;  %v467_v40 = vsub.f32 %v8613_v56, %v6724_v30  ;;  %v4071_v38 = vpop.eup %4070  ;;  %vm2766_vm15 = vcmp.ge.f32.partialorder %v2510_v0, 0.003921569  ;;  %v3022_v3 = vmin.f32 %v2510_v0, 0.999  ;;  %v700_v61 = vsub.f32 %v8614_v26, %v6726_v42 }
 0x23d   : > { %v2284_v19 = vmul.f32 1.442695, %v2054_v6  ;;  %vm2894_vm4 = vmand %vm2638_vm13, %vm2766_vm15  ;;  %v2501_v27 = vmul.f32 %v4071_v38, %v8618_v2  ;;  %vm2629_vm12 = vcmp.ge.f32.partialorder %v6894_v59, 0.0  ;;  %v2045_v41 = vsub.f32 0.0, %v6950_v17 }
 0x23e   : > { %v1471_v31 = vadd.f32 %v1343_v57, %v1023_v24  ;;  %3748 = vmatpush1.msk.msra.mxu1 %vm2894_vm4, %v3022_v3  ;;  %v892_v29 = vmul.f32 %v8615_v32, %v467_v40  ;;  %v1212_v53 = vmul.f32 %v8616_v35, %v700_v61  ;;  %v1660_v10 = vmul.f32 %v8617_v33, %v467_v40  ;;  %v8621_v24 = vld [vmem:[#allocation82_spill] sm:$0xff] }
 0x23f   : > { %4076 = vpow2.f32 %v2284_v19  ;;  %vm2757_vm14 = vcmp.ge.f32.partialorder %v2501_v27, 0.003921569  ;;  %v3013_v50 = vmin.f32 %v2501_v27, 0.999  ;;  %v2266_v47 = vmul.f32 1.442695, %v2045_v41 }
 0x240   : > { %v6962_v22 = vadd.f32 %v1791_v51, %v1471_v31  ;;  %vm2885_vm11 = vmand %vm2629_vm12, %vm2757_vm14  ;;  %v1020_v23 = vmul.f32 %v892_v29, %v467_v40  ;;  %v1340_v58 = vmul.f32 %v1212_v53, %v700_v61  ;;  %v1788_v59 = vmul.f32 %v1660_v10, %v700_v61  ;;  %v8622_v51 = vld [vmem:[#allocation10_spill] sm:$0xff]  ;;  %v8623_v29 = vld [vmem:[#allocation123_spill] sm:$0xff] }
 0x241   : > { %v469_v60 = vsub.f32 %v8613_v56, %v6736_v63  ;;  %3717 = vmatprep.subr.msk.mxu0 %vm2885_vm11, %v3013_v50  ;;  %vm2631_vm10 = vcmp.ge.f32.partialorder %v6912_v52, 0.0  ;;  %4078 = vpow2.f32 %v2266_v47  ;;  %v702_v62 = vsub.f32 %v8614_v26, %v6738_v5 }
 0x242   : > { %v2047_v8 = vsub.f32 0.0, %v6962_v22  ;;  %v1468_v14 = vadd.f32 %v1340_v58, %v1020_v23  ;;  %v460_v39 = vsub.f32 %v8619_v13, %v8593_v11  ;;  %v693_v45 = vsub.f32 %v8620_v21, %v8583_v16 }
 0x243   : > { %v894_v49 = vmul.f32 %v8615_v32, %v469_v60  ;;  %v1662_v18 = vmul.f32 %v8617_v33, %v469_v60  ;;  %v4073_v4 = vpop.eup %4072  ;;  %v1214_v56 = vmul.f32 %v8616_v35, %v702_v62  ;;  %v462_v36 = vsub.f32 %v8619_v13, %v6694_v55 }
 0x244   : > { %v2270_v15 = vmul.f32 1.442695, %v2047_v8  ;;  %v2503_v26 = vmul.f32 %v4073_v4, %v8618_v2  ;;  %v6980_v0 = vadd.f32 %v1788_v59, %v1468_v14  ;;  %v885_v57 = vmul.f32 %v8621_v24, %v460_v39 }
 0x245   : > { %v1022_v32 = vmul.f32 %v894_v49, %v469_v60  ;;  %v1790_v6 = vmul.f32 %v1662_v18, %v702_v62  ;;  %v1342_v33 = vmul.f32 %v1214_v56, %v702_v62  ;;  %v1205_v40 = vmul.f32 %v8622_v51, %v693_v45 }
 0x246   : > { %4080 = vpow2.f32 %v2270_v15  ;;  %vm2759_vm0 = vcmp.ge.f32.partialorder %v2503_v26, 0.003921569  ;;  %v3015_v35 = vmin.f32 %v2503_v26, 0.999  ;;  %vm2628_vm3 = vcmp.ge.f32.partialorder %v6928_v43, 0.0 }
 0x247   : > { %v4075_v38 = vpop.eup %4074  ;;  %v2044_v3 = vsub.f32 0.0, %v6980_v0  ;;  %vm2887_vm6 = vmand %vm2631_vm10, %vm2759_vm0  ;;  %v1470_v61 = vadd.f32 %v1342_v33, %v1022_v32  ;;  %v1013_v27 = vmul.f32 %v885_v57, %v460_v39  ;;  %v1333_v41 = vmul.f32 %v1205_v40, %v693_v45 }
 0x248   : > { %v2500_v19 = vmul.f32 %v4075_v38, %v8618_v2  ;;  %3749 = vmatprep.subr.msk.mxu1 %vm2887_vm6, %v3015_v35  ;;  %v1653_v53 = vmul.f32 %v8623_v29, %v460_v39  ;;  %v695_v10 = vsub.f32 %v8620_v21, %v6704_v12  ;;  %v887_v50 = vmul.f32 %v8621_v24, %v462_v36 }
 0x249   : > { %v2264_v31 = vmul.f32 1.442695, %v2044_v3  ;;  %vm2630_vm5 = vcmp.ge.f32.partialorder %v6940_v20, 0.0  ;;  %v6994_v52 = vadd.f32 %v1790_v6, %v1470_v61  ;;  %v1461_v23 = vadd.f32 %v1333_v41, %v1013_v27 }
 0x24a   : > { %vm2756_vm2 = vcmp.ge.f32.partialorder %v2500_v19, 0.003921569  ;;  %v3012_v47 = vmin.f32 %v2500_v19, 0.999  ;;  %v1781_v58 = vmul.f32 %v1653_v53, %v693_v45  ;;  %v1207_v59 = vmul.f32 %v8622_v51, %v695_v10 }
 0x24b   : > { %vm2884_vm8 = vmand %vm2628_vm3, %vm2756_vm2  ;;  %4082 = vpow2.f32 %v2264_v31  ;;  %v2046_v8 = vsub.f32 0.0, %v6994_v52  ;;  %v1015_v62 = vmul.f32 %v887_v50, %v462_v36  ;;  %v1655_v14 = vmul.f32 %v8623_v29, %v462_v36 }
 0x24c   : > { %v4077_v60 = vpop.eup %4076  ;;  %3718 = vmatpush1.msk.msra.mxu0 %vm2884_vm8, %v3012_v47  ;;  %v459_v49 = vsub.f32 %v8619_v13, %v6724_v30  ;;  %v7004_v39 = vadd.f32 %v1781_v58, %v1461_v23  ;;  %v1335_v43 = vmul.f32 %v1207_v59, %v695_v10  ;;  %v692_v4 = vsub.f32 %v8620_v21, %v6726_v42 }
 0x24d   : > { %v2502_v18 = vmul.f32 %v4077_v60, %v8618_v2  ;;  %v2268_v15 = vmul.f32 1.442695, %v2046_v8  ;;  %v1783_v56 = vmul.f32 %v1655_v14, %v695_v10  ;;  %vm2621_vm9 = vcmp.ge.f32.partialorder %v6950_v17, 0.0  ;;  %v8624_v2 = vld [vmem:[#allocation121_spill] sm:$0xff]  ;;  %v8625_v17 = vld [vmem:[#allocation56_spill] sm:$0xff] }
 0x24e   : > { %v884_v45 = vmul.f32 %v8621_v24, %v459_v49  ;;  %v1652_v26 = vmul.f32 %v8623_v29, %v459_v49  ;;  %v4079_v32 = vpop.eup %4078  ;;  %v2037_v6 = vsub.f32 0.0, %v7004_v39  ;;  %v1463_v57 = vadd.f32 %v1335_v43, %v1015_v62  ;;  %v8626_v62 = vld [vmem:[#allocation118_spill] sm:$0xff]  ;;  %v8627_v14 = vld [vmem:[#allocation120_spill] sm:$0xff] }
 0x24f   : > { %vm2758_vm7 = vcmp.ge.f32.partialorder %v2502_v18, 0.003921569  ;;  %v3014_v36 = vmin.f32 %v2502_v18, 0.999  ;;  %v2493_v33 = vmul.f32 %v4079_v32, %v8624_v2  ;;  %4084 = vpow2.f32 %v2268_v15  ;;  %v8628_v18 = vld [vmem:[#allocation80_spill] sm:$0xff] }
 0x250   : > { %vm2886_vm1 = vmand %vm2630_vm5, %vm2758_vm7  ;;  %v1012_v40 = vmul.f32 %v884_v45, %v459_v49  ;;  %v2250_v38 = vmul.f32 1.442695, %v2037_v6  ;;  %v1204_v35 = vmul.f32 %v8622_v51, %v692_v4  ;;  %v1780_v3 = vmul.f32 %v1652_v26, %v692_v4  ;;  %v8629_v6 = vld [vmem:[#allocation25_spill] sm:$0xff] }
 0x251   : > { %3750 = vmatpush1.msk.msra.mxu1 %vm2886_vm1, %v3014_v36  ;;  %v461_v19 = vsub.f32 %v8619_v13, %v6736_v63  ;;  %vm2749_vm13 = vcmp.ge.f32.partialorder %v2493_v33, 0.003921569  ;;  %v3005_v61 = vmin.f32 %v2493_v33, 0.999  ;;  %v7018_v27 = vadd.f32 %v1783_v56, %v1463_v57 }
 0x252   : > { %v694_v20 = vsub.f32 %v8620_v21, %v6738_v5  ;;  %vm2877_vm15 = vmand %vm2621_vm9, %vm2749_vm13  ;;  %4086 = vpow2.f32 %v2250_v38  ;;  %v1332_v31 = vmul.f32 %v1204_v35, %v692_v4  ;;  %vm2623_vm4 = vcmp.ge.f32.partialorder %v6962_v22, 0.0 }
 0x253   : > { %v4081_v41 = vpop.eup %4080  ;;  %v886_v53 = vmul.f32 %v8621_v24, %v461_v19  ;;  %v1654_v10 = vmul.f32 %v8623_v29, %v461_v19  ;;  %3719 = vmatprep.subr.msk.mxu0 %vm2877_vm15, %v3005_v61  ;;  %v2039_v50 = vsub.f32 0.0, %v7018_v27  ;;  %v452_v59 = vsub.f32 %v8625_v17, %v8593_v11 }
 0x254   : > { %v2495_v13 = vmul.f32 %v4081_v41, %v8624_v2  ;;  %v1206_v47 = vmul.f32 %v8622_v51, %v694_v20  ;;  %v1460_v21 = vadd.f32 %v1332_v31, %v1012_v40  ;;  %v685_v22 = vsub.f32 %v8626_v62, %v8583_v16 }
 0x255   : > { %v1014_v23 = vmul.f32 %v886_v53, %v461_v19  ;;  %v1782_v58 = vmul.f32 %v1654_v10, %v694_v20  ;;  %v2254_v24 = vmul.f32 1.442695, %v2039_v50  ;;  %v877_v49 = vmul.f32 %v8627_v14, %v452_v59 }
 0x256   : > { %vm2751_vm12 = vcmp.ge.f32.partialorder %v2495_v13, 0.003921569  ;;  %v3007_v60 = vmin.f32 %v2495_v13, 0.999  ;;  %v1334_v8 = vmul.f32 %v1206_v47, %v694_v20  ;;  %v7032_v29 = vadd.f32 %v1780_v3, %v1460_v21 }
 0x257   : > { %vm2879_vm14 = vmand %vm2623_vm4, %vm2751_vm12  ;;  %v1645_v51 = vmul.f32 %v8628_v18, %v452_v59  ;;  %4088 = vpow2.f32 %v2254_v24  ;;  %v454_v15 = vsub.f32 %v8625_v17, %v6694_v55  ;;  %v687_v56 = vsub.f32 %v8626_v62, %v6704_v12 }
 0x258   : > { %v4083_v43 = vpop.eup %4082  ;;  %3751 = vmatprep.subr.msk.mxu1 %vm2879_vm14, %v3007_v60  ;;  %v1462_v4 = vadd.f32 %v1334_v8, %v1014_v23  ;;  %vm2620_vm11 = vcmp.ge.f32.partialorder %v6980_v0, 0.0  ;;  %v2036_v26 = vsub.f32 0.0, %v7032_v29  ;;  %v1005_v36 = vmul.f32 %v877_v49, %v452_v59  ;;  %v8630_v8 = vld [vmem:[#allocation110_spill] sm:$0xff] }
 0x259   : > { %v2492_v45 = vmul.f32 %v4083_v43, %v8624_v2  ;;  %v1197_v33 = vmul.f32 %v8629_v6, %v685_v22  ;;  %v879_v57 = vmul.f32 %v8627_v14, %v454_v15  ;;  %v1199_v35 = vmul.f32 %v8629_v6, %v687_v56 }
 0x25a   : > { %v7045_v32 = vadd.f32 %v1782_v58, %v1462_v4  ;;  %v2248_v38 = vmul.f32 1.442695, %v2036_v26  ;;  %v1773_v61 = vmul.f32 %v1645_v51, %v685_v22  ;;  %v1647_v31 = vmul.f32 %v8628_v18, %v454_v15 }
 0x25b   : > { %vm2748_vm10 = vcmp.ge.f32.partialorder %v2492_v45, 0.003921569  ;;  %v3004_v40 = vmin.f32 %v2492_v45, 0.999  ;;  %v1325_v19 = vmul.f32 %v1197_v33, %v685_v22  ;;  %v1007_v0 = vmul.f32 %v879_v57, %v454_v15 }
 0x25c   : > { %vm2876_vm0 = vmand %vm2620_vm11, %vm2748_vm10  ;;  %v2038_v3 = vsub.f32 0.0, %v7045_v32  ;;  %v4085_v20 = vpop.eup %4084  ;;  %4090 = vpow2.f32 %v2248_v38  ;;  %v1327_v41 = vmul.f32 %v1199_v35, %v687_v56  ;;  %v451_v53 = vsub.f32 %v8625_v17, %v6724_v30  ;;  %v8631_v38 = vld [vmem:[#allocation21_spill] sm:$0xff] }
 0x25d   : > { %3720 = vmatpush1.msk.msra.mxu0 %vm2876_vm0, %v3004_v40  ;;  %v2494_v10 = vmul.f32 %v4085_v20, %v8624_v2  ;;  %v1453_v50 = vadd.f32 %v1325_v19, %v1005_v36  ;;  %v684_v47 = vsub.f32 %v8626_v62, %v6726_v42  ;;  %vm2622_vm3 = vcmp.ge.f32.partialorder %v6994_v52, 0.0  ;;  %v8633_v20 = vld [vmem:[#allocation126_spill] sm:$0xff] }
 0x25e   : > { %v2252_v13 = vmul.f32 1.442695, %v2038_v3  ;;  %v1455_v21 = vadd.f32 %v1327_v41, %v1007_v0  ;;  %v1775_v23 = vmul.f32 %v1647_v31, %v687_v56  ;;  %v876_v58 = vmul.f32 %v8627_v14, %v451_v53 }
 0x25f   : > { %v4087_v59 = vpop.eup %4086  ;;  %vm2750_vm6 = vcmp.ge.f32.partialorder %v2494_v10, 0.003921569  ;;  %v3006_v60 = vmin.f32 %v2494_v10, 0.999  ;;  %v7059_v24 = vadd.f32 %v1773_v61, %v1453_v50  ;;  %v1196_v49 = vmul.f32 %v8629_v6, %v684_v47  ;;  %v8632_v61 = vld [vmem:[#allocation60_spill] sm:$0xff] }
 0x260   : > { %4092 = vpow2.f32 %v2252_v13  ;;  %vm2878_vm2 = vmand %vm2622_vm3, %vm2750_vm6  ;;  %v2485_v2 = vmul.f32 %v4087_v59, %v8630_v8  ;;  %v7062_v22 = vadd.f32 %v1775_v23, %v1455_v21  ;;  %v1644_v51 = vmul.f32 %v8628_v18, %v451_v53 }
 0x261   : > { %3752 = vmatpush1.msk.msra.mxu1 %vm2878_vm2, %v3006_v60  ;;  %vm2613_vm5 = vcmp.ge.f32.partialorder %v7004_v39, 0.0  ;;  %v2029_v52 = vsub.f32 0.0, %v7059_v24  ;;  %v1004_v43 = vmul.f32 %v876_v58, %v451_v53  ;;  %v453_v4 = vsub.f32 %v8625_v17, %v6736_v63 }
 0x262   : > { %vm2741_vm8 = vcmp.ge.f32.partialorder %v2485_v2, 0.003921569  ;;  %v2997_v15 = vmin.f32 %v2485_v2, 0.999  ;;  %vm2615_vm7 = vcmp.ge.f32.partialorder %v7018_v27, 0.0  ;;  %v2031_v56 = vsub.f32 0.0, %v7062_v22 }
 0x263   : > { %vm2869_vm9 = vmand %vm2613_vm5, %vm2741_vm8  ;;  %v2234_v45 = vmul.f32 1.442695, %v2029_v52  ;;  %v1324_v26 = vmul.f32 %v1196_v49, %v684_v47  ;;  %v686_v36 = vsub.f32 %v8626_v62, %v6738_v5  ;;  %v878_v39 = vmul.f32 %v8627_v14, %v453_v4 }
 0x264   : > { %v4089_v33 = vpop.eup %4088  ;;  %3721 = vmatprep.subr.msk.mxu0 %vm2869_vm9, %v2997_v15  ;;  %vm2612_vm1 = vcmp.ge.f32.partialorder %v7032_v29, 0.0  ;;  %v2238_v57 = vmul.f32 1.442695, %v2031_v56  ;;  %v1772_v17 = vmul.f32 %v1644_v51, %v684_v47  ;;  %v1646_v40 = vmul.f32 %v8628_v18, %v453_v4  ;;  %v8634_v18 = vld [vmem:[#allocation132_spill] sm:$0xff]  ;;  %v8635_v47 = vld [vmem:[#allocation141_spill] sm:$0xff] }
 0x265   : > { %v444_v35 = vsub.f32 %v8631_v38, %v8593_v11  ;;  %v2487_v3 = vmul.f32 %v4089_v33, %v8630_v8  ;;  %4094 = vpow2.f32 %v2234_v45  ;;  %v1452_v19 = vadd.f32 %v1324_v26, %v1004_v43 }
 0x266   : > { %v677_v62 = vsub.f32 %v8632_v61, %v8583_v16  ;;  %4096 = vpow2.f32 %v2238_v57  ;;  %v1006_v14 = vmul.f32 %v878_v39, %v453_v4  ;;  %v1198_v0 = vmul.f32 %v8629_v6, %v686_v36 }
 0x267   : > { %v869_v41 = vmul.f32 %v8633_v20, %v444_v35  ;;  %vm2743_vm13 = vcmp.ge.f32.partialorder %v2487_v3, 0.003921569  ;;  %v2999_v31 = vmin.f32 %v2487_v3, 0.999  ;;  %v7084_v53 = vadd.f32 %v1772_v17, %v1452_v19 }
 0x268   : > { %v1189_v10 = vmul.f32 %v8634_v18, %v677_v62  ;;  %vm2871_vm15 = vmand %vm2615_vm7, %vm2743_vm13  ;;  %v1326_v13 = vmul.f32 %v1198_v0, %v686_v36  ;;  %v1774_v50 = vmul.f32 %v1646_v40, %v686_v36  ;;  %v1637_v21 = vmul.f32 %v8635_v47, %v444_v35 }
 0x269   : > { %v446_v23 = vsub.f32 %v8631_v38, %v6694_v55  ;;  %v4091_v58 = vpop.eup %4090  ;;  %3753 = vmatprep.subr.msk.mxu1 %vm2871_vm15, %v2999_v31  ;;  %v2028_v6 = vsub.f32 0.0, %v7084_v53  ;;  %v997_v59 = vmul.f32 %v869_v41, %v444_v35  ;;  %v679_v2 = vsub.f32 %v8632_v61, %v6704_v12 }
 0x26a   : > { %v1317_v60 = vmul.f32 %v1189_v10, %v677_v62  ;;  %v2484_v49 = vmul.f32 %v4091_v58, %v8630_v8  ;;  %v1454_v27 = vadd.f32 %v1326_v13, %v1006_v14  ;;  %v1765_v51 = vmul.f32 %v1637_v21, %v677_v62  ;;  %v8636_v58 = vld [vmem:[#allocation88_spill] sm:$0xff] }
 0x26b   : > { %v871_v52 = vmul.f32 %v8633_v20, %v446_v23  ;;  %v2232_v43 = vmul.f32 1.442695, %v2028_v6  ;;  %v1191_v15 = vmul.f32 %v8634_v18, %v679_v2  ;;  %v1639_v56 = vmul.f32 %v8635_v47, %v446_v23 }
 0x26c   : > { %v1445_v4 = vadd.f32 %v1317_v60, %v997_v59  ;;  %vm2740_vm4 = vcmp.ge.f32.partialorder %v2484_v49, 0.003921569  ;;  %v2996_v26 = vmin.f32 %v2484_v49, 0.999  ;;  %vm2614_vm12 = vcmp.ge.f32.partialorder %v7045_v32, 0.0 }
 0x26d   : > { %v4093_v45 = vpop.eup %4092  ;;  %v7100_v36 = vadd.f32 %v1774_v50, %v1454_v27  ;;  %vm2868_vm14 = vmand %vm2612_vm1, %vm2740_vm4  ;;  %4098 = vpow2.f32 %v2232_v43  ;;  %v1319_v57 = vmul.f32 %v1191_v15, %v679_v2  ;;  %v999_v40 = vmul.f32 %v871_v52, %v446_v23 }
 0x26e   : > { %v2486_v39 = vmul.f32 %v4093_v45, %v8630_v8  ;;  %v7105_v33 = vadd.f32 %v1765_v51, %v1445_v4  ;;  %3722 = vmatpush1.msk.msra.mxu0 %vm2868_vm14, %v2996_v26  ;;  %v1767_v35 = vmul.f32 %v1639_v56, %v679_v2  ;;  %v443_v3 = vsub.f32 %v8631_v38, %v6724_v30  ;;  %v8637_v45 = vld [vmem:[#allocation91_spill] sm:$0xff] }
 0x26f   : > { %v2030_v17 = vsub.f32 0.0, %v7100_v36  ;;  %vm2605_vm10 = vcmp.ge.f32.partialorder %v7059_v24, 0.0  ;;  %v1447_v62 = vadd.f32 %v1319_v57, %v999_v40  ;;  %v676_v14 = vsub.f32 %v8632_v61, %v6726_v42 }
 0x270   : > { %vm2742_vm11 = vcmp.ge.f32.partialorder %v2486_v39, 0.003921569  ;;  %v2998_v19 = vmin.f32 %v2486_v39, 0.999  ;;  %v2021_v29 = vsub.f32 0.0, %v7105_v33  ;;  %v868_v0 = vmul.f32 %v8633_v20, %v443_v3  ;;  %v8638_v39 = vld [vmem:[#allocation37_spill] sm:$0xff] }
 0x271   : > { %vm2870_vm0 = vmand %vm2614_vm12, %vm2742_vm11  ;;  %v2236_v8 = vmul.f32 1.442695, %v2030_v17  ;;  %vm2607_vm3 = vcmp.ge.f32.partialorder %v7062_v22, 0.0  ;;  %v1636_v31 = vmul.f32 %v8635_v47, %v443_v3  ;;  %v445_v10 = vsub.f32 %v8631_v38, %v6736_v63 }
 0x272   : > { %3754 = vmatpush1.msk.msra.mxu1 %vm2870_vm0, %v2998_v19  ;;  %v2218_v41 = vmul.f32 1.442695, %v2021_v29  ;;  %v4095_v13 = vpop.eup %4094  ;;  %v7121_v32 = vadd.f32 %v1767_v35, %v1447_v62  ;;  %v1188_v50 = vmul.f32 %v8634_v18, %v676_v14  ;;  %v678_v21 = vsub.f32 %v8632_v61, %v6738_v5  ;;  %v8639_v35 = vld [vmem:[#allocation139_spill] sm:$0xff]  ;;  %v8641_v62 = vld [vmem:[#allocation145_spill] sm:$0xff] }
 0x273   : > { %4100 = vpow2.f32 %v2236_v8  ;;  %v4097_v23 = vpop.eup %4096  ;;  %v2477_v6 = vmul.f32 %v4095_v13, %v8636_v58  ;;  %v996_v59 = vmul.f32 %v868_v0, %v443_v3  ;;  %v870_v60 = vmul.f32 %v8633_v20, %v445_v10  ;;  %v8640_v3 = vld [vmem:[#allocation27_spill] sm:$0xff] }
 0x274   : > { %4102 = vpow2.f32 %v2218_v41  ;;  %v2479_v2 = vmul.f32 %v4097_v23, %v8636_v58  ;;  %v2023_v38 = vsub.f32 0.0, %v7121_v32  ;;  %v1316_v49 = vmul.f32 %v1188_v50, %v676_v14 }
 0x275   : > { %v1764_v27 = vmul.f32 %v1636_v31, %v676_v14  ;;  %vm2733_vm6 = vcmp.ge.f32.partialorder %v2477_v6, 0.003921569  ;;  %v2989_v51 = vmin.f32 %v2477_v6, 0.999  ;;  %v998_v52 = vmul.f32 %v870_v60, %v445_v10 }
 0x276   : > { %v1190_v43 = vmul.f32 %v8634_v18, %v678_v21  ;;  %vm2861_vm2 = vmand %vm2605_vm10, %vm2733_vm6  ;;  %vm2735_vm5 = vcmp.ge.f32.partialorder %v2479_v2, 0.003921569  ;;  %v2991_v61 = vmin.f32 %v2479_v2, 0.999  ;;  %v2222_v4 = vmul.f32 1.442695, %v2023_v38 }
 0x277   : > { %v1444_v15 = vadd.f32 %v1316_v49, %v996_v59  ;;  %3723 = vmatprep.subr.msk.mxu0 %vm2861_vm2, %v2989_v51  ;;  %vm2863_vm8 = vmand %vm2607_vm3, %vm2735_vm5  ;;  %v1638_v56 = vmul.f32 %v8635_v47, %v445_v10  ;;  %v436_v26 = vsub.f32 %v8637_v45, %v8593_v11  ;;  %v669_v18 = vsub.f32 %v8638_v39, %v8583_v16 }
 0x278   : > { %v1318_v20 = vmul.f32 %v1190_v43, %v678_v21  ;;  %3755 = vmatprep.subr.msk.mxu1 %vm2863_vm8, %v2991_v61  ;;  %4104 = vpow2.f32 %v2222_v4  ;;  %v438_v57 = vsub.f32 %v8637_v45, %v6694_v55  ;;  %v671_v22 = vsub.f32 %v8638_v39, %v6704_v12 }
 0x279   : > { %v7140_v24 = vadd.f32 %v1764_v27, %v1444_v15  ;;  %v1766_v40 = vmul.f32 %v1638_v56, %v678_v21  ;;  %v861_v47 = vmul.f32 %v8639_v35, %v436_v26  ;;  %v1181_v19 = vmul.f32 %v8640_v3, %v669_v18 }
 0x27a   : > { %v1446_v17 = vadd.f32 %v1318_v20, %v998_v52  ;;  %v4099_v29 = vpop.eup %4098  ;;  %vm2604_vm7 = vcmp.ge.f32.partialorder %v7084_v53, 0.0  ;;  %v1629_v14 = vmul.f32 %v8641_v62, %v436_v26  ;;  %v863_v0 = vmul.f32 %v8639_v35, %v438_v57 }
 0x27b   : > { %v2020_v8 = vsub.f32 0.0, %v7140_v24  ;;  %v2476_v41 = vmul.f32 %v4099_v29, %v8636_v58  ;;  %v989_v10 = vmul.f32 %v861_v47, %v436_v26  ;;  %v1309_v13 = vmul.f32 %v1181_v19, %v669_v18 }
 0x27c   : > { %v7153_v31 = vadd.f32 %v1766_v40, %v1446_v17  ;;  %v1757_v21 = vmul.f32 %v1629_v14, %v669_v18  ;;  %v991_v23 = vmul.f32 %v863_v0, %v438_v57  ;;  %v1183_v6 = vmul.f32 %v8640_v3, %v671_v22 }
 0x27d   : > { %v2216_v50 = vmul.f32 1.442695, %v2020_v8  ;;  %vm2732_vm9 = vcmp.ge.f32.partialorder %v2476_v41, 0.003921569  ;;  %v2988_v59 = vmin.f32 %v2476_v41, 0.999  ;;  %v1437_v2 = vadd.f32 %v1309_v13, %v989_v10 }
 0x27e   : > { %vm2606_vm1 = vcmp.ge.f32.partialorder %v7100_v36, 0.0  ;;  %v2022_v60 = vsub.f32 0.0, %v7153_v31  ;;  %vm2860_vm13 = vmand %vm2604_vm7, %vm2732_vm9  ;;  %v1311_v38 = vmul.f32 %v1183_v6, %v671_v22  ;;  %v1631_v49 = vmul.f32 %v8641_v62, %v438_v57 }
 0x27f   : > { %4106 = vpow2.f32 %v2216_v50  ;;  %3724 = vmatpush1.msk.msra.mxu0 %vm2860_vm13, %v2988_v59  ;;  %vm2597_vm15 = vcmp.ge.f32.partialorder %v7105_v33, 0.0  ;;  %v435_v52 = vsub.f32 %v8637_v45, %v6724_v30  ;;  %v668_v43 = vsub.f32 %v8638_v39, %v6726_v42 }
 0x280   : > { %v4101_v27 = vpop.eup %4100  ;;  %v2220_v51 = vmul.f32 1.442695, %v2022_v60  ;;  %v7167_v4 = vadd.f32 %v1757_v21, %v1437_v2  ;;  %v1439_v15 = vadd.f32 %v1311_v38, %v991_v23  ;;  %v1759_v20 = vmul.f32 %v1631_v49, %v671_v22  ;;  %v8642_v60 = vld [vmem:[#allocation18_spill] sm:$0xff] }
 0x281   : > { %v4103_v61 = vpop.eup %4102  ;;  %v2478_v53 = vmul.f32 %v4101_v27, %v8636_v58  ;;  %v860_v26 = vmul.f32 %v8639_v35, %v435_v52  ;;  %v1180_v18 = vmul.f32 %v8640_v3, %v668_v43  ;;  %v437_v40 = vsub.f32 %v8637_v45, %v6736_v63  ;;  %v8644_v27 = vld [vmem:[#allocation93_spill] sm:$0xff] }
 0x282   : > { %v2469_v56 = vmul.f32 %v4103_v61, %v6342_v1  ;;  %4108 = vpow2.f32 %v2220_v51  ;;  %v2013_v17 = vsub.f32 0.0, %v7167_v4  ;;  %v7177_v22 = vadd.f32 %v1759_v20, %v1439_v15  ;;  %v8645_v61 = vld [vmem:[#allocation106_spill] sm:$0xff] }
 0x283   : > { %vm2734_vm4 = vcmp.ge.f32.partialorder %v2478_v53, 0.003921569  ;;  %v2990_v57 = vmin.f32 %v2478_v53, 0.999  ;;  %v988_v47 = vmul.f32 %v860_v26, %v435_v52  ;;  %v1308_v29 = vmul.f32 %v1180_v18, %v668_v43  ;;  %v8646_v53 = vld [vmem:[#allocation58_spill] sm:$0xff] }
 0x284   : > { %vm2862_vm12 = vmand %vm2606_vm1, %vm2734_vm4  ;;  %vm2725_vm14 = vcmp.ge.f32.partialorder %v2469_v56, 0.003921569  ;;  %v2981_v58 = vmin.f32 %v2469_v56, 0.999  ;;  %v2202_v19 = vmul.f32 1.442695, %v2013_v17  ;;  %v1628_v8 = vmul.f32 %v8641_v62, %v435_v52 }
 0x285   : > { %3756 = vmatpush1.msk.msra.mxu1 %vm2862_vm12, %v2990_v57  ;;  %vm2853_vm11 = vmand %vm2597_vm15, %vm2725_vm14  ;;  %v670_v14 = vsub.f32 %v8638_v39, %v6738_v5  ;;  %v4105_v45 = vpop.eup %4104  ;;  %vm2599_vm10 = vcmp.ge.f32.partialorder %v7121_v32, 0.0  ;;  %v2015_v36 = vsub.f32 0.0, %v7177_v22  ;;  %v862_v0 = vmul.f32 %v8639_v35, %v437_v40 }
 0x286   : > { %3725 = vmatprep.subr.msk.mxu0 %vm2853_vm11, %v2981_v58  ;;  %v1630_v41 = vmul.f32 %v8641_v62, %v437_v40  ;;  %v2471_v33 = vmul.f32 %v4105_v45, %v6342_v1  ;;  %4110 = vpow2.f32 %v2202_v19  ;;  %v1436_v10 = vadd.f32 %v1308_v29, %v988_v47  ;;  %v8643_v62 = vld [vmem:[#allocation133_spill] sm:$0xff] }
 0x287   : > { %v1756_v13 = vmul.f32 %v1628_v8, %v668_v43  ;;  %v2206_v50 = vmul.f32 1.442695, %v2015_v36  ;;  %v990_v21 = vmul.f32 %v862_v0, %v437_v40  ;;  %v1182_v23 = vmul.f32 %v8640_v3, %v670_v14 }
 0x288   : > { %v1758_v39 = vmul.f32 %v1630_v41, %v670_v14  ;;  %vm2727_vm0 = vcmp.ge.f32.partialorder %v2471_v33, 0.003921569  ;;  %v2983_v6 = vmin.f32 %v2471_v33, 0.999  ;;  %v428_v2 = vsub.f32 %v8642_v60, %v8593_v11 }
 0x289   : > { %v7190_v59 = vadd.f32 %v1756_v13, %v1436_v10  ;;  %vm2855_vm3 = vmand %vm2599_vm10, %vm2727_vm0  ;;  %4112 = vpow2.f32 %v2206_v50  ;;  %v1310_v35 = vmul.f32 %v1182_v23, %v670_v14  ;;  %v661_v38 = vsub.f32 %v8643_v62, %v8583_v16 }
 0x28a   : > { %v430_v49 = vsub.f32 %v8642_v60, %v6694_v55  ;;  %3757 = vmatprep.subr.msk.mxu1 %vm2855_vm3, %v2983_v6  ;;  %vm2596_vm6 = vcmp.ge.f32.partialorder %v7140_v24, 0.0  ;;  %v853_v51 = vmul.f32 %v8644_v27, %v428_v2  ;;  %v1621_v15 = vmul.f32 %v8646_v53, %v428_v2 }
 0x28b   : > { %v2012_v3 = vsub.f32 0.0, %v7190_v59  ;;  %v1438_v43 = vadd.f32 %v1310_v35, %v990_v21  ;;  %v1173_v32 = vmul.f32 %v8645_v61, %v661_v38  ;;  %v663_v20 = vsub.f32 %v8643_v62, %v6704_v12 }
 0x28c   : > { %v4107_v52 = vpop.eup %4106  ;;  %vm2598_vm2 = vcmp.ge.f32.partialorder %v7153_v31, 0.0  ;;  %v855_v18 = vmul.f32 %v8644_v27, %v430_v49  ;;  %v981_v17 = vmul.f32 %v853_v51, %v428_v2  ;;  %v1623_v29 = vmul.f32 %v8646_v53, %v430_v49 }
 0x28d   : > { %v2468_v56 = vmul.f32 %v4107_v52, %v6342_v1  ;;  %v2200_v26 = vmul.f32 1.442695, %v2012_v3  ;;  %v7210_v57 = vadd.f32 %v1758_v39, %v1438_v43  ;;  %v1301_v40 = vmul.f32 %v1173_v32, %v661_v38 }
 0x28e   : > { %v1175_v58 = vmul.f32 %v8645_v61, %v663_v20  ;;  %v1749_v36 = vmul.f32 %v1621_v15, %v661_v38  ;;  %v983_v0 = vmul.f32 %v855_v18, %v430_v49  ;;  %v427_v33 = vsub.f32 %v8642_v60, %v6724_v30  ;;  %v8647_v49 = vld [vmem:[#allocation102_spill] sm:$0xff] }
 0x28f   : > { %v4109_v47 = vpop.eup %4108  ;;  %vm2724_vm5 = vcmp.ge.f32.partialorder %v2468_v56, 0.003921569  ;;  %v2980_v19 = vmin.f32 %v2468_v56, 0.999  ;;  %4114 = vpow2.f32 %v2200_v26  ;;  %v2014_v14 = vsub.f32 0.0, %v7210_v57 }
 0x290   : > { %vm2852_vm8 = vmand %vm2596_vm6, %vm2724_vm5  ;;  %v2470_v8 = vmul.f32 %v4109_v47, %v6342_v1  ;;  %v1429_v45 = vadd.f32 %v1301_v40, %v981_v17  ;;  %v1303_v41 = vmul.f32 %v1175_v58, %v663_v20  ;;  %v660_v10 = vsub.f32 %v8643_v62, %v6726_v42  ;;  %v8648_v58 = vld [vmem:[#allocation15_spill] sm:$0xff] }
 0x291   : > { %3726 = vmatpush1.msk.msra.mxu0 %vm2852_vm8, %v2980_v19  ;;  %v2204_v50 = vmul.f32 1.442695, %v2014_v14  ;;  %v1751_v21 = vmul.f32 %v1623_v29, %v663_v20  ;;  %v852_v23 = vmul.f32 %v8644_v27, %v427_v33  ;;  %v1620_v35 = vmul.f32 %v8646_v53, %v427_v33 }
 0x292   : > { %vm2726_vm7 = vcmp.ge.f32.partialorder %v2470_v8, 0.003921569  ;;  %v2982_v13 = vmin.f32 %v2470_v8, 0.999  ;;  %v7222_v24 = vadd.f32 %v1749_v36, %v1429_v45  ;;  %v1431_v1 = vadd.f32 %v1303_v41, %v983_v0  ;;  %v8650_v36 = vld [vmem:[#allocation151_spill] sm:$0xff] }
 0x293   : > { %vm2854_vm9 = vmand %vm2598_vm2, %vm2726_vm7  ;;  %v1172_v39 = vmul.f32 %v8645_v61, %v660_v10  ;;  %v4111_v6 = vpop.eup %4110  ;;  %4116 = vpow2.f32 %v2204_v50  ;;  %v429_v38 = vsub.f32 %v8642_v60, %v6736_v63  ;;  %vm2589_vm1 = vcmp.ge.f32.partialorder %v7167_v4, 0.0 }
 0x294   : > { %3758 = vmatpush1.msk.msra.mxu1 %vm2854_vm9, %v2982_v13  ;;  %v2005_v2 = vsub.f32 0.0, %v7222_v24  ;;  %v2461_v3 = vmul.f32 %v4111_v6, %v8647_v49  ;;  %v7234_v31 = vadd.f32 %v1751_v21, %v1431_v1  ;;  %vm2591_vm13 = vcmp.ge.f32.partialorder %v7177_v22, 0.0  ;;  %v8652_v13 = vld [vmem:[#allocation49_spill] sm:$0xff] }
 0x295   : > { %v1300_v51 = vmul.f32 %v1172_v39, %v660_v10  ;;  %v980_v43 = vmul.f32 %v852_v23, %v427_v33  ;;  %v662_v32 = vsub.f32 %v8643_v62, %v6738_v5  ;;  %vm2588_vm4 = vcmp.ge.f32.partialorder %v7190_v59, 0.0  ;;  %v8651_v33 = vld [vmem:[#allocation153_spill] sm:$0xff] }
 0x296   : > { %v2186_v52 = vmul.f32 1.442695, %v2005_v2  ;;  %v4113_v15 = vpop.eup %4112  ;;  %vm2717_vm15 = vcmp.ge.f32.partialorder %v2461_v3, 0.003921569  ;;  %v2973_v20 = vmin.f32 %v2461_v3, 0.999  ;;  %v854_v56 = vmul.f32 %v8644_v27, %v429_v38 }
 0x297   : > { %v2007_v60 = vsub.f32 0.0, %v7234_v31  ;;  %vm2845_vm12 = vmand %vm2589_vm1, %vm2717_vm15  ;;  %v2463_v4 = vmul.f32 %v4113_v15, %v8647_v49  ;;  %v1428_v26 = vadd.f32 %v1300_v51, %v980_v43  ;;  %v1748_v18 = vmul.f32 %v1620_v35, %v660_v10  ;;  %v8649_v27 = vld [vmem:[#allocation86_spill] sm:$0xff] }
 0x298   : > { %4118 = vpow2.f32 %v2186_v52  ;;  %3727 = vmatprep.subr.msk.mxu0 %vm2845_vm12, %v2973_v20  ;;  %v1174_v40 = vmul.f32 %v8645_v61, %v662_v32  ;;  %v1622_v62 = vmul.f32 %v8646_v53, %v429_v38  ;;  %v420_v47 = vsub.f32 %v8648_v58, %v8593_v11 }
 0x299   : > { %v2190_v17 = vmul.f32 1.442695, %v2007_v60  ;;  %vm2719_vm14 = vcmp.ge.f32.partialorder %v2463_v4, 0.003921569  ;;  %v2975_v19 = vmin.f32 %v2463_v4, 0.999  ;;  %v7247_v29 = vadd.f32 %v1748_v18, %v1428_v26 }
 0x29a   : > { %v653_v8 = vsub.f32 %v8649_v27, %v8583_v16  ;;  %vm2847_vm11 = vmand %vm2591_vm13, %vm2719_vm14  ;;  %v982_v14 = vmul.f32 %v854_v56, %v429_v38  ;;  %v1302_v45 = vmul.f32 %v1174_v40, %v662_v32  ;;  %v845_v61 = vmul.f32 %v8650_v36, %v420_v47 }
 0x29b   : > { %4120 = vpow2.f32 %v2190_v17  ;;  %3759 = vmatprep.subr.msk.mxu1 %vm2847_vm11, %v2975_v19  ;;  %v2004_v53 = vsub.f32 0.0, %v7247_v29  ;;  %v1750_v41 = vmul.f32 %v1622_v62, %v662_v32  ;;  %v1613_v50 = vmul.f32 %v8652_v13, %v420_v47 }
 0x29c   : > { %v4115_v0 = vpop.eup %4114  ;;  %v1165_v10 = vmul.f32 %v8651_v33, %v653_v8  ;;  %v1430_v21 = vadd.f32 %v1302_v45, %v982_v14  ;;  %v973_v23 = vmul.f32 %v845_v61, %v420_v47  ;;  %v422_v22 = vsub.f32 %v8648_v58, %v6694_v55 }
 0x29d   : > { %v2460_v1 = vmul.f32 %v4115_v0, %v8647_v49  ;;  %v2184_v39 = vmul.f32 1.442695, %v2004_v53  ;;  %v1741_v2 = vmul.f32 %v1613_v50, %v653_v8  ;;  %v655_v35 = vsub.f32 %v8649_v27, %v6704_v12 }
 0x29e   : > { %v1293_v6 = vmul.f32 %v1165_v10, %v653_v8  ;;  %v7262_v3 = vadd.f32 %v1750_v41, %v1430_v21  ;;  %v847_v51 = vmul.f32 %v8650_v36, %v422_v22  ;;  %v1615_v32 = vmul.f32 %v8652_v13, %v422_v22 }
 0x29f   : > { %vm2716_vm10 = vcmp.ge.f32.partialorder %v2460_v1, 0.003921569  ;;  %v2972_v38 = vmin.f32 %v2460_v1, 0.999  ;;  %4122 = vpow2.f32 %v2184_v39  ;;  %v1167_v43 = vmul.f32 %v8651_v33, %v655_v35 }
 0x2a0   : > { %vm2844_vm0 = vmand %vm2588_vm4, %vm2716_vm10  ;;  %v1421_v52 = vadd.f32 %v1293_v6, %v973_v23  ;;  %v4117_v15 = vpop.eup %4116  ;;  %vm2590_vm3 = vcmp.ge.f32.partialorder %v7210_v57, 0.0  ;;  %v2006_v20 = vsub.f32 0.0, %v7262_v3  ;;  %v975_v60 = vmul.f32 %v847_v51, %v422_v22 }
 0x2a1   : > { %3728 = vmatpush1.msk.msra.mxu0 %vm2844_vm0, %v2972_v38  ;;  %v419_v56 = vsub.f32 %v8648_v58, %v6724_v30  ;;  %v2462_v4 = vmul.f32 %v4117_v15, %v8647_v49  ;;  %v1295_v26 = vmul.f32 %v1167_v43, %v655_v35  ;;  %v1743_v18 = vmul.f32 %v1615_v32, %v655_v35 }
 0x2a2   : > { %v7274_v59 = vadd.f32 %v1741_v2, %v1421_v52  ;;  %v2188_v17 = vmul.f32 1.442695, %v2006_v20  ;;  %v652_v40 = vsub.f32 %v8649_v27, %v6726_v42  ;;  %vm2581_vm2 = vcmp.ge.f32.partialorder %v7222_v24, 0.0  ;;  %v8653_v2 = vld [vmem:[#allocation16_spill] sm:$0xff]  ;;  %v8654_v52 = vld [vmem:[#allocation53_spill] sm:$0xff] }
 0x2a3   : > { %v844_v62 = vmul.f32 %v8650_v36, %v419_v56  ;;  %v1612_v47 = vmul.f32 %v8652_v13, %v419_v56  ;;  %vm2718_vm6 = vcmp.ge.f32.partialorder %v2462_v4, 0.003921569  ;;  %v2974_v19 = vmin.f32 %v2462_v4, 0.999  ;;  %v8656_v4 = vld [vmem:[#allocation29_spill] sm:$0xff] }
 0x2a4   : > { %v1997_v8 = vsub.f32 0.0, %v7274_v59  ;;  %vm2846_vm5 = vmand %vm2590_vm3, %vm2718_vm6  ;;  %vm2583_vm8 = vcmp.ge.f32.partialorder %v7234_v31, 0.0  ;;  %4124 = vpow2.f32 %v2188_v17  ;;  %v1423_v49 = vadd.f32 %v1295_v26, %v975_v60  ;;  %v8655_v60 = vld [vmem:[#allocation100_spill] sm:$0xff] }
 0x2a5   : > { %v4119_v14 = vpop.eup %4118  ;;  %v1164_v45 = vmul.f32 %v8651_v33, %v652_v40  ;;  %3760 = vmatpush1.msk.msra.mxu1 %vm2846_vm5, %v2974_v19  ;;  %v972_v53 = vmul.f32 %v844_v62, %v419_v56  ;;  %v421_v41 = vsub.f32 %v8648_v58, %v6736_v63  ;;  %v1740_v1 = vmul.f32 %v1612_v47, %v652_v40 }
 0x2a6   : > { %v2453_v61 = vmul.f32 %v4119_v14, %v6410_v44  ;;  %v2170_v0 = vmul.f32 1.442695, %v1997_v8  ;;  %v7289_v10 = vadd.f32 %v1743_v18, %v1423_v49  ;;  %v654_v57 = vsub.f32 %v8649_v27, %v6738_v5  ;;  %v8657_v18 = vld [vmem:[#allocation103_spill] sm:$0xff] }
 0x2a7   : > { %v1292_v50 = vmul.f32 %v1164_v45, %v652_v40  ;;  %v846_v22 = vmul.f32 %v8650_v36, %v421_v41  ;;  %v412_v35 = vsub.f32 %v8653_v2, %v8593_v11  ;;  %v1614_v51 = vmul.f32 %v8652_v13, %v421_v41 }
 0x2a8   : > { %v4121_v21 = vpop.eup %4120  ;;  %vm2709_vm7 = vcmp.ge.f32.partialorder %v2453_v61, 0.003921569  ;;  %v2965_v23 = vmin.f32 %v2453_v61, 0.999  ;;  %4126 = vpow2.f32 %v2170_v0  ;;  %v1999_v58 = vsub.f32 0.0, %v7289_v10 }
 0x2a9   : > { %vm2837_vm9 = vmand %vm2581_vm2, %vm2709_vm7  ;;  %v2455_v39 = vmul.f32 %v4121_v21, %v6410_v44  ;;  %v1420_v6 = vadd.f32 %v1292_v50, %v972_v53  ;;  %v974_v38 = vmul.f32 %v846_v22, %v421_v41  ;;  %v1166_v27 = vmul.f32 %v8651_v33, %v654_v57 }
 0x2aa   : > { %3729 = vmatprep.subr.msk.mxu0 %vm2837_vm9, %v2965_v23  ;;  %v645_v36 = vsub.f32 %v8654_v52, %v8583_v16  ;;  %v2174_v43 = vmul.f32 1.442695, %v1999_v58  ;;  %v1742_v20 = vmul.f32 %v1614_v51, %v654_v57  ;;  %v837_v56 = vmul.f32 %v8655_v60, %v412_v35 }
 0x2ab   : > { %vm2711_vm1 = vcmp.ge.f32.partialorder %v2455_v39, 0.003921569  ;;  %v2967_v24 = vmin.f32 %v2455_v39, 0.999  ;;  %v7304_v32 = vadd.f32 %v1740_v1, %v1420_v6  ;;  %v1294_v15 = vmul.f32 %v1166_v27, %v654_v57 }
 0x2ac   : > { %vm2839_vm13 = vmand %vm2583_vm8, %vm2711_vm1  ;;  %v1157_v26 = vmul.f32 %v8656_v4, %v645_v36  ;;  %v4123_v33 = vpop.eup %4122  ;;  %vm2580_vm15 = vcmp.ge.f32.partialorder %v7247_v29, 0.0  ;;  %4128 = vpow2.f32 %v2174_v43  ;;  %v1605_v17 = vmul.f32 %v8657_v18, %v412_v35 }
 0x2ad   : > { %3761 = vmatprep.subr.msk.mxu1 %vm2839_vm13, %v2967_v24  ;;  %v1996_v13 = vsub.f32 0.0, %v7304_v32  ;;  %v2452_v40 = vmul.f32 %v4123_v33, %v6410_v44  ;;  %v1422_v62 = vadd.f32 %v1294_v15, %v974_v38  ;;  %v965_v31 = vmul.f32 %v837_v56, %v412_v35 }
 0x2ae   : > { %v1285_v47 = vmul.f32 %v1157_v26, %v645_v36  ;;  %v1733_v8 = vmul.f32 %v1605_v17, %v645_v36  ;;  %v414_v14 = vsub.f32 %v8653_v2, %v6694_v55  ;;  %v647_v49 = vsub.f32 %v8654_v52, %v6704_v12 }
 0x2af   : > { %v2168_v19 = vmul.f32 1.442695, %v1996_v13  ;;  %vm2708_vm4 = vcmp.ge.f32.partialorder %v2452_v40, 0.003921569  ;;  %v2964_v45 = vmin.f32 %v2452_v40, 0.999  ;;  %v7318_v61 = vadd.f32 %v1742_v20, %v1422_v62 }
 0x2b0   : > { %v1413_v0 = vadd.f32 %v1285_v47, %v965_v31  ;;  %vm2836_vm12 = vmand %vm2580_vm15, %vm2708_vm4  ;;  %v839_v53 = vmul.f32 %v8655_v60, %v414_v14  ;;  %v1159_v41 = vmul.f32 %v8656_v4, %v647_v49  ;;  %v1607_v50 = vmul.f32 %v8657_v18, %v414_v14 }
 0x2b1   : > { %4130 = vpow2.f32 %v2168_v19  ;;  %v4125_v1 = vpop.eup %4124  ;;  %3730 = vmatpush1.msk.msra.mxu0 %vm2836_vm12, %v2964_v45  ;;  %vm2582_vm14 = vcmp.ge.f32.partialorder %v7262_v3, 0.0  ;;  %v1998_v57 = vsub.f32 0.0, %v7318_v61  ;;  %v411_v23 = vsub.f32 %v8653_v2, %v6724_v30 }
 0x2b2   : > { %v7327_v21 = vadd.f32 %v1733_v8, %v1413_v0  ;;  %v2454_v29 = vmul.f32 %v4125_v1, %v6410_v44  ;;  %v967_v22 = vmul.f32 %v839_v53, %v414_v14  ;;  %v1287_v39 = vmul.f32 %v1159_v41, %v647_v49  ;;  %v8658_v44 = vld [vmem:[#allocation8_spill] sm:$0xff]  ;;  %v8659_v14 = vld [vmem:[#allocation13_spill] sm:$0xff]  ;;  %v8660_v53 = vld [vmem:[#allocation159_spill] sm:$0xff] }
 0x2b3   : > { %v1735_v58 = vmul.f32 %v1607_v50, %v647_v49  ;;  %vm2573_vm11 = vcmp.ge.f32.partialorder %v7274_v59, 0.0  ;;  %v2172_v6 = vmul.f32 1.442695, %v1998_v57  ;;  %v644_v38 = vsub.f32 %v8654_v52, %v6726_v42  ;;  %v8661_v57 = vld [vmem:[#allocation99_spill] sm:$0xff] }
 0x2b4   : > { %v1989_v35 = vsub.f32 0.0, %v7327_v21  ;;  %vm2710_vm10 = vcmp.ge.f32.partialorder %v2454_v29, 0.003921569  ;;  %v2966_v51 = vmin.f32 %v2454_v29, 0.999  ;;  %v1415_v36 = vadd.f32 %v1287_v39, %v967_v22  ;;  %v8662_v22 = vld [vmem:[#allocation166_spill] sm:$0xff] }
 0x2b5   : > { %v4127_v27 = vpop.eup %4126  ;;  %v836_v24 = vmul.f32 %v8655_v60, %v411_v23  ;;  %vm2838_vm0 = vmand %vm2582_vm14, %vm2710_vm10  ;;  %4132 = vpow2.f32 %v2172_v6  ;;  %v1156_v20 = vmul.f32 %v8656_v4, %v644_v38  ;;  %v1604_v33 = vmul.f32 %v8657_v18, %v411_v23 }
 0x2b6   : > { %v2445_v43 = vmul.f32 %v4127_v27, %v8658_v44  ;;  %v2154_v15 = vmul.f32 1.442695, %v1989_v35  ;;  %3762 = vmatpush1.msk.msra.mxu1 %vm2838_vm0, %v2966_v51  ;;  %v7341_v56 = vadd.f32 %v1735_v58, %v1415_v36  ;;  %v413_v13 = vsub.f32 %v8653_v2, %v6736_v63 }
 0x2b7   : > { %v964_v26 = vmul.f32 %v836_v24, %v411_v23  ;;  %v1284_v3 = vmul.f32 %v1156_v20, %v644_v38  ;;  %vm2575_vm2 = vcmp.ge.f32.partialorder %v7289_v10, 0.0  ;;  %v1732_v62 = vmul.f32 %v1604_v33, %v644_v38  ;;  %v8663_v38 = vld [vmem:[#allocation81_spill] sm:$0xff] }
 0x2b8   : > { %vm2701_vm3 = vcmp.ge.f32.partialorder %v2445_v43, 0.003921569  ;;  %v2957_v17 = vmin.f32 %v2445_v43, 0.999  ;;  %4134 = vpow2.f32 %v2154_v15  ;;  %v1991_v40 = vsub.f32 0.0, %v7341_v56 }
 0x2b9   : > { %vm2829_vm6 = vmand %vm2573_vm11, %vm2701_vm3  ;;  %v646_v31 = vsub.f32 %v8654_v52, %v6738_v5  ;;  %v4129_v47 = vpop.eup %4128  ;;  %v1412_v19 = vadd.f32 %v1284_v3, %v964_v26  ;;  %v838_v2 = vmul.f32 %v8655_v60, %v413_v13  ;;  %v1606_v8 = vmul.f32 %v8657_v18, %v413_v13 }
 0x2ba   : > { %3731 = vmatprep.subr.msk.mxu0 %vm2829_vm6, %v2957_v17  ;;  %v404_v49 = vsub.f32 %v8659_v14, %v8593_v11  ;;  %v2447_v59 = vmul.f32 %v4129_v47, %v8658_v44  ;;  %v2158_v45 = vmul.f32 1.442695, %v1991_v40  ;;  %v637_v41 = vsub.f32 %v8660_v53, %v8583_v16 }
 0x2bb   : > { %v1158_v0 = vmul.f32 %v8656_v4, %v646_v31  ;;  %v7360_v50 = vadd.f32 %v1732_v62, %v1412_v19  ;;  %v966_v52 = vmul.f32 %v838_v2, %v413_v13  ;;  %v1734_v1 = vmul.f32 %v1606_v8, %v646_v31 }
 0x2bc   : > { %v829_v23 = vmul.f32 %v8661_v57, %v404_v49  ;;  %vm2703_vm5 = vcmp.ge.f32.partialorder %v2447_v59, 0.003921569  ;;  %v2959_v60 = vmin.f32 %v2447_v59, 0.999  ;;  %4136 = vpow2.f32 %v2158_v45 }
 0x2bd   : > { %v1286_v18 = vmul.f32 %v1158_v0, %v646_v31  ;;  %vm2831_vm8 = vmand %vm2575_vm2, %vm2703_vm5  ;;  %vm2572_vm7 = vcmp.ge.f32.partialorder %v7304_v32, 0.0  ;;  %vm2574_vm9 = vcmp.ge.f32.partialorder %v7318_v61, 0.0  ;;  %v1988_v4 = vsub.f32 0.0, %v7360_v50 }
 0x2be   : > { %v4131_v29 = vpop.eup %4130  ;;  %v1149_v39 = vmul.f32 %v8662_v22, %v637_v41  ;;  %3763 = vmatprep.subr.msk.mxu1 %vm2831_vm8, %v2959_v60  ;;  %v957_v35 = vmul.f32 %v829_v23, %v404_v49  ;;  %v1597_v27 = vmul.f32 %v8663_v38, %v404_v49  ;;  %v406_v10 = vsub.f32 %v8659_v14, %v6694_v55 }
 0x2bf   : > { %v2444_v58 = vmul.f32 %v4131_v29, %v8658_v44  ;;  %v1414_v6 = vadd.f32 %v1286_v18, %v966_v52  ;;  %v2152_v51 = vmul.f32 1.442695, %v1988_v4  ;;  %v639_v24 = vsub.f32 %v8660_v53, %v6704_v12 }
 0x2c0   : > { %v1277_v36 = vmul.f32 %v1149_v39, %v637_v41  ;;  %v1725_v20 = vmul.f32 %v1597_v27, %v637_v41  ;;  %v831_v33 = vmul.f32 %v8661_v57, %v406_v10  ;;  %vm2565_vm15 = vcmp.ge.f32.partialorder %v7327_v21, 0.0  ;;  %v8664_v27 = vld [vmem:[#allocation11_spill] sm:$0xff] }
 0x2c1   : > { %vm2700_vm1 = vcmp.ge.f32.partialorder %v2444_v58, 0.003921569  ;;  %v2956_v43 = vmin.f32 %v2444_v58, 0.999  ;;  %v7375_v15 = vadd.f32 %v1734_v1, %v1414_v6  ;;  %4138 = vpow2.f32 %v2152_v51 }
 0x2c2   : > { %vm2828_vm13 = vmand %vm2572_vm7, %vm2700_vm1  ;;  %v1405_v26 = vadd.f32 %v1277_v36, %v957_v35  ;;  %v1151_v13 = vmul.f32 %v8662_v22, %v639_v24  ;;  %v4133_v17 = vpop.eup %4132  ;;  %v403_v40 = vsub.f32 %v8659_v14, %v6724_v30  ;;  %v636_v62 = vsub.f32 %v8660_v53, %v6726_v42 }
 0x2c3   : > { %3732 = vmatpush1.msk.msra.mxu0 %vm2828_vm13, %v2956_v43  ;;  %v1990_v3 = vsub.f32 0.0, %v7375_v15  ;;  %v2446_v32 = vmul.f32 %v4133_v17, %v8658_v44  ;;  %v1599_v19 = vmul.f32 %v8663_v38, %v406_v10  ;;  %v959_v49 = vmul.f32 %v831_v33, %v406_v10  ;;  %v8666_v33 = vld [vmem:[#allocation46_spill] sm:$0xff] }
 0x2c4   : > { %v7388_v31 = vadd.f32 %v1725_v20, %v1405_v26  ;;  %v1279_v47 = vmul.f32 %v1151_v13, %v639_v24  ;;  %v828_v59 = vmul.f32 %v8661_v57, %v403_v40  ;;  %v1148_v45 = vmul.f32 %v8662_v22, %v636_v62 }
 0x2c5   : > { %v4135_v2 = vpop.eup %4134  ;;  %v2156_v8 = vmul.f32 1.442695, %v1990_v3  ;;  %vm2702_vm4 = vcmp.ge.f32.partialorder %v2446_v32, 0.003921569  ;;  %v2958_v0 = vmin.f32 %v2446_v32, 0.999  ;;  %v1727_v1 = vmul.f32 %v1599_v19, %v639_v24 }
 0x2c6   : > { %v2437_v41 = vmul.f32 %v4135_v2, %v6503_v28  ;;  %v1981_v52 = vsub.f32 0.0, %v7388_v31  ;;  %vm2830_vm12 = vmand %vm2574_vm9, %vm2702_vm4  ;;  %v1407_v44 = vadd.f32 %v1279_v47, %v959_v49  ;;  %v956_v23 = vmul.f32 %v828_v59, %v403_v40  ;;  %v8665_v24 = vld [vmem:[#allocation162_spill] sm:$0xff] }
 0x2c7   : > { %4140 = vpow2.f32 %v2156_v8  ;;  %3764 = vmatpush1.msk.msra.mxu1 %vm2830_vm12, %v2958_v0  ;;  %v1276_v29 = vmul.f32 %v1148_v45, %v636_v62  ;;  %vm2567_vm10 = vcmp.ge.f32.partialorder %v7341_v56, 0.0  ;;  %v1596_v39 = vmul.f32 %v8663_v38, %v403_v40  ;;  %v8668_v56 = vld [vmem:[#allocation127_spill] sm:$0xff] }
 0x2c8   : > { %vm2693_vm14 = vcmp.ge.f32.partialorder %v2437_v41, 0.003921569  ;;  %v2949_v60 = vmin.f32 %v2437_v41, 0.999  ;;  %v2138_v18 = vmul.f32 1.442695, %v1981_v52  ;;  %v7400_v4 = vadd.f32 %v1727_v1, %v1407_v44 }
 0x2c9   : > { %vm2821_vm11 = vmand %vm2565_vm15, %vm2693_vm14  ;;  %v405_v61 = vsub.f32 %v8659_v14, %v6736_v63  ;;  %v4137_v58 = vpop.eup %4136  ;;  %v1404_v6 = vadd.f32 %v1276_v29, %v956_v23  ;;  %v638_v35 = vsub.f32 %v8660_v53, %v6738_v5  ;;  %v396_v21 = vsub.f32 %v8664_v27, %v8593_v11 }
 0x2ca   : > { %3733 = vmatprep.subr.msk.mxu0 %vm2821_vm11, %v2949_v60  ;;  %4142 = vpow2.f32 %v2138_v18  ;;  %v2439_v51 = vmul.f32 %v4137_v58, %v6503_v28  ;;  %v1983_v36 = vsub.f32 0.0, %v7400_v4  ;;  %v1724_v10 = vmul.f32 %v1596_v39, %v636_v62 }
 0x2cb   : > { %v629_v43 = vsub.f32 %v8665_v24, %v8583_v16  ;;  %v830_v14 = vmul.f32 %v8661_v57, %v405_v61  ;;  %v1150_v20 = vmul.f32 %v8662_v22, %v638_v35  ;;  %v1598_v26 = vmul.f32 %v8663_v38, %v405_v61  ;;  %v8667_v38 = vld [vmem:[#allocation109_spill] sm:$0xff] }
 0x2cc   : > { %v821_v13 = vmul.f32 %v8666_v33, %v396_v21  ;;  %vm2695_vm0 = vcmp.ge.f32.partialorder %v2439_v51, 0.003921569  ;;  %v2951_v53 = vmin.f32 %v2439_v51, 0.999  ;;  %v2142_v17 = vmul.f32 1.442695, %v1983_v36 }
 0x2cd   : > { %v7417_v3 = vadd.f32 %v1724_v10, %v1404_v6  ;;  %vm2823_vm3 = vmand %vm2567_vm10, %vm2695_vm0  ;;  %vm2564_vm6 = vcmp.ge.f32.partialorder %v7360_v50, 0.0  ;;  %v958_v40 = vmul.f32 %v830_v14, %v405_v61  ;;  %v1278_v62 = vmul.f32 %v1150_v20, %v638_v35 }
 0x2ce   : > { %v4139_v32 = vpop.eup %4138  ;;  %3765 = vmatprep.subr.msk.mxu1 %vm2823_vm3, %v2951_v53  ;;  %vm2566_vm2 = vcmp.ge.f32.partialorder %v7375_v15, 0.0  ;;  %4144 = vpow2.f32 %v2142_v17  ;;  %v1726_v22 = vmul.f32 %v1598_v26, %v638_v35  ;;  %v1141_v47 = vmul.f32 %v8667_v38, %v629_v43 }
 0x2cf   : > { %v1980_v57 = vsub.f32 0.0, %v7417_v3  ;;  %v2436_v19 = vmul.f32 %v4139_v32, %v6503_v28  ;;  %v1406_v2 = vadd.f32 %v1278_v62, %v958_v40  ;;  %v949_v8 = vmul.f32 %v821_v13, %v396_v21 }
 0x2d0   : > { %v1589_v49 = vmul.f32 %v8668_v56, %v396_v21  ;;  %v1269_v45 = vmul.f32 %v1141_v47, %v629_v43  ;;  %v398_v0 = vsub.f32 %v8664_v27, %v6694_v55  ;;  %v631_v41 = vsub.f32 %v8665_v24, %v6704_v12 }
 0x2d1   : > { %v2136_v59 = vmul.f32 1.442695, %v1980_v57  ;;  %vm2692_vm5 = vcmp.ge.f32.partialorder %v2436_v19, 0.003921569  ;;  %v2948_v52 = vmin.f32 %v2436_v19, 0.999  ;;  %v7431_v44 = vadd.f32 %v1726_v22, %v1406_v2 }
 0x2d2   : > { %v1717_v1 = vmul.f32 %v1589_v49, %v629_v43  ;;  %vm2820_vm8 = vmand %vm2564_vm6, %vm2692_vm5  ;;  %v1397_v23 = vadd.f32 %v1269_v45, %v949_v8  ;;  %v823_v60 = vmul.f32 %v8666_v33, %v398_v0  ;;  %v1143_v18 = vmul.f32 %v8667_v38, %v631_v41 }
 0x2d3   : > { %4146 = vpow2.f32 %v2136_v59  ;;  %3734 = vmatpush1.msk.msra.mxu0 %vm2820_vm8, %v2948_v52  ;;  %v1982_v39 = vsub.f32 0.0, %v7431_v44  ;;  %v1591_v61 = vmul.f32 %v8668_v56, %v398_v0  ;;  %v395_v58 = vsub.f32 %v8664_v27, %v6724_v30  ;;  %v8670_v52 = vld [vmem:[#allocation14_spill] sm:$0xff] }
 0x2d4   : > { %v4141_v29 = vpop.eup %4140  ;;  %v628_v6 = vsub.f32 %v8665_v24, %v6726_v42  ;;  %v7444_v35 = vadd.f32 %v1717_v1, %v1397_v23  ;;  %v951_v21 = vmul.f32 %v823_v60, %v398_v0  ;;  %v1271_v51 = vmul.f32 %v1143_v18, %v631_v41  ;;  %v8671_v18 = vld [vmem:[#allocation63_spill] sm:$0xff] }
 0x2d5   : > { %v2438_v50 = vmul.f32 %v4141_v29, %v6503_v28  ;;  %v2140_v36 = vmul.f32 1.442695, %v1982_v39  ;;  %v1719_v10 = vmul.f32 %v1591_v61, %v631_v41  ;;  %v820_v43 = vmul.f32 %v8666_v33, %v395_v58  ;;  %v8669_v28 = vld [vmem:[#allocation72_spill] sm:$0xff] }
 0x2d6   : > { %v1140_v14 = vmul.f32 %v8667_v38, %v628_v6  ;;  %vm2557_vm9 = vcmp.ge.f32.partialorder %v7388_v31, 0.0  ;;  %v1973_v13 = vsub.f32 0.0, %v7444_v35  ;;  %v1399_v17 = vadd.f32 %v1271_v51, %v951_v21 }
 0x2d7   : > { %v4143_v20 = vpop.eup %4142  ;;  %vm2694_vm7 = vcmp.ge.f32.partialorder %v2438_v50, 0.003921569  ;;  %v2950_v26 = vmin.f32 %v2438_v50, 0.999  ;;  %4148 = vpow2.f32 %v2140_v36  ;;  %v948_v40 = vmul.f32 %v820_v43, %v395_v58  ;;  %v8673_v50 = vld [vmem:[#allocation48_spill] sm:$0xff] }
 0x2d8   : > { %vm2822_vm1 = vmand %vm2566_vm2, %vm2694_vm7  ;;  %v2429_v53 = vmul.f32 %v4143_v20, %v8669_v28  ;;  %v2122_v62 = vmul.f32 1.442695, %v1973_v13  ;;  %v1268_v32 = vmul.f32 %v1140_v14, %v628_v6  ;;  %v1588_v57 = vmul.f32 %v8668_v56, %v395_v58  ;;  %v8672_v58 = vld [vmem:[#allocation114_spill] sm:$0xff] }
 0x2d9   : > { %3766 = vmatpush1.msk.msra.mxu1 %vm2822_vm1, %v2950_v26  ;;  %v397_v22 = vsub.f32 %v8664_v27, %v6736_v63  ;;  %v7456_v19 = vadd.f32 %v1719_v10, %v1399_v17  ;;  %v630_v15 = vsub.f32 %v8665_v24, %v6738_v5  ;;  %vm2559_vm4 = vcmp.ge.f32.partialorder %v7400_v4, 0.0  ;;  %v8674_v10 = vld [vmem:[#allocation122_spill] sm:$0xff] }
 0x2da   : > { %vm2685_vm13 = vcmp.ge.f32.partialorder %v2429_v53, 0.003921569  ;;  %v2941_v47 = vmin.f32 %v2429_v53, 0.999  ;;  %4150 = vpow2.f32 %v2122_v62  ;;  %v1396_v2 = vadd.f32 %v1268_v32, %v948_v40 }
 0x2db   : > { %vm2813_vm15 = vmand %vm2557_vm9, %vm2685_vm13  ;;  %v1716_v8 = vmul.f32 %v1588_v57, %v628_v6  ;;  %v822_v49 = vmul.f32 %v8666_v33, %v397_v22  ;;  %v4145_v59 = vpop.eup %4144  ;;  %v1975_v27 = vsub.f32 0.0, %v7456_v19  ;;  %v1142_v45 = vmul.f32 %v8667_v38, %v630_v15 }
 0x2dc   : > { %3735 = vmatprep.subr.msk.mxu0 %vm2813_vm15, %v2941_v47  ;;  %v1590_v0 = vmul.f32 %v8668_v56, %v397_v22  ;;  %v2431_v24 = vmul.f32 %v4145_v59, %v8669_v28  ;;  %v388_v1 = vsub.f32 %v8670_v52, %v8593_v11  ;;  %v621_v29 = vsub.f32 %v8671_v18, %v8583_v16 }
 0x2dd   : > { %v7468_v41 = vadd.f32 %v1716_v8, %v1396_v2  ;;  %v950_v31 = vmul.f32 %v822_v49, %v397_v22  ;;  %v2126_v23 = vmul.f32 1.442695, %v1975_v27  ;;  %v1270_v33 = vmul.f32 %v1142_v45, %v630_v15 }
 0x2de   : > { %v1718_v60 = vmul.f32 %v1590_v0, %v630_v15  ;;  %vm2687_vm12 = vcmp.ge.f32.partialorder %v2431_v24, 0.003921569  ;;  %v2943_v39 = vmin.f32 %v2431_v24, 0.999  ;;  %vm2556_vm14 = vcmp.ge.f32.partialorder %v7417_v3, 0.0 }
 0x2df   : > { %v1972_v38 = vsub.f32 0.0, %v7468_v41  ;;  %vm2815_vm11 = vmand %vm2559_vm4, %vm2687_vm12  ;;  %4152 = vpow2.f32 %v2126_v23  ;;  %v1398_v61 = vadd.f32 %v1270_v33, %v950_v31  ;;  %v813_v6 = vmul.f32 %v8672_v58, %v388_v1 }
 0x2e0   : > { %v4147_v56 = vpop.eup %4146  ;;  %v1133_v21 = vmul.f32 %v8673_v50, %v621_v29  ;;  %3767 = vmatprep.subr.msk.mxu1 %vm2815_vm11, %v2943_v39  ;;  %v1581_v43 = vmul.f32 %v8674_v10, %v388_v1  ;;  %v390_v14 = vsub.f32 %v8670_v52, %v6694_v55  ;;  %vm2558_vm10 = vcmp.ge.f32.partialorder %v7431_v44, 0.0 }
 0x2e1   : > { %v2428_v51 = vmul.f32 %v4147_v56, %v8669_v28  ;;  %v2120_v36 = vmul.f32 1.442695, %v1972_v38  ;;  %v7485_v20 = vadd.f32 %v1718_v60, %v1398_v61  ;;  %v941_v4 = vmul.f32 %v813_v6, %v388_v1 }
 0x2e2   : > { %v1261_v26 = vmul.f32 %v1133_v21, %v621_v29  ;;  %v623_v53 = vsub.f32 %v8671_v18, %v6704_v12  ;;  %v1709_v62 = vmul.f32 %v1581_v43, %v621_v29  ;;  %v815_v32 = vmul.f32 %v8672_v58, %v390_v14 }
 0x2e3   : > { %vm2684_vm0 = vcmp.ge.f32.partialorder %v2428_v51, 0.003921569  ;;  %v2940_v13 = vmin.f32 %v2428_v51, 0.999  ;;  %4154 = vpow2.f32 %v2120_v36  ;;  %v1974_v17 = vsub.f32 0.0, %v7485_v20 }
 0x2e4   : > { %vm2812_vm3 = vmand %vm2556_vm14, %vm2684_vm0  ;;  %v1389_v40 = vadd.f32 %v1261_v26, %v941_v4  ;;  %v4149_v57 = vpop.eup %4148  ;;  %v1135_v22 = vmul.f32 %v8673_v50, %v623_v53  ;;  %v1583_v47 = vmul.f32 %v8674_v10, %v390_v14  ;;  %v387_v15 = vsub.f32 %v8670_v52, %v6724_v30 }
 0x2e5   : > { %3736 = vmatpush1.msk.msra.mxu0 %vm2812_vm3, %v2940_v13  ;;  %v620_v2 = vsub.f32 %v8671_v18, %v6726_v42  ;;  %v2430_v3 = vmul.f32 %v4149_v57, %v8669_v28  ;;  %vm2549_vm6 = vcmp.ge.f32.partialorder %v7444_v35, 0.0  ;;  %v2124_v8 = vmul.f32 1.442695, %v1974_v17 }
 0x2e6   : > { %v7501_v49 = vadd.f32 %v1709_v62, %v1389_v40  ;;  %v943_v59 = vmul.f32 %v815_v32, %v390_v14  ;;  %v1263_v27 = vmul.f32 %v1135_v22, %v623_v53  ;;  %v812_v45 = vmul.f32 %v8672_v58, %v387_v15 }
 0x2e7   : > { %v1132_v0 = vmul.f32 %v8673_v50, %v620_v2  ;;  %v4151_v24 = vpop.eup %4150  ;;  %vm2686_vm2 = vcmp.ge.f32.partialorder %v2430_v3, 0.003921569  ;;  %v2942_v31 = vmin.f32 %v2430_v3, 0.999  ;;  %4156 = vpow2.f32 %v2124_v8 }
 0x2e8   : > { %v1965_v1 = vsub.f32 0.0, %v7501_v49  ;;  %vm2814_vm5 = vmand %vm2558_vm10, %vm2686_vm2  ;;  %v2421_v28 = vmul.f32 %v4151_v24, %v6582_v9  ;;  %v1391_v23 = vadd.f32 %v1263_v27, %v943_v59  ;;  %v1711_v33 = vmul.f32 %v1583_v47, %v623_v53 }
 0x2e9   : > { %v940_v60 = vmul.f32 %v812_v45, %v387_v15  ;;  %3768 = vmatpush1.msk.msra.mxu1 %vm2814_vm5, %v2942_v31  ;;  %v1260_v39 = vmul.f32 %v1132_v0, %v620_v2  ;;  %v1580_v38 = vmul.f32 %v8674_v10, %v387_v15  ;;  %v389_v56 = vsub.f32 %v8670_v52, %v6736_v63 }
 0x2ea   : > { %v2106_v29 = vmul.f32 1.442695, %v1965_v1  ;;  %vm2677_vm8 = vcmp.ge.f32.partialorder %v2421_v28, 0.003921569  ;;  %v2933_v61 = vmin.f32 %v2421_v28, 0.999  ;;  %v7512_v6 = vadd.f32 %v1711_v33, %v1391_v23 }
 0x2eb   : > { %v622_v44 = vsub.f32 %v8671_v18, %v6738_v5  ;;  %vm2805_vm7 = vmand %vm2549_vm6, %vm2677_vm8  ;;  %v1388_v21 = vadd.f32 %v1260_v39, %v940_v60  ;;  %v1708_v51 = vmul.f32 %v1580_v38, %v620_v2  ;;  %v814_v36 = vmul.f32 %v8672_v58, %v389_v56 }
 0x2ec   : > { %4158 = vpow2.f32 %v2106_v29  ;;  %v4153_v43 = vpop.eup %4152  ;;  %3737 = vmatprep.subr.msk.mxu0 %vm2805_vm7, %v2933_v61  ;;  %vm2551_vm9 = vcmp.ge.f32.partialorder %v7456_v19, 0.0  ;;  %v1967_v52 = vsub.f32 0.0, %v7512_v6  ;;  %v1582_v4 = vmul.f32 %v8674_v10, %v389_v56 }
 0x2ed   : > { %v1134_v14 = vmul.f32 %v8673_v50, %v622_v44  ;;  %v2423_v18 = vmul.f32 %v4153_v43, %v6582_v9  ;;  %vm2548_vm1 = vcmp.ge.f32.partialorder %v7468_v41, 0.0  ;;  %v7525_v35 = vadd.f32 %v1708_v51, %v1388_v21 }
 0x2ee   : > { %v942_v26 = vmul.f32 %v814_v36, %v389_v56  ;;  %v2110_v13 = vmul.f32 1.442695, %v1967_v52  ;;  %v1710_v58 = vmul.f32 %v1582_v4, %v622_v44  ;;  %v380_v17 = vsub.f32 %v8573_v25, %v8593_v11  ;;  %v3314_v4 = vpop.f32.mrf.mxu1 }
 0x2ef   : > { %v1262_v53 = vmul.f32 %v1134_v14, %v622_v44  ;;  %vm2679_vm13 = vcmp.ge.f32.partialorder %v2423_v18, 0.003921569  ;;  %v2935_v62 = vmin.f32 %v2423_v18, 0.999  ;;  %v1964_v50 = vsub.f32 0.0, %v7525_v35  ;;  %v3243_v44 = vpop.f32.mrf.mxu0  ;;  %v3168_v14 = vld [vmem:[#allocation2 + $0x30] sm:$0xff] }
 0x2f0   : > { %v4155_v40 = vpop.eup %4154  ;;  %v613_v10 = vsub.f32 %v8576_v37, %v8583_v16  ;;  %vm2807_vm15 = vmand %vm2551_vm9, %vm2679_vm13  ;;  %4160 = vpow2.f32 %v2110_v13  ;;  %v805_v22 = vmul.f32 %v8476_v54, %v380_v17  ;;  %v1573_v15 = vmul.f32 %v8557_v46, %v380_v17 }
 0x2f1   : > { %v2420_v32 = vmul.f32 %v4155_v40, %v6582_v9  ;;  %v1390_v57 = vadd.f32 %v1262_v53, %v942_v26  ;;  %3769 = vmatprep.subr.msk.mxu1 %vm2807_vm15, %v2935_v62  ;;  %v2104_v47 = vmul.f32 1.442695, %v1964_v50  ;;  %v382_v2 = vsub.f32 %v8573_v25, %v6694_v55  ;;  %v3170_v40 = vld [vmem:[#allocation2 + $0x18] sm:$0xff]  ;;  %v3169_v62 = vld [vmem:[#allocation2] sm:$0xff]  ;;  %v3245_v50 = vpop.f32.mrf.mxu0 }
 0x2f2   : > { %v1125_v11 = vmul.f32 %v8520_v34, %v613_v10  ;;  %v933_v19 = vmul.f32 %v805_v22, %v380_v17  ;;  %v1701_v59 = vmul.f32 %v1573_v15, %v613_v10  ;;  %v615_v27 = vsub.f32 %v8576_v37, %v6704_v12 }
 0x2f3   : > { %vm2676_vm4 = vcmp.ge.f32.partialorder %v2420_v32, 0.003921569  ;;  %v2932_v16 = vmin.f32 %v2420_v32, 0.999  ;;  %v7540_v3 = vadd.f32 %v1710_v58, %v1390_v57  ;;  %4162 = vpow2.f32 %v2104_v47 }
 0x2f4   : > { %vm2804_vm12 = vmand %vm2548_vm1, %vm2676_vm4  ;;  %v1253_v8 = vmul.f32 %v1125_v11, %v613_v10  ;;  %v4157_v45 = vpop.eup %4156  ;;  %vm2550_vm14 = vcmp.ge.f32.partialorder %v7485_v20, 0.0  ;;  %v807_v0 = vmul.f32 %v8476_v54, %v382_v2  ;;  %v1575_v24 = vmul.f32 %v8557_v46, %v382_v2 }
 0x2f5   : > { %3738 = vmatpush1.msk.msra.mxu0 %vm2804_vm12, %v2932_v16  ;;  %v1966_v55 = vsub.f32 0.0, %v7540_v3  ;;  %v2422_v31 = vmul.f32 %v4157_v45, %v6582_v9  ;;  %v1127_v1 = vmul.f32 %v8520_v34, %v615_v27  ;;  %v379_v28 = vsub.f32 %v8573_v25, %v6724_v30 }
 0x2f6   : > { %v1381_v41 = vadd.f32 %v1253_v8, %v933_v19  ;;  %v935_v12 = vmul.f32 %v807_v0, %v382_v2  ;;  %v1703_v33 = vmul.f32 %v1575_v24, %v615_v27  ;;  %v612_v60 = vsub.f32 %v8576_v37, %v6726_v42 }
 0x2f7   : > { %v2108_v23 = vmul.f32 1.442695, %v1966_v55  ;;  %vm2678_vm11 = vcmp.ge.f32.partialorder %v2422_v31, 0.003921569  ;;  %v2934_v29 = vmin.f32 %v2422_v31, 0.999  ;;  %v1255_v38 = vmul.f32 %v1127_v1, %v615_v27 }
 0x2f8   : > { %v7556_v39 = vadd.f32 %v1701_v59, %v1381_v41  ;;  %vm2806_vm10 = vmand %vm2550_vm14, %vm2678_vm11  ;;  %v804_v9 = vmul.f32 %v8476_v54, %v379_v28  ;;  %v1124_v30 = vmul.f32 %v8520_v34, %v612_v60  ;;  %v1572_v61 = vmul.f32 %v8557_v46, %v379_v28 }
 0x2f9   : > { %v4159_v56 = vpop.eup %4158  ;;  %4164 = vpow2.f32 %v2108_v23  ;;  %3770 = vmatpush1.msk.msra.mxu1 %vm2806_vm10, %v2934_v29  ;;  %vm2541_vm0 = vcmp.ge.f32.partialorder %v7501_v49, 0.0  ;;  %v1383_v51 = vadd.f32 %v1255_v38, %v935_v12  ;;  %v381_v52 = vsub.f32 %v8573_v25, %v6736_v63 }
 0x2fa   : > { %v2413_v42 = vmul.f32 %v4159_v56, %v6435_v7  ;;  %v1957_v21 = vsub.f32 0.0, %v7556_v39  ;;  %v932_v36 = vmul.f32 %v804_v9, %v379_v28  ;;  %v1252_v43 = vmul.f32 %v1124_v30, %v612_v60  ;;  %v3172_v30 = vld [vmem:[#allocation2 + $0x8] sm:$0xff] }
 0x2fb   : > { %v1700_v20 = vmul.f32 %v1572_v61, %v612_v60  ;;  %v7568_v13 = vadd.f32 %v1703_v33, %v1383_v51  ;;  %v614_v49 = vsub.f32 %v8576_v37, %v6738_v5  ;;  %v806_v58 = vmul.f32 %v8476_v54, %v381_v52  ;;  %v3171_v5 = vld [vmem:[#allocation2 + $0x10] sm:$0xff]  ;;  %v3316_v54 = vpop.f32.mrf.mxu1 }
 0x2fc   : > { %vm2669_vm3 = vcmp.ge.f32.partialorder %v2413_v42, 0.003921569  ;;  %v2925_v18 = vmin.f32 %v2413_v42, 0.999  ;;  %v2090_v26 = vmul.f32 1.442695, %v1957_v21  ;;  %v1380_v53 = vadd.f32 %v1252_v43, %v932_v36 }
 0x2fd   : > { %vm2797_vm6 = vmand %vm2541_vm0, %vm2669_vm3  ;;  %v1574_v17 = vmul.f32 %v8557_v46, %v381_v52  ;;  %v4161_v25 = vpop.eup %4160  ;;  %v1959_v63 = vsub.f32 0.0, %v7568_v13  ;;  %v3461_v10 = vadd.f32 %v3243_v44, %v3168_v14  ;;  %vm2543_vm2 = vcmp.ge.f32.partialorder %v7512_v6, 0.0  ;;  %v3173_v44 = vld [vmem:[#allocation2 + $0x20] sm:$0xff]  ;;  %v3174_v36 = vld [vmem:[#allocation2 + $0x28] sm:$0xff] }
 0x2fe   : > { %3739 = vmatprep.subr.msk.mxu0 %vm2797_vm6, %v2925_v18  ;;  %4166 = vpow2.f32 %v2090_v26  ;;  %v2415_v32 = vmul.f32 %v4161_v25, %v6435_v7  ;;  %v1828_v57 = vadd.f32 %v1700_v20, %v1380_v53  ;;  %v1126_v37 = vmul.f32 %v8520_v34, %v614_v49  ;;  %v3175_v20 = vld [vmem:[#allocation2 + $0x38] sm:$0xff] }
 0x2ff   : > { %v2094_v22 = vmul.f32 1.442695, %v1959_v63  ;;  %v934_v46 = vmul.f32 %v806_v58, %v381_v52  ;;  %3469 = vst [vmem:[#allocation2 + $0x30] sm:$0xff] %v3461_v10  ;;  %v3463_v47 = vadd.f32 %v3314_v4, %v3170_v40  ;;  %v3462_v11 = vadd.f32 %v3245_v50, %v3169_v62 }
 0x300   : > { %v4163_v15 = vpop.eup %4162  ;;  %vm2671_vm5 = vcmp.ge.f32.partialorder %v2415_v32, 0.003921569  ;;  %v2927_v2 = vmin.f32 %v2415_v32, 0.999  ;;  %v1956_v16 = vsub.f32 0.0, %v1828_v57  ;;  %v1702_v19 = vmul.f32 %v1574_v17, %v614_v49 }
 0x301   : > { %vm2799_vm8 = vmand %vm2543_vm2, %vm2671_vm5  ;;  %v2412_v8 = vmul.f32 %v4163_v15, %v6435_v7  ;;  %4168 = vpow2.f32 %v2094_v22  ;;  %v1254_v59 = vmul.f32 %v1126_v37, %v614_v49  ;;  %3471 = vst [vmem:[#allocation2 + $0x18] sm:$0xff] %v3463_v47  ;;  %v3464_v34 = vadd.f32 %v3316_v54, %v3171_v5 }
 0x302   : > { %3470 = vst [vmem:[#allocation2] sm:$0xff] %v3462_v11  ;;  %3771 = vmatprep.subr.msk.mxu1 %vm2799_vm8, %v2927_v2  ;;  %v2088_v27 = vmul.f32 1.442695, %v1956_v16  ;;  %vm2540_vm7 = vcmp.ge.f32.partialorder %v7525_v35, 0.0  ;;  %vm2542_vm13 = vcmp.ge.f32.partialorder %v7540_v3, 0.0  ;;  %vm2533_vm12 = vcmp.ge.f32.partialorder %v7556_v39, 0.0 }
 0x303   : > { %vm2668_vm9 = vcmp.ge.f32.partialorder %v2412_v8, 0.003921569  ;;  %v2924_v45 = vmin.f32 %v2412_v8, 0.999  ;;  %v1382_v55 = vadd.f32 %v1254_v59, %v934_v46  ;;  %3472 = vst [vmem:[#allocation2 + $0x10] sm:$0xff] %v3464_v34  ;;  %vm2535_vm10 = vcmp.ge.f32.partialorder %v7568_v13, 0.0 }
 0x304   : > { %vm2796_vm1 = vmand %vm2540_vm7, %vm2668_vm9  ;;  %4170 = vpow2.f32 %v2088_v27  ;;  %vm2532_vm6 = vcmp.ge.f32.partialorder %v1828_v57, 0.0  ;;  %v4184_v39 = vld [vmem:[%s4397_s22] sm:$0xff] }
 0x305   : > { %3740 = vmatpush1.msk.msra.mxu0 %vm2796_vm1, %v2924_v45  ;;  %v1830_v6 = vadd.f32 %v1702_v19, %v1382_v55 }
 0x306   : > { %v4165_v0 = vpop.eup %4164 }
 0x307   : > { %v2414_v24 = vmul.f32 %v4165_v0, %v6435_v7  ;;  %v1958_v31 = vsub.f32 0.0, %v1830_v6  ;;  %vm2534_vm8 = vcmp.ge.f32.partialorder %v1830_v6, 0.0 }
 0x309   : > { %vm2670_vm15 = vcmp.ge.f32.partialorder %v2414_v24, 0.003921569  ;;  %v2926_v41 = vmin.f32 %v2414_v24, 0.999  ;;  %v2092_v1 = vmul.f32 1.442695, %v1958_v31 }
 0x30a   : > { %vm2798_vm4 = vmand %vm2542_vm13, %vm2670_vm15 }
 0x30b   : > { %v4167_v28 = vpop.eup %4166  ;;  %3772 = vmatpush1.msk.msra.mxu1 %vm2798_vm4, %v2926_v41  ;;  %4172 = vpow2.f32 %v2092_v1 }
 0x30c   : > { %v2405_v35 = vmul.f32 %v4167_v28, %v6721_v48 }
 0x30e   : > { %vm2661_vm14 = vcmp.ge.f32.partialorder %v2405_v35, 0.003921569  ;;  %v2917_v23 = vmin.f32 %v2405_v35, 0.999  ;;  %v4169_v12 = vpop.eup %4168 }
 0x30f   : > { %vm2789_vm11 = vmand %vm2533_vm12, %vm2661_vm14  ;;  %v2407_v7 = vmul.f32 %v4169_v12, %v6721_v48 }
 0x310   : > { %3741 = vmatprep.subr.msk.mxu0 %vm2789_vm11, %v2917_v23 }
 0x311   : > { %v4171_v3 = vpop.eup %4170  ;;  %vm2663_vm0 = vcmp.ge.f32.partialorder %v2407_v7, 0.003921569  ;;  %v2919_v33 = vmin.f32 %v2407_v7, 0.999 }
 0x312   : > { %vm2791_vm3 = vmand %vm2535_vm10, %vm2663_vm0  ;;  %v2404_v60 = vmul.f32 %v4171_v3, %v6721_v48 }
 0x313   : > { %3773 = vmatprep.subr.msk.mxu1 %vm2791_vm3, %v2919_v33 }
 0x314   : > { %vm2660_vm2 = vcmp.ge.f32.partialorder %v2404_v60, 0.003921569  ;;  %v2916_v29 = vmin.f32 %v2404_v60, 0.999 }
 0x315   : > { %vm2788_vm5 = vmand %vm2532_vm6, %vm2660_vm2 }
 0x316   : > { %3742 = vmatpush1.msk.msra.mxu0 %vm2788_vm5, %v2916_v29 }
 0x317   : > { %3384 = vmatmul.mubr.f32.vlgmr.msra.gmra.mxu0 %v4184_v39 }
 0x318   : > { %v4173_v38 = vpop.eup %4172 }
 0x319   : > { %v2406_v56 = vmul.f32 %v4173_v38, %v6721_v48 }
 0x31b   : > { %vm2662_vm7 = vcmp.ge.f32.partialorder %v2406_v56, 0.003921569  ;;  %v2918_v9 = vmin.f32 %v2406_v56, 0.999 }
 0x31c   : > { %vm2790_vm9 = vmand %vm2534_vm8, %vm2662_vm7 }
 0x31d   : > { %3774 = vmatpush1.msk.msra.mxu1 %vm2790_vm9, %v2918_v9 }
 0x31e   : > { %3455 = vmatmul.mubr.f32.vlgmr.msra.gmra.mxu1 %v4184_v39 }
 0x3d7   : > { %v3385_v61 = vpop.f32.mrf.mxu0 }
 0x3d8   : > { %v3465_v42 = vadd.f32 %v3385_v61, %v3172_v30 }
 0x3d9   : > { %v3387_v21 = vpop.f32.mrf.mxu0 }
 0x3da   : > { %3473 = vst [vmem:[#allocation2 + $0x8] sm:$0xff] %v3465_v42  ;;  %v3466_v51 = vadd.f32 %v3387_v21, %v3173_v44 }
 0x3dc   : > { %3474 = vst [vmem:[#allocation2 + $0x20] sm:$0xff] %v3466_v51 }
 0x3de   : > { %v3456_v43 = vpop.f32.mrf.mxu1 }
 0x3df   : > { %v3467_v52 = vadd.f32 %v3456_v43, %v3174_v36  ;;  %3480 = sbr.rel (%p3775_p2) target bundleno = 1010 (0x3f2), region = 40 }
 0x3e0   : > { %v3458_v14 = vpop.f32.mrf.mxu1 }
 0x3e1   : > { %3475 = vst [vmem:[#allocation2 + $0x28] sm:$0xff] %v3467_v52  ;;  %v3468_v48 = vadd.f32 %v3458_v14, %v3175_v20 }
 0x3e3   : > { %3476 = vst [vmem:[#allocation2 + $0x38] sm:$0xff] %v3468_v48 }
 0x3e4   : > { %v3481_v4 = vld [vmem:[#allocation2 + $0x30] sm:$0x7]  ;;  %v3482_v18 = vld [vmem:[#allocation2] sm:$0x7]  ;;  %v3483_v26 = vld [vmem:[#allocation2 + $0x18] sm:$0x7] }
 0x3e5   : > { %v3489_v13 = vmax.f32 %v3481_v4, 0.0  ;;  %v3490_v53 = vmax.f32 %v3482_v18, 0.0  ;;  %v3484_v49 = vld [vmem:[#allocation2 + $0x10] sm:$0x7]  ;;  %v3491_v58 = vmax.f32 %v3483_v26, 0.0 }
 0x3e6   : > { %v3492_v17 = vmax.f32 %v3484_v49, 0.0  ;;  %v3485_v40 = vld [vmem:[#allocation2 + $0x8] sm:$0x7]  ;;  %v3486_v62 = vld [vmem:[#allocation2 + $0x20] sm:$0x7] }
 0x3e7   : > { %v3497_v50 = vmin.f32 %v3489_v13, 1.0  ;;  %v3498_v25 = vmin.f32 %v3490_v53, 1.0  ;;  %v3499_v63 = vmin.f32 %v3491_v58, 1.0  ;;  %v3493_v10 = vmax.f32 %v3485_v40, 0.0 }
 0x3e8   : > { %v3487_v32 = vld [vmem:[#allocation2 + $0x28] sm:$0x7]  ;;  %v3500_v57 = vmin.f32 %v3492_v17, 1.0  ;;  %v3494_v37 = vmax.f32 %v3486_v62, 0.0 }
 0x3e9   : > { %v3495_v54 = vmax.f32 %v3487_v32, 0.0  ;;  %v3513_v22 = vcombine.low %v3497_v50, %v3498_v25  ;;  %v3501_v46 = vmin.f32 %v3493_v10, 1.0 }
 0x3ea   : > { %v3488_v5 = vld [vmem:[#allocation2 + $0x38] sm:$0x7]  ;;  %v3514_v11 = vcombine.low %v3499_v63, %v3500_v57  ;;  %v3502_v15 = vmin.f32 %v3494_v37, 1.0 }
 0x3eb   : > { %v3496_v47 = vmax.f32 %v3488_v5, 0.0  ;;  %v3503_v2 = vmin.f32 %v3495_v54, 1.0  ;;  %3521 = vst [vmem:[%s4399_s30] sm:$0x77] %v3513_v22 }
 0x3ec   : > { %3522 = vst [vmem:[%s4399_s30 + $0x8] sm:$0x77] %v3514_v11  ;;  %v3515_v19 = vcombine.low %v3501_v46, %v3502_v15 }
 0x3ed   : > { %v3504_v16 = vmin.f32 %v3496_v47, 1.0 }
 0x3ee   : > { %3523 = vst [vmem:[%s4399_s30 + $0x10] sm:$0x77] %v3515_v19 }
 0x3ef   : > { %v3516_v8 = vcombine.low %v3503_v2, %v3504_v16 }
 0x3f1   : > { %3524 = vst [vmem:[%s4399_s30 + $0x18] sm:$0x77] %v3516_v8 }
 0x3f2 PF: > { %s3781_s15 = sshll.u32 %s4265_s16, 9  ;;  %s3540_s4 = sshll.u32 %s4399_s30, 4  ;;  %s3541_s4 = int_to_ptr.vmem [resolvable:$true] %s3540_s4 }
 0x3f3   : > { %s3538_s29 = scalar_lea.hbm %s7646_s3, %s3781_s15  ;;  %s8675_s5 = sand.u32 1, %s4253_s13  }
 0x3f4   : > { %s3526_s6 = scalar_lea.sflag [#allocation4], %s8675_s5  ;;  %s4185_s7 = scalar_lea.vmem %s3541_s4, 512 }
 0x3f5   : > { %p4186_p4 = scmp.ne.s32.totalorder %s3541_s4, %s4185_s7  ;;  %s4287_s8 = smov [#allocation3]  }
 0x3f6   : > { %s4189_s9 = sshll.u32 %s4287_s8, 4  ;;  %s4190_s9 = int_to_ptr.vmem [resolvable:$false] %s4189_s9 }
 0x3f7   : > { %p4187_p5 = pnand %p4186_p4, %p4357_p3  ;;  %s4191_s10 = scalar_lea.vmem %s4190_s9, 1024 }
 0x3f8   : > { %p4192_p7 = scmp.lt.s32.totalorder %s3541_s4, %s4190_s9  ;;  %p4193_p8 = scmp.lt.s32.totalorder %s4191_s10, %s4185_s7 }
 0x3f9   : > { %p4188_p6 = pneg %p4187_p5 }
 0x3fa   : > { %p4194_p10 = por %p4193_p8, %p4192_p7 }
 0x3fc   : > { %p4195_p11 = pnand %p4194_p10, %p4188_p6 }
 0x3fe   : > { %4198 = shalt.err (!%p4195_p11)
}
 0x3ff   : > { %s4199_s16 = scalar_lea.hbm %s3538_s29, 512  ;;  %s4203_s21 = scalar_lea.hbm %s7646_s3, 2048 }
 0x400   : > { %p4200_p12 = scmp.ne.s32.totalorder %s3538_s29, %s4199_s16  ;;  %p4204_p1 = scmp.lt.s32.totalorder %s3538_s29, %s7646_s3 }
 0x401   : > { %p4205_p2 = scmp.lt.s32.totalorder %s4203_s21, %s4199_s16 }
 0x402   : > { %p4201_p13 = pnand %p4200_p12, %p4357_p3 }
 0x403   : > { %p4206_p4 = por %p4205_p2, %p4204_p1 }
 0x404   : > { %p4202_p0 = pneg %p4201_p13 }
 0x406   : > { %p4207_p5 = pnand %p4206_p4, %p4202_p0 }
 0x408   : > { %4210 = shalt.err (!%p4207_p5)
}
 0x409   : > { %3782 = dma.vmem_to_hbm [thread:$0]  (%p4357_p3), %s3541_s4, 512, %s3538_s29, %s3526_s6  }
 0x40a PF: > { %p3788_p6 = scmp.ge.s32.totalorder %s4277_s19, 2  ;;  %s3552_s30 = sand.u32 1, %s4249_s12  }
 0x40b   : > { %s3553_s15 = scalar_lea.sflag [#allocation4], %s3552_s30 }
 0x40c   : > { %p3785_p7 = pnand %p3788_p6, %p4367_p9 }
 0x40e   : > { %p3786_p8 = pneg %p3785_p7 }
 0x410   : > { %4244 = dma.done.wait (%p3786_p8), %s3553_s15, 512  }
 0x411   : > { %4246 = vsyncadd (%p3786_p8), %s3553_s15, 4294966784  ;;  %s16_s19 = sadd.s32 1, %s4277_s19   ;;  %s8676_s24 = sld [smem:[#allocation6_spill]] }
 0x412   : > { %p13_p10 = scmp.ge.s32.totalorder %s16_s19, 10   ;;  %s8677_s22 = sld [smem:[#allocation7_spill]] }
 0x413   : > { %s8678_s12 = smov %s4253_s13  ;;  %s8679_s13 = smov %s4257_s14 }
 0x414   : > { %s8680_s14 = smov %s4375_s28  ;;  %s8681_s15 = smov %s4269_s17 }
 0x415   : > { %s8682_s16 = smov %s4273_s18  ;;  %15 = sbr.rel (!%p13_p10) target bundleno = 5 (0x5), region = 82 }
 0x417   : > { %s8683_s17 = smov %s8676_s24 }
 0x418   : > { %s8684_s18 = smov %s8677_s22 }
 0x41a   :  { %3558 = vsyncpa [#allocation4], 1 }
 0x41b   :  { %3560 = vsyncpa [#allocation4 + $0x1], 1 }

</bundles_post_ra>
